<compile_context>
chip_gen: v6e
topology: v6e:2x2x1
jax: 0.10.0
libtpu: 0.0.40
codegen_flags: <defaults>
</compile_context>

<pallas_src>
import functools

import jax
import jax.numpy as jnp
from jax.experimental import pallas as pl
from jax.experimental.pallas import tpu as pltpu


def _upconv_kernel(core_ref, top_ref, bot_ref, m_ref, b_ref, o_ref, xp_ref):
    """Sub-pixel (2x-upsample + 3x3 conv) on one row-tile of the ORIGINAL image.

    core_ref : (1, TH, W, C)      input rows h*TH .. h*TH+TH-1
    top_ref  : (1, 1, W, C)       input row h*TH-1   (clamped; used iff h > 0)
    bot_ref  : (1, 1, W, C)       input row (h+1)*TH (clamped; used iff h < last)
    m_ref    : (12, C, 2C)        phase weights, k = (py*2 + r)*3 + cc
    b_ref    : (1, 2C)            f32 bias duplicated for the two width phases
    o_ref    : (1, TH, 2, W, 2C)  output block; row-major identical to the
                                  (2TH, 2W, C) slab of the final image
    xp_ref   : (TH+2, W+2, C)     VMEM scratch: 1-pixel zero-padded input tile
    """
    TH, W, C = core_ref.shape[1], core_ref.shape[2], core_ref.shape[3]
    h = pl.program_id(1)
    n_h = pl.num_programs(1)
    zdt = xp_ref.dtype

    # ---- assemble the padded tile; zero ONLY the 1-element borders ---------
    # (scratch persists across grid steps and per-core under megacore, so the
    #  boundary rows/columns are (re)written on every step they apply to).
    xp_ref[:, 0, :] = jnp.zeros((TH + 2, C), zdt)          # left pad column
    xp_ref[:, W + 1, :] = jnp.zeros((TH + 2, C), zdt)      # right pad column
    xp_ref[pl.ds(1, TH), pl.ds(1, W), :] = core_ref[0]     # interior rows

    @pl.when(h > 0)
    def _():
        xp_ref[0, pl.ds(1, W), :] = top_ref[0, 0]

    @pl.when(h == 0)
    def _():
        xp_ref[0, pl.ds(1, W), :] = jnp.zeros((W, C), zdt)

    @pl.when(h < n_h - 1)
    def _():
        xp_ref[TH + 1, pl.ds(1, W), :] = bot_ref[0, 0]

    @pl.when(h == n_h - 1)
    def _():
        xp_ref[TH + 1, pl.ds(1, W), :] = jnp.zeros((W, C), zdt)

    # ---- sub-pixel conv: 9 shared patches, 12 (C -> 2C) MXU matmuls --------
    bias = b_ref[...].astype(jnp.float32)                  # (1, 2C)
    acc = [None, None]                                     # per row-phase f32
    for pr in range(3):            # padded-row window offset (orig row y-1+pr)
        for cc in range(3):        # padded-col offset        (orig col x-1+cc)
            patch = xp_ref[pl.ds(pr, TH), pl.ds(cc, W), :].reshape(TH * W, C)
            for py in range(2):    # output row phase
                r = pr - py
                if 0 <= r <= 1:
                    k = (py * 2 + r) * 3 + cc
                    contrib = jnp.dot(patch, m_ref[k],
                                      preferred_element_type=jnp.float32)
                    acc[py] = contrib if acc[py] is None else acc[py] + contrib

    # ---- fused bias add + a single store per row phase ----------------------
    for py in range(2):
        res = (acc[py] + bias).reshape(TH, W, 2 * C).astype(o_ref.dtype)
        o_ref[0, :, py, :, :] = res


def _subpixel_weights(w_oihw, bias, dtype):
    """4 phase 2x2 kernels of the (nearest-2x -> 3x3 conv), packed as 12
    (C, 2C) matrices so the two width phases share one matmul output."""
    w = jnp.transpose(w_oihw, (2, 3, 1, 0)).astype(jnp.float32)  # HWIO (ky,kx,i,o)
    C = w.shape[2]
    zeros = jnp.zeros((C, C), jnp.float32)
    # Row (ky) combine per (py, r): orig-row taps {y-1, y} (py=0) / {y, y+1} (py=1)
    A = [[w[0], w[1] + w[2]],
         [w[0] + w[1], w[2]]]                              # A[py][r]: (3_kx, C, C)
    mats = []
    for py in range(2):
        for r in range(2):
            a = A[py][r]
            # Column (kx) combine: px=0 taps {x-1: kx0, x: kx1+kx2};
            #                      px=1 taps {x: kx0+kx1, x+1: kx2}
            w00, w01 = a[0], a[1] + a[2]                   # px = 0
            w10, w11 = a[0] + a[1], a[2]                   # px = 1
            mats.append(jnp.concatenate([w00, zeros], axis=1))   # padded col x
            mats.append(jnp.concatenate([w01, w10], axis=1))     # padded col x+1
            mats.append(jnp.concatenate([zeros, w11], axis=1))   # padded col x+2
    m_all = jnp.stack(mats, axis=0).astype(dtype)          # (12, C, 2C)
    b2 = jnp.concatenate([bias, bias]).reshape(1, 2 * C).astype(jnp.float32)
    return m_all, b2


def _pick_tile_h(H, W, C, dtype, budget_bytes=8 * 1024 * 1024):
    """Largest divisor of H whose per-step VMEM footprint fits the budget."""
    bpe = jnp.dtype(dtype).itemsize
    best = 1
    for th in range(1, H + 1):
        if H % th:
            continue
        in_bytes = 2 * th * W * C * bpe + 4 * W * C * bpe          # dbl-buffered
        out_bytes = 2 * th * 2 * W * 2 * C * bpe                   # dbl-buffered
        scratch = (th + 2) * (W + 2) * C * bpe
        accs = 2 * th * W * 2 * C * 4                              # f32 locals
        if in_bytes + out_bytes + scratch + accs <= budget_bytes:
            best = th
    return best


def _vmem_limit_bytes(default=32 * 1024 * 1024):
    try:
        info = pltpu.get_tpu_info()
        cap = getattr(info, "vmem_capacity_bytes", None)
        if cap:
            return int(min(cap // 2, 64 * 1024 * 1024))
    except Exception:
        pass
    return default


@functools.partial(jax.jit, static_argnames=("with_conv",))
def upsample_forward(x_nchw, w_oihw, bias, with_conv=True):
    """Equivalent of Upsample.forward: nearest-2x upsample (+ optional conv)."""
    x = jnp.transpose(x_nchw, (0, 2, 3, 1))                # NCHW -> NHWC
    N, H, W, C = x.shape

    if not with_conv:
        # Pure data duplication; nothing to put on the MXU.
        up = jnp.repeat(jnp.repeat(x, 2, axis=1), 2, axis=2)
        return jnp.transpose(up, (0, 3, 1, 2))

    m_all, b2 = _subpixel_weights(w_oihw, bias, x.dtype)   # (12,C,2C), (1,2C)
    TH = _pick_tile_h(H, W, C, x.dtype)

    out5 = pl.pallas_call(
        _upconv_kernel,
        out_shape=jax.ShapeDtypeStruct((N, H, 2, W, 2 * C), x.dtype),
        grid_spec=pltpu.PrefetchScalarGridSpec(
            num_scalar_prefetch=0,
            grid=(N, H // TH),
            in_specs=[
                # core rows of this tile
                pl.BlockSpec((1, TH, W, C), lambda n, h: (n, h, 0, 0)),
                # 1-row halos with clamped indices (zeroed in-kernel at edges)
                pl.BlockSpec((1, 1, W, C),
                             lambda n, h: (n, jnp.maximum(h * TH - 1, 0), 0, 0)),
                pl.BlockSpec((1, 1, W, C),
                             lambda n, h: (n, jnp.minimum((h + 1) * TH, H - 1), 0, 0)),
                # phase weights + bias (small, resident)
                pl.BlockSpec((12, C, 2 * C), lambda n, h: (0, 0, 0)),
                pl.BlockSpec((1, 2 * C), lambda n, h: (0, 0)),
            ],
            out_specs=pl.BlockSpec((1, TH, 2, W, 2 * C),
                                   lambda n, h: (n, h, 0, 0, 0)),
            scratch_shapes=[pltpu.VMEM((TH + 2, W + 2, C), x.dtype)],
        ),
        compiler_params=pltpu.CompilerParams(
            dimension_semantics=("parallel", "parallel"),
            vmem_limit_bytes=_vmem_limit_bytes()),
    )(x, x, x, m_all, b2)

    # (N, H, 2, W, 2C) and (N, 2H, 2W, C) share the same row-major layout:
    # this reshape is a pure relabel (no data movement).
    out = out5.reshape(N, 2 * H, 2 * W, C)
    return jnp.transpose(out, (0, 3, 1, 2))                # NHWC -> NCHW


def _init_params(key, in_channels):
    """Deterministic init matching torch.nn.Conv2d default (kaiming-uniform)."""
    kw, kb = jax.random.split(key)
    fan_in = in_channels * 3 * 3
    bound = 1.0 / jnp.sqrt(fan_in)
    w = jax.random.uniform(
        kw, (in_channels, in_channels, 3, 3), jnp.float32, -bound, bound)  # OIHW
    b = jax.random.uniform(kb, (in_channels,), jnp.float32, -bound, bound)
    return w, b


if __name__ == "__main__":
    key = jax.random.PRNGKey(0)
    kx, kp = jax.random.split(key)

    N, C, H, W = 2, 4, 16, 16
    x = jax.random.normal(kx, (N, C, H, W), jnp.float32)     # NCHW like PyTorch
    w_oihw, bias = _init_params(kp, C)

    out = upsample_forward(x, w_oihw, bias, with_conv=True)
    out = jax.block_until_ready(out)
    assert out.shape == (N, C, 2 * H, 2 * W), out.shape

    # Pure-JAX reference (nearest upsample + lax conv) for correctness.
    x_nhwc = jnp.transpose(x, (0, 2, 3, 1))
    up = jnp.repeat(jnp.repeat(x_nhwc, 2, axis=1), 2, axis=2)
    ref = jax.lax.conv_general_dilated(
        up, jnp.transpose(w_oihw, (2, 3, 1, 0)),
        window_strides=(1, 1), padding=((1, 1), (1, 1)),
        dimension_numbers=("NHWC", "HWIO", "NHWC")) + bias
    ref = jnp.transpose(ref, (0, 3, 1, 2))
    assert jnp.allclose(out, ref, rtol=1e-5, atol=1e-4), float(
        jnp.max(jnp.abs(out - ref)))

    # with_conv=False path (pure upsample).
    out_nc = jax.block_until_ready(
        upsample_forward(x, w_oihw, bias, with_conv=False))
    ref_nc = jnp.transpose(up, (0, 3, 1, 2))
    assert out_nc.shape == (N, C, 2 * H, 2 * W)
    assert jnp.allclose(out_nc, ref_nc)

    print("KERNEL_OK")
</pallas_src>

<mosaic_0001>
module attributes {stable_mosaic.version = 11 : i64} {
  func.func @_upconv_kernel(%arg0: i32, %arg1: i32, %arg2: memref<1x16x16x4xf32, #tpu.memory_space<vmem>>, %arg3: memref<1x1x16x4xf32, #tpu.memory_space<vmem>>, %arg4: memref<1x1x16x4xf32, #tpu.memory_space<vmem>>, %arg5: memref<12x4x8xf32, #tpu.memory_space<vmem>>, %arg6: memref<1x8xf32, #tpu.memory_space<vmem>>, %arg7: memref<1x16x2x16x8xf32, #tpu.memory_space<vmem>>, %arg8: memref<18x18x4xf32, #tpu.memory_space<vmem>>) attributes {dimension_semantics = [#tpu.dimension_semantics<parallel>, #tpu.dimension_semantics<parallel>], iteration_bounds = array<i64: 2, 1>, scalar_prefetch = 0 : i64, scratch_operands = 1 : i64, tpu.core_type = #tpu.core_type<tc>, window_params = [{transform_indices = @transform_0, window_bounds = array<i64: 1, 16, 16, 4>}, {transform_indices = @transform_1, window_bounds = array<i64: 1, 1, 16, 4>}, {transform_indices = @transform_2, window_bounds = array<i64: 1, 1, 16, 4>}, {pipeline_mode = #tpu.pipeline_mode<synchronous>, transform_indices = @transform_3, window_bounds = array<i64: 12, 4, 8>}, {pipeline_mode = #tpu.pipeline_mode<synchronous>, transform_indices = @transform_4, window_bounds = array<i64: 1, 8>}, {transform_indices = @transform_5, window_bounds = array<i64: 1, 16, 2, 16, 8>}]} {
    %cst = arith.constant 0.000000e+00 : f32
    %0 = vector.broadcast %cst : f32 to vector<18x4xf32>
    %c0 = arith.constant 0 : index
    %c0_0 = arith.constant 0 : index
    %c0_1 = arith.constant 0 : index
    %1 = vector.load %arg8[%c0, %c0_0, %c0_1] : memref<18x18x4xf32, #tpu.memory_space<vmem>>, vector<18x1x4xf32>
    %2 = vector.shape_cast %1 : vector<18x1x4xf32> to vector<18x4xf32>
    %3 = vector.shape_cast %0 : vector<18x4xf32> to vector<18x1x4xf32>
    tpu.vector_store %arg8[%c0, %c0_0, %c0_1], %3 {strides = array<i32>} : memref<18x18x4xf32, #tpu.memory_space<vmem>>, vector<18x1x4xf32>,
    %cst_2 = arith.constant 0.000000e+00 : f32
    %4 = vector.broadcast %cst_2 : f32 to vector<18x4xf32>
    %c0_3 = arith.constant 0 : index
    %c17 = arith.constant 17 : index
    %c0_4 = arith.constant 0 : index
    %5 = vector.load %arg8[%c0_3, %c17, %c0_4] : memref<18x18x4xf32, #tpu.memory_space<vmem>>, vector<18x1x4xf32>
    %6 = vector.shape_cast %5 : vector<18x1x4xf32> to vector<18x4xf32>
    %7 = vector.shape_cast %4 : vector<18x4xf32> to vector<18x1x4xf32>
    tpu.vector_store %arg8[%c0_3, %c17, %c0_4], %7 {strides = array<i32>} : memref<18x18x4xf32, #tpu.memory_space<vmem>>, vector<18x1x4xf32>,
    %c0_5 = arith.constant 0 : index
    %c0_6 = arith.constant 0 : index
    %c0_7 = arith.constant 0 : index
    %c0_8 = arith.constant 0 : index
    %8 = vector.load %arg2[%c0_5, %c0_6, %c0_7, %c0_8] : memref<1x16x16x4xf32, #tpu.memory_space<vmem>>, vector<1x16x16x4xf32>
    %9 = vector.shape_cast %8 : vector<1x16x16x4xf32> to vector<16x16x4xf32>
    %c1 = arith.constant 1 : index
    %c1_9 = arith.constant 1 : index
    %c0_10 = arith.constant 0 : index
    %10 = vector.load %arg8[%c1, %c1_9, %c0_10] : memref<18x18x4xf32, #tpu.memory_space<vmem>>, vector<16x16x4xf32>
    tpu.vector_store %arg8[%c1, %c1_9, %c0_10], %9 {strides = array<i32>} : memref<18x18x4xf32, #tpu.memory_space<vmem>>, vector<16x16x4xf32>,
    %c0_i32 = arith.constant 0 : i32
    %11 = arith.cmpi sgt, %arg1, %c0_i32 : i32
    %12 = arith.extui %11 : i1 to i32
    %c0_i32_11 = arith.constant 0 : i32
    %13 = arith.cmpi ne, %12, %c0_i32_11 : i32
    scf.if %13 {
      %c0_95 = arith.constant 0 : index
      %c0_96 = arith.constant 0 : index
      %c0_97 = arith.constant 0 : index
      %c0_98 = arith.constant 0 : index
      %100 = vector.load %arg3[%c0_95, %c0_96, %c0_97, %c0_98] : memref<1x1x16x4xf32, #tpu.memory_space<vmem>>, vector<1x1x16x4xf32>
      %101 = vector.shape_cast %100 : vector<1x1x16x4xf32> to vector<16x4xf32>
      %c0_99 = arith.constant 0 : index
      %c1_100 = arith.constant 1 : index
      %c0_101 = arith.constant 0 : index
      %102 = vector.load %arg8[%c0_99, %c1_100, %c0_101] : memref<18x18x4xf32, #tpu.memory_space<vmem>>, vector<1x16x4xf32>
      %103 = vector.shape_cast %102 : vector<1x16x4xf32> to vector<16x4xf32>
      %104 = vector.shape_cast %101 : vector<16x4xf32> to vector<1x16x4xf32>
      tpu.vector_store %arg8[%c0_99, %c1_100, %c0_101], %104 {strides = array<i32>} : memref<18x18x4xf32, #tpu.memory_space<vmem>>, vector<1x16x4xf32>,
    } else {
    }
    %c0_i32_12 = arith.constant 0 : i32
    %14 = arith.cmpi eq, %arg1, %c0_i32_12 : i32
    %15 = arith.extui %14 : i1 to i32
    %c0_i32_13 = arith.constant 0 : i32
    %16 = arith.cmpi ne, %15, %c0_i32_13 : i32
    scf.if %16 {
      %cst_95 = arith.constant 0.000000e+00 : f32
      %100 = vector.broadcast %cst_95 : f32 to vector<16x4xf32>
      %c0_96 = arith.constant 0 : index
      %c1_97 = arith.constant 1 : index
      %c0_98 = arith.constant 0 : index
      %101 = vector.load %arg8[%c0_96, %c1_97, %c0_98] : memref<18x18x4xf32, #tpu.memory_space<vmem>>, vector<1x16x4xf32>
      %102 = vector.shape_cast %101 : vector<1x16x4xf32> to vector<16x4xf32>
      %103 = vector.shape_cast %100 : vector<16x4xf32> to vector<1x16x4xf32>
      tpu.vector_store %arg8[%c0_96, %c1_97, %c0_98], %103 {strides = array<i32>} : memref<18x18x4xf32, #tpu.memory_space<vmem>>, vector<1x16x4xf32>,
    } else {
    }
    %c0_i32_14 = arith.constant 0 : i32
    %17 = arith.cmpi slt, %arg1, %c0_i32_14 : i32
    %18 = arith.extui %17 : i1 to i32
    %c0_i32_15 = arith.constant 0 : i32
    %19 = arith.cmpi ne, %18, %c0_i32_15 : i32
    scf.if %19 {
      %c0_95 = arith.constant 0 : index
      %c0_96 = arith.constant 0 : index
      %c0_97 = arith.constant 0 : index
      %c0_98 = arith.constant 0 : index
      %100 = vector.load %arg4[%c0_95, %c0_96, %c0_97, %c0_98] : memref<1x1x16x4xf32, #tpu.memory_space<vmem>>, vector<1x1x16x4xf32>
      %101 = vector.shape_cast %100 : vector<1x1x16x4xf32> to vector<16x4xf32>
      %c17_99 = arith.constant 17 : index
      %c1_100 = arith.constant 1 : index
      %c0_101 = arith.constant 0 : index
      %102 = vector.load %arg8[%c17_99, %c1_100, %c0_101] : memref<18x18x4xf32, #tpu.memory_space<vmem>>, vector<1x16x4xf32>
      %103 = vector.shape_cast %102 : vector<1x16x4xf32> to vector<16x4xf32>
      %104 = vector.shape_cast %101 : vector<16x4xf32> to vector<1x16x4xf32>
      tpu.vector_store %arg8[%c17_99, %c1_100, %c0_101], %104 {strides = array<i32>} : memref<18x18x4xf32, #tpu.memory_space<vmem>>, vector<1x16x4xf32>,
    } else {
    }
    %c0_i32_16 = arith.constant 0 : i32
    %20 = arith.cmpi eq, %arg1, %c0_i32_16 : i32
    %21 = arith.extui %20 : i1 to i32
    %c0_i32_17 = arith.constant 0 : i32
    %22 = arith.cmpi ne, %21, %c0_i32_17 : i32
    scf.if %22 {
      %cst_95 = arith.constant 0.000000e+00 : f32
      %100 = vector.broadcast %cst_95 : f32 to vector<16x4xf32>
      %c17_96 = arith.constant 17 : index
      %c1_97 = arith.constant 1 : index
      %c0_98 = arith.constant 0 : index
      %101 = vector.load %arg8[%c17_96, %c1_97, %c0_98] : memref<18x18x4xf32, #tpu.memory_space<vmem>>, vector<1x16x4xf32>
      %102 = vector.shape_cast %101 : vector<1x16x4xf32> to vector<16x4xf32>
      %103 = vector.shape_cast %100 : vector<16x4xf32> to vector<1x16x4xf32>
      tpu.vector_store %arg8[%c17_96, %c1_97, %c0_98], %103 {strides = array<i32>} : memref<18x18x4xf32, #tpu.memory_space<vmem>>, vector<1x16x4xf32>,
    } else {
    }
    %c0_18 = arith.constant 0 : index
    %c0_19 = arith.constant 0 : index
    %23 = vector.load %arg6[%c0_18, %c0_19] : memref<1x8xf32, #tpu.memory_space<vmem>>, vector<1x8xf32>
    %c0_20 = arith.constant 0 : index
    %c0_21 = arith.constant 0 : index
    %c0_22 = arith.constant 0 : index
    %24 = vector.load %arg8[%c0_20, %c0_21, %c0_22] : memref<18x18x4xf32, #tpu.memory_space<vmem>>, vector<16x16x4xf32>
    %25 = vector.shape_cast %24 : vector<16x16x4xf32> to vector<256x4xf32>
    %c0_23 = arith.constant 0 : index
    %c0_24 = arith.constant 0 : index
    %c0_25 = arith.constant 0 : index
    %26 = vector.load %arg5[%c0_23, %c0_24, %c0_25] : memref<12x4x8xf32, #tpu.memory_space<vmem>>, vector<1x4x8xf32>
    %27 = vector.shape_cast %26 : vector<1x4x8xf32> to vector<4x8xf32>
    %cst_26 = arith.constant dense<0.000000e+00> : vector<256x8xf32>
    %28 = tpu.matmul %25, %27, %cst_26 {dimension_numbers = #tpu.dot_dimension_numbers<[1], [0], [0], [1], [0, 0, 1, 1], [], []>} : vector<256x4xf32>, vector<4x8xf32>, vector<256x8xf32> -> vector<256x8xf32>
    %c0_27 = arith.constant 0 : index
    %c1_28 = arith.constant 1 : index
    %c0_29 = arith.constant 0 : index
    %29 = vector.load %arg8[%c0_27, %c1_28, %c0_29] : memref<18x18x4xf32, #tpu.memory_space<vmem>>, vector<16x16x4xf32>
    %30 = vector.shape_cast %29 : vector<16x16x4xf32> to vector<256x4xf32>
    %c1_30 = arith.constant 1 : index
    %c0_31 = arith.constant 0 : index
    %c0_32 = arith.constant 0 : index
    %31 = vector.load %arg5[%c1_30, %c0_31, %c0_32] : memref<12x4x8xf32, #tpu.memory_space<vmem>>, vector<1x4x8xf32>
    %32 = vector.shape_cast %31 : vector<1x4x8xf32> to vector<4x8xf32>
    %cst_33 = arith.constant dense<0.000000e+00> : vector<256x8xf32>
    %33 = tpu.matmul %30, %32, %cst_33 {dimension_numbers = #tpu.dot_dimension_numbers<[1], [0], [0], [1], [0, 0, 1, 1], [], []>} : vector<256x4xf32>, vector<4x8xf32>, vector<256x8xf32> -> vector<256x8xf32>
    %34 = arith.addf %28, %33 : vector<256x8xf32>
    %c0_34 = arith.constant 0 : index
    %c2 = arith.constant 2 : index
    %c0_35 = arith.constant 0 : index
    %35 = vector.load %arg8[%c0_34, %c2, %c0_35] : memref<18x18x4xf32, #tpu.memory_space<vmem>>, vector<16x16x4xf32>
    %36 = vector.shape_cast %35 : vector<16x16x4xf32> to vector<256x4xf32>
    %c2_36 = arith.constant 2 : index
    %c0_37 = arith.constant 0 : index
    %c0_38 = arith.constant 0 : index
    %37 = vector.load %arg5[%c2_36, %c0_37, %c0_38] : memref<12x4x8xf32, #tpu.memory_space<vmem>>, vector<1x4x8xf32>
    %38 = vector.shape_cast %37 : vector<1x4x8xf32> to vector<4x8xf32>
    %cst_39 = arith.constant dense<0.000000e+00> : vector<256x8xf32>
    %39 = tpu.matmul %36, %38, %cst_39 {dimension_numbers = #tpu.dot_dimension_numbers<[1], [0], [0], [1], [0, 0, 1, 1], [], []>} : vector<256x4xf32>, vector<4x8xf32>, vector<256x8xf32> -> vector<256x8xf32>
    %40 = arith.addf %34, %39 : vector<256x8xf32>
    %c1_40 = arith.constant 1 : index
    %c0_41 = arith.constant 0 : index
    %c0_42 = arith.constant 0 : index
    %41 = vector.load %arg8[%c1_40, %c0_41, %c0_42] : memref<18x18x4xf32, #tpu.memory_space<vmem>>, vector<16x16x4xf32>
    %42 = vector.shape_cast %41 : vector<16x16x4xf32> to vector<256x4xf32>
    %c3 = arith.constant 3 : index
    %c0_43 = arith.constant 0 : index
    %c0_44 = arith.constant 0 : index
    %43 = vector.load %arg5[%c3, %c0_43, %c0_44] : memref<12x4x8xf32, #tpu.memory_space<vmem>>, vector<1x4x8xf32>
    %44 = vector.shape_cast %43 : vector<1x4x8xf32> to vector<4x8xf32>
    %cst_45 = arith.constant dense<0.000000e+00> : vector<256x8xf32>
    %45 = tpu.matmul %42, %44, %cst_45 {dimension_numbers = #tpu.dot_dimension_numbers<[1], [0], [0], [1], [0, 0, 1, 1], [], []>} : vector<256x4xf32>, vector<4x8xf32>, vector<256x8xf32> -> vector<256x8xf32>
    %46 = arith.addf %40, %45 : vector<256x8xf32>
    %c6 = arith.constant 6 : index
    %c0_46 = arith.constant 0 : index
    %c0_47 = arith.constant 0 : index
    %47 = vector.load %arg5[%c6, %c0_46, %c0_47] : memref<12x4x8xf32, #tpu.memory_space<vmem>>, vector<1x4x8xf32>
    %48 = vector.shape_cast %47 : vector<1x4x8xf32> to vector<4x8xf32>
    %cst_48 = arith.constant dense<0.000000e+00> : vector<256x8xf32>
    %49 = tpu.matmul %42, %48, %cst_48 {dimension_numbers = #tpu.dot_dimension_numbers<[1], [0], [0], [1], [0, 0, 1, 1], [], []>} : vector<256x4xf32>, vector<4x8xf32>, vector<256x8xf32> -> vector<256x8xf32>
    %c1_49 = arith.constant 1 : index
    %c1_50 = arith.constant 1 : index
    %c0_51 = arith.constant 0 : index
    %50 = vector.load %arg8[%c1_49, %c1_50, %c0_51] : memref<18x18x4xf32, #tpu.memory_space<vmem>>, vector<16x16x4xf32>
    %51 = vector.shape_cast %50 : vector<16x16x4xf32> to vector<256x4xf32>
    %c4 = arith.constant 4 : index
    %c0_52 = arith.constant 0 : index
    %c0_53 = arith.constant 0 : index
    %52 = vector.load %arg5[%c4, %c0_52, %c0_53] : memref<12x4x8xf32, #tpu.memory_space<vmem>>, vector<1x4x8xf32>
    %53 = vector.shape_cast %52 : vector<1x4x8xf32> to vector<4x8xf32>
    %cst_54 = arith.constant dense<0.000000e+00> : vector<256x8xf32>
    %54 = tpu.matmul %51, %53, %cst_54 {dimension_numbers = #tpu.dot_dimension_numbers<[1], [0], [0], [1], [0, 0, 1, 1], [], []>} : vector<256x4xf32>, vector<4x8xf32>, vector<256x8xf32> -> vector<256x8xf32>
    %55 = arith.addf %46, %54 : vector<256x8xf32>
    %c7 = arith.constant 7 : index
    %c0_55 = arith.constant 0 : index
    %c0_56 = arith.constant 0 : index
    %56 = vector.load %arg5[%c7, %c0_55, %c0_56] : memref<12x4x8xf32, #tpu.memory_space<vmem>>, vector<1x4x8xf32>
    %57 = vector.shape_cast %56 : vector<1x4x8xf32> to vector<4x8xf32>
    %cst_57 = arith.constant dense<0.000000e+00> : vector<256x8xf32>
    %58 = tpu.matmul %51, %57, %cst_57 {dimension_numbers = #tpu.dot_dimension_numbers<[1], [0], [0], [1], [0, 0, 1, 1], [], []>} : vector<256x4xf32>, vector<4x8xf32>, vector<256x8xf32> -> vector<256x8xf32>
    %59 = arith.addf %49, %58 : vector<256x8xf32>
    %c1_58 = arith.constant 1 : index
    %c2_59 = arith.constant 2 : index
    %c0_60 = arith.constant 0 : index
    %60 = vector.load %arg8[%c1_58, %c2_59, %c0_60] : memref<18x18x4xf32, #tpu.memory_space<vmem>>, vector<16x16x4xf32>
    %61 = vector.shape_cast %60 : vector<16x16x4xf32> to vector<256x4xf32>
    %c5 = arith.constant 5 : index
    %c0_61 = arith.constant 0 : index
    %c0_62 = arith.constant 0 : index
    %62 = vector.load %arg5[%c5, %c0_61, %c0_62] : memref<12x4x8xf32, #tpu.memory_space<vmem>>, vector<1x4x8xf32>
    %63 = vector.shape_cast %62 : vector<1x4x8xf32> to vector<4x8xf32>
    %cst_63 = arith.constant dense<0.000000e+00> : vector<256x8xf32>
    %64 = tpu.matmul %61, %63, %cst_63 {dimension_numbers = #tpu.dot_dimension_numbers<[1], [0], [0], [1], [0, 0, 1, 1], [], []>} : vector<256x4xf32>, vector<4x8xf32>, vector<256x8xf32> -> vector<256x8xf32>
    %65 = arith.addf %55, %64 : vector<256x8xf32>
    %c8 = arith.constant 8 : index
    %c0_64 = arith.constant 0 : index
    %c0_65 = arith.constant 0 : index
    %66 = vector.load %arg5[%c8, %c0_64, %c0_65] : memref<12x4x8xf32, #tpu.memory_space<vmem>>, vector<1x4x8xf32>
    %67 = vector.shape_cast %66 : vector<1x4x8xf32> to vector<4x8xf32>
    %cst_66 = arith.constant dense<0.000000e+00> : vector<256x8xf32>
    %68 = tpu.matmul %61, %67, %cst_66 {dimension_numbers = #tpu.dot_dimension_numbers<[1], [0], [0], [1], [0, 0, 1, 1], [], []>} : vector<256x4xf32>, vector<4x8xf32>, vector<256x8xf32> -> vector<256x8xf32>
    %69 = arith.addf %59, %68 : vector<256x8xf32>
    %c2_67 = arith.constant 2 : index
    %c0_68 = arith.constant 0 : index
    %c0_69 = arith.constant 0 : index
    %70 = vector.load %arg8[%c2_67, %c0_68, %c0_69] : memref<18x18x4xf32, #tpu.memory_space<vmem>>, vector<16x16x4xf32>
    %71 = vector.shape_cast %70 : vector<16x16x4xf32> to vector<256x4xf32>
    %c9 = arith.constant 9 : index
    %c0_70 = arith.constant 0 : index
    %c0_71 = arith.constant 0 : index
    %72 = vector.load %arg5[%c9, %c0_70, %c0_71] : memref<12x4x8xf32, #tpu.memory_space<vmem>>, vector<1x4x8xf32>
    %73 = vector.shape_cast %72 : vector<1x4x8xf32> to vector<4x8xf32>
    %cst_72 = arith.constant dense<0.000000e+00> : vector<256x8xf32>
    %74 = tpu.matmul %71, %73, %cst_72 {dimension_numbers = #tpu.dot_dimension_numbers<[1], [0], [0], [1], [0, 0, 1, 1], [], []>} : vector<256x4xf32>, vector<4x8xf32>, vector<256x8xf32> -> vector<256x8xf32>
    %75 = arith.addf %69, %74 : vector<256x8xf32>
    %c2_73 = arith.constant 2 : index
    %c1_74 = arith.constant 1 : index
    %c0_75 = arith.constant 0 : index
    %76 = vector.load %arg8[%c2_73, %c1_74, %c0_75] : memref<18x18x4xf32, #tpu.memory_space<vmem>>, vector<16x16x4xf32>
    %77 = vector.shape_cast %76 : vector<16x16x4xf32> to vector<256x4xf32>
    %c10 = arith.constant 10 : index
    %c0_76 = arith.constant 0 : index
    %c0_77 = arith.constant 0 : index
    %78 = vector.load %arg5[%c10, %c0_76, %c0_77] : memref<12x4x8xf32, #tpu.memory_space<vmem>>, vector<1x4x8xf32>
    %79 = vector.shape_cast %78 : vector<1x4x8xf32> to vector<4x8xf32>
    %cst_78 = arith.constant dense<0.000000e+00> : vector<256x8xf32>
    %80 = tpu.matmul %77, %79, %cst_78 {dimension_numbers = #tpu.dot_dimension_numbers<[1], [0], [0], [1], [0, 0, 1, 1], [], []>} : vector<256x4xf32>, vector<4x8xf32>, vector<256x8xf32> -> vector<256x8xf32>
    %81 = arith.addf %75, %80 : vector<256x8xf32>
    %c2_79 = arith.constant 2 : index
    %c2_80 = arith.constant 2 : index
    %c0_81 = arith.constant 0 : index
    %82 = vector.load %arg8[%c2_79, %c2_80, %c0_81] : memref<18x18x4xf32, #tpu.memory_space<vmem>>, vector<16x16x4xf32>
    %83 = vector.shape_cast %82 : vector<16x16x4xf32> to vector<256x4xf32>
    %c11 = arith.constant 11 : index
    %c0_82 = arith.constant 0 : index
    %c0_83 = arith.constant 0 : index
    %84 = vector.load %arg5[%c11, %c0_82, %c0_83] : memref<12x4x8xf32, #tpu.memory_space<vmem>>, vector<1x4x8xf32>
    %85 = vector.shape_cast %84 : vector<1x4x8xf32> to vector<4x8xf32>
    %cst_84 = arith.constant dense<0.000000e+00> : vector<256x8xf32>
    %86 = tpu.matmul %83, %85, %cst_84 {dimension_numbers = #tpu.dot_dimension_numbers<[1], [0], [0], [1], [0, 0, 1, 1], [], []>} : vector<256x4xf32>, vector<4x8xf32>, vector<256x8xf32> -> vector<256x8xf32>
    %87 = arith.addf %81, %86 : vector<256x8xf32>
    %88 = vector.broadcast %23 : vector<1x8xf32> to vector<256x8xf32>
    %89 = arith.addf %65, %88 : vector<256x8xf32>
    %90 = vector.shape_cast %89 : vector<256x8xf32> to vector<16x16x8xf32>
    %c0_85 = arith.constant 0 : index
    %c0_86 = arith.constant 0 : index
    %c0_87 = arith.constant 0 : index
    %c0_88 = arith.constant 0 : index
    %c0_89 = arith.constant 0 : index
    %91 = vector.load %arg7[%c0_85, %c0_86, %c0_87, %c0_88, %c0_89] : memref<1x16x2x16x8xf32, #tpu.memory_space<vmem>>, vector<1x16x1x16x8xf32>
    %92 = vector.shape_cast %91 : vector<1x16x1x16x8xf32> to vector<16x16x8xf32>
    %93 = vector.shape_cast %90 : vector<16x16x8xf32> to vector<1x16x1x16x8xf32>
    tpu.vector_store %arg7[%c0_85, %c0_86, %c0_87, %c0_88, %c0_89], %93 {strides = array<i32>} : memref<1x16x2x16x8xf32, #tpu.memory_space<vmem>>, vector<1x16x1x16x8xf32>,
    %94 = vector.broadcast %23 : vector<1x8xf32> to vector<256x8xf32>
    %95 = arith.addf %87, %94 : vector<256x8xf32>
    %96 = vector.shape_cast %95 : vector<256x8xf32> to vector<16x16x8xf32>
    %c0_90 = arith.constant 0 : index
    %c0_91 = arith.constant 0 : index
    %c1_92 = arith.constant 1 : index
    %c0_93 = arith.constant 0 : index
    %c0_94 = arith.constant 0 : index
    %97 = vector.load %arg7[%c0_90, %c0_91, %c1_92, %c0_93, %c0_94] : memref<1x16x2x16x8xf32, #tpu.memory_space<vmem>>, vector<1x16x1x16x8xf32>
    %98 = vector.shape_cast %97 : vector<1x16x1x16x8xf32> to vector<16x16x8xf32>
    %99 = vector.shape_cast %96 : vector<16x16x8xf32> to vector<1x16x1x16x8xf32>
    tpu.vector_store %arg7[%c0_90, %c0_91, %c1_92, %c0_93, %c0_94], %99 {strides = array<i32>} : memref<1x16x2x16x8xf32, #tpu.memory_space<vmem>>, vector<1x16x1x16x8xf32>,
    return
  }
  func.func @transform_0(%arg0: i32, %arg1: i32) -> (i32, i32, i32, i32) {
    %c0_i32 = arith.constant 0 : i32
    %c0_i32_0 = arith.constant 0 : i32
    %c0_i32_1 = arith.constant 0 : i32
    return %arg0, %arg1, %c0_i32, %c0_i32_0 : i32, i32, i32, i32
  }
  func.func @transform_1(%arg0: i32, %arg1: i32) -> (i32, i32, i32, i32) {
    %c16_i32 = arith.constant 16 : i32
    %0 = arith.muli %arg1, %c16_i32 : i32
    %c1_i32 = arith.constant 1 : i32
    %1 = arith.subi %0, %c1_i32 : i32
    %c0_i32 = arith.constant 0 : i32
    %2 = arith.maxsi %1, %c0_i32 : i32
    %c0_i32_0 = arith.constant 0 : i32
    %c0_i32_1 = arith.constant 0 : i32
    %c0_i32_2 = arith.constant 0 : i32
    return %arg0, %2, %c0_i32_0, %c0_i32_1 : i32, i32, i32, i32
  }
  func.func @transform_2(%arg0: i32, %arg1: i32) -> (i32, i32, i32, i32) {
    %c1_i32 = arith.constant 1 : i32
    %0 = arith.addi %arg1, %c1_i32 : i32
    %c16_i32 = arith.constant 16 : i32
    %1 = arith.muli %0, %c16_i32 : i32
    %c15_i32 = arith.constant 15 : i32
    %2 = arith.minsi %1, %c15_i32 : i32
    %c0_i32 = arith.constant 0 : i32
    %c0_i32_0 = arith.constant 0 : i32
    %c0_i32_1 = arith.constant 0 : i32
    return %arg0, %2, %c0_i32, %c0_i32_0 : i32, i32, i32, i32
  }
  func.func @transform_3(%arg0: i32, %arg1: i32) -> (i32, i32, i32) {
    %c0_i32 = arith.constant 0 : i32
    %c0_i32_0 = arith.constant 0 : i32
    %c0_i32_1 = arith.constant 0 : i32
    %c0_i32_2 = arith.constant 0 : i32
    return %c0_i32, %c0_i32_0, %c0_i32_1 : i32, i32, i32
  }
  func.func @transform_4(%arg0: i32, %arg1: i32) -> (i32, i32) {
    %c0_i32 = arith.constant 0 : i32
    %c0_i32_0 = arith.constant 0 : i32
    %c0_i32_1 = arith.constant 0 : i32
    return %c0_i32, %c0_i32_0 : i32, i32
  }
  func.func @transform_5(%arg0: i32, %arg1: i32) -> (i32, i32, i32, i32, i32) {
    %c0_i32 = arith.constant 0 : i32
    %c0_i32_0 = arith.constant 0 : i32
    %c0_i32_1 = arith.constant 0 : i32
    %c0_i32_2 = arith.constant 0 : i32
    return %arg0, %arg1, %c0_i32, %c0_i32_0, %c0_i32_1 : i32, i32, i32, i32, i32
  }
}

</mosaic_0001>

<bundles_post_ra>
// kernel: upsample_forward.1
= control target key start
LH: loop header
LB: loop body
LE: loop exit
PB: predicated region body
PF: predicated region fallthrough
CT: control target
= control target key end

     0   :  { %s6506_s18 = smov 0   ;;  %s6508_s19 = smov 0   ;;  %s8472_s0 = inlined_call_operand.vmem [shape: f32[2,16,16,4], index: 0, kind: input, shape index: {}, may-alias: {0,1,2}]   ;;  %s8473_s1 = inlined_call_operand.vmem [shape: f32[2,16,16,4], index: 1, kind: input, shape index: {}, may-alias: {0,1,2}]   ;;  %s8474_s2 = inlined_call_operand.vmem [shape: f32[2,16,16,4], index: 2, kind: input, shape index: {}, may-alias: {0,1,2}]   ;;  %s8475_s3 = inlined_call_operand.vmem [shape: f32[12,4,8], index: 3, kind: input, shape index: {}]   ;;  %s8476_s4 = inlined_call_operand.vmem [shape: f32[1,8], index: 4, kind: input, shape index: {}]   ;;  %s8477_s5 = inlined_call_operand.vmem [shape: f32[2,16,2,16,8], index: 5, kind: output, shape index: {}]  }
   0x1   :  { %s6510_s20 = smov 0  }
   0x2 LB: > { %s27_s1 = sadd.s32 1, %s6469_s19  ;;  %p4973_p0 = scmp.ge.s32.totalorder %s6473_s20, 1  ;;  %s6473_s20 = sphi %s6510_s20, %s15_s20   ;;  %s6469_s19 = sphi %s6508_s19, %s8790_s19   ;;  %s6465_s18 = sphi %s6506_s18, %s8789_s18  }
   0x3   : > { %p29_p1 = scmp.ge.s32.totalorder %s27_s1, 2  ;;  %p273_p2 = scmp.lt.s32.totalorder %s6473_s20, 3 }
   0x5   : > { %s8792_s1 = smov (%p29_p1, %s27_s1), 0  ;;  %p274_p3 = pnand %p4973_p0, %p273_p2 }
   0x7   : > { %277 = sbr.rel (%p274_p3) target bundleno = 621 (0x26d), region = 40 }
   0xc   : > { %v4982_v0 = vld [vmem:[%s8475_s3 + $0x4] sm:$0xf]  ;;  %vm689_vm0 = vcmask 1043456   ;;  %v558_v1 = vld [vmem:[%s8475_s3] sm:$0xf]  ;;  %vm463_vm1 = vcmask 31744  }
   0xd   : > { %5825 = vmatprep.subr.msk.mxu0 %vm689_vm0, %v4982_v0  ;;  %5875 = vmatprep.subr.msk.mxu1 %vm689_vm0, %v558_v1  ;;  %vm393_vm2 = vcmask 24576   ;;  %v6537_v2 = vld [vmem:[%s8475_s3 + $0x8] sm:$0xf]  ;;  %v6542_v3 = vld [vmem:[%s8475_s3 + $0xc] sm:$0xf]  ;;  %v6475_v4 = vmov 0.0  }
   0xe   : > { %5826 = vmatpush3.msk.msra.mxu0 %vm689_vm0, %v4982_v0  ;;  %508 = vst.msk [vmem:[#allocation2 + $0x1] sm:$0xff] %vm463_vm1, %v6475_v4  ;;  %509 = vst.msk [vmem:[#allocation2 + $0x9] sm:$0xff] %vm463_vm1, %v6475_v4  ;;  %5876 = vmatpush3.msk.msra.mxu1 %vm689_vm0, %v558_v1  ;;  %p338_p4 = scmp.lt.s32.totalorder %s6465_s18, 1  ;;  %v6606_v8 = vld [vmem:[%s8475_s3 + $0x10] sm:$0xf]  ;;  %vm4733_vm3 = vcmask 64512  }
   0xf   : > { %523 = vst.msk [vmem:[#allocation2 + $0x199] sm:$0xff] %vm463_vm1, %v6475_v4  ;;  %524 = vst.msk [vmem:[#allocation2 + $0x1a1] sm:$0xff] %vm463_vm1, %v6475_v4  ;;  %5925 = vmatprep.subr.msk.mxu0 %vm689_vm0, %v6537_v2  ;;  %5975 = vmatprep.subr.msk.mxu1 %vm689_vm0, %v6542_v3  ;;  %v6611_v9 = vld [vmem:[%s8475_s3 + $0x1c] sm:$0xf] }
  0x10   : > { %394 = vst.msk [vmem:[#allocation2] sm:$0x1] %vm393_vm2, %v6475_v4  ;;  %395 = vst.msk [vmem:[#allocation2 + $0x18] sm:$0x1] %vm393_vm2, %v6475_v4  ;;  %s8794_s18 = smov (!%p338_p4, %s6465_s18), 1 }
  0x11   : > { %396 = vst.msk [vmem:[#allocation2 + $0x30] sm:$0x1] %vm393_vm2, %v6475_v4  ;;  %397 = vst.msk [vmem:[#allocation2 + $0x48] sm:$0x1] %vm393_vm2, %v6475_v4  ;;  %s5424_s28 = sshll.u32 %s8794_s18, 8  ;;  %s5428_s25 = sshll.u32 %s8794_s18, 9 }
  0x12   : > { %398 = vst.msk [vmem:[#allocation2 + $0x60] sm:$0x1] %vm393_vm2, %v6475_v4  ;;  %399 = vst.msk [vmem:[#allocation2 + $0x78] sm:$0x1] %vm393_vm2, %v6475_v4  ;;  %s6598_s6 = scalar_lea.vmem %s8472_s0, %s5424_s28  ;;  %s7898_s18 = scalar_lea.vmem %s8477_s5, %s5428_s25 }
  0x13   : > { %400 = vst.msk [vmem:[#allocation2 + $0x90] sm:$0x1] %vm393_vm2, %v6475_v4  ;;  %401 = vst.msk [vmem:[#allocation2 + $0xa8] sm:$0x1] %vm393_vm2, %v6475_v4  ;;  %v430_v5 = vld [vmem:[%s6598_s6] sm:$0xff]  ;;  %v431_v6 = vld [vmem:[%s6598_s6 + $0x8] sm:$0xff] }
  0x14   : > { %402 = vst.msk [vmem:[#allocation2 + $0xc0] sm:$0x1] %vm393_vm2, %v6475_v4  ;;  %403 = vst.msk [vmem:[#allocation2 + $0xd8] sm:$0x1] %vm393_vm2, %v6475_v4  ;;  %v432_v7 = vld [vmem:[%s6598_s6 + $0x10] sm:$0xff]  ;;  %v433_v14 = vld [vmem:[%s6598_s6 + $0x18] sm:$0xff] }
  0x15   : > { %404 = vst.msk [vmem:[#allocation2 + $0xf0] sm:$0x1] %vm393_vm2, %v6475_v4  ;;  %405 = vst.msk [vmem:[#allocation2 + $0x108] sm:$0x1] %vm393_vm2, %v6475_v4  ;;  %v559_v10 = vld [vmem:[#allocation2 + $0x1] sm:$0xff]  ;;  %v560_v12 = vld [vmem:[#allocation2 + $0x9] sm:$0xff] }
  0x16   : > { %406 = vst.msk [vmem:[#allocation2 + $0x120] sm:$0x1] %vm393_vm2, %v6475_v4  ;;  %407 = vst.msk [vmem:[#allocation2 + $0x138] sm:$0x1] %vm393_vm2, %v6475_v4  ;;  %5827 = vmatprep.mubr.msk.f32.mxu0 %vm463_vm1, %v559_v10  ;;  %v527_v13 = vld [vmem:[#allocation2 + $0x8] sm:$0xff]  ;;  %v434_v15 = vld [vmem:[%s6598_s6 + $0x20] sm:$0xff] }
  0x17   : > { %408 = vst.msk [vmem:[#allocation2 + $0x150] sm:$0x1] %vm393_vm2, %v6475_v4  ;;  %409 = vst.msk [vmem:[#allocation2 + $0x168] sm:$0x1] %vm393_vm2, %v6475_v4  ;;  %v526_v11 = vld [vmem:[#allocation2] sm:$0xff]  ;;  %5828 = vmatmul.mubr.msk.f32.vlgmr.msra.gmra.mxu0 %vm463_vm1, %v560_v12  ;;  %v435_v16 = vld [vmem:[%s6598_s6 + $0x28] sm:$0xff] }
  0x18   : > { %410 = vst.msk [vmem:[#allocation2 + $0x180] sm:$0x1] %vm393_vm2, %v6475_v4  ;;  %411 = vst.msk [vmem:[#allocation2 + $0x198] sm:$0x1] %vm393_vm2, %v6475_v4  ;;  %5877 = vmatprep.mubr.msk.f32.mxu1 %vm463_vm1, %v526_v11  ;;  %v436_v17 = vld [vmem:[%s6598_s6 + $0x30] sm:$0xff]  ;;  %v437_v18 = vld [vmem:[%s6598_s6 + $0x38] sm:$0xff]  ;;  %5926 = vmatpush3.msk.msra.mxu0 %vm689_vm0, %v6537_v2 }
  0x19   : > { %412 = vst.msk [vmem:[#allocation2 + $0x11] sm:$0x1] %vm393_vm2, %v6475_v4  ;;  %413 = vst.msk [vmem:[#allocation2 + $0x29] sm:$0x1] %vm393_vm2, %v6475_v4  ;;  %5878 = vmatmul.mubr.msk.f32.vlgmr.msra.gmra.mxu1 %vm463_vm1, %v527_v13  ;;  %v438_v19 = vld [vmem:[%s6598_s6 + $0x40] sm:$0xff]  ;;  %v439_v20 = vld [vmem:[%s6598_s6 + $0x48] sm:$0xff]  ;;  %6025 = vmatprep.subr.msk.mxu0 %vm689_vm0, %v6606_v8 }
  0x1a   : > { %414 = vst.msk [vmem:[#allocation2 + $0x41] sm:$0x1] %vm393_vm2, %v6475_v4  ;;  %415 = vst.msk [vmem:[#allocation2 + $0x59] sm:$0x1] %vm393_vm2, %v6475_v4  ;;  %5976 = vmatpush3.msk.msra.mxu1 %vm689_vm0, %v6542_v3  ;;  %v440_v21 = vld [vmem:[%s6598_s6 + $0x50] sm:$0xff]  ;;  %v441_v22 = vld [vmem:[%s6598_s6 + $0x58] sm:$0xff] }
  0x1b   : > { %416 = vst.msk [vmem:[#allocation2 + $0x71] sm:$0x1] %vm393_vm2, %v6475_v4  ;;  %417 = vst.msk [vmem:[#allocation2 + $0x89] sm:$0x1] %vm393_vm2, %v6475_v4  ;;  %v442_v23 = vld [vmem:[%s6598_s6 + $0x60] sm:$0xff]  ;;  %v443_v24 = vld [vmem:[%s6598_s6 + $0x68] sm:$0xff]  ;;  %6075 = vmatprep.subr.msk.mxu1 %vm689_vm0, %v6611_v9 }
  0x1c   : > { %418 = vst.msk [vmem:[#allocation2 + $0xa1] sm:$0x1] %vm393_vm2, %v6475_v4  ;;  %419 = vst.msk [vmem:[#allocation2 + $0xb9] sm:$0x1] %vm393_vm2, %v6475_v4  ;;  %v444_v25 = vld [vmem:[%s6598_s6 + $0x70] sm:$0xff]  ;;  %v445_v26 = vld [vmem:[%s6598_s6 + $0x78] sm:$0xff] }
  0x1d   : > { %420 = vst.msk [vmem:[#allocation2 + $0xd1] sm:$0x1] %vm393_vm2, %v6475_v4  ;;  %421 = vst.msk [vmem:[#allocation2 + $0xe9] sm:$0x1] %vm393_vm2, %v6475_v4  ;;  %v446_v27 = vld [vmem:[%s6598_s6 + $0x80] sm:$0xff]  ;;  %v447_v28 = vld [vmem:[%s6598_s6 + $0x88] sm:$0xff] }
  0x1e   : > { %422 = vst.msk [vmem:[#allocation2 + $0x101] sm:$0x1] %vm393_vm2, %v6475_v4  ;;  %423 = vst.msk [vmem:[#allocation2 + $0x119] sm:$0x1] %vm393_vm2, %v6475_v4  ;;  %v448_v29 = vld [vmem:[%s6598_s6 + $0x90] sm:$0xff]  ;;  %v449_v30 = vld [vmem:[%s6598_s6 + $0x98] sm:$0xff] }
  0x1f   : > { %424 = vst.msk [vmem:[#allocation2 + $0x131] sm:$0x1] %vm393_vm2, %v6475_v4  ;;  %425 = vst.msk [vmem:[#allocation2 + $0x149] sm:$0x1] %vm393_vm2, %v6475_v4  ;;  %v450_v51 = vld [vmem:[%s6598_s6 + $0xa0] sm:$0xff]  ;;  %v451_v52 = vld [vmem:[%s6598_s6 + $0xa8] sm:$0xff] }
  0x20   : > { %426 = vst.msk [vmem:[#allocation2 + $0x161] sm:$0x1] %vm393_vm2, %v6475_v4  ;;  %427 = vst.msk [vmem:[#allocation2 + $0x179] sm:$0x1] %vm393_vm2, %v6475_v4  ;;  %v452_v54 = vld [vmem:[%s6598_s6 + $0xb0] sm:$0xff]  ;;  %v453_v55 = vld [vmem:[%s6598_s6 + $0xb8] sm:$0xff] }
  0x21   : > { %428 = vst.msk [vmem:[#allocation2 + $0x191] sm:$0x1] %vm393_vm2, %v6475_v4  ;;  %429 = vst.msk [vmem:[#allocation2 + $0x1a9] sm:$0x1] %vm393_vm2, %v6475_v4  ;;  %v454_v56 = vld [vmem:[%s6598_s6 + $0xc0] sm:$0xff]  ;;  %v455_v57 = vld [vmem:[%s6598_s6 + $0xc8] sm:$0xff] }
  0x22   : > { %464 = vst.msk [vmem:[#allocation2 + $0x19] sm:$0xff] %vm463_vm1, %v430_v5  ;;  %465 = vst.msk [vmem:[#allocation2 + $0x21] sm:$0xff] %vm463_vm1, %v431_v6  ;;  %v456_v58 = vld [vmem:[%s6598_s6 + $0xd0] sm:$0xff]  ;;  %v457_v59 = vld [vmem:[%s6598_s6 + $0xd8] sm:$0xff] }
  0x23   : > { %466 = vst.msk [vmem:[#allocation2 + $0x31] sm:$0xff] %vm463_vm1, %v432_v7  ;;  %467 = vst.msk [vmem:[#allocation2 + $0x39] sm:$0xff] %vm463_vm1, %v433_v14  ;;  %v458_v61 = vld [vmem:[%s6598_s6 + $0xe0] sm:$0xff]  ;;  %v459_v62 = vld [vmem:[%s6598_s6 + $0xe8] sm:$0xff] }
  0x24   : > { %468 = vst.msk [vmem:[#allocation2 + $0x49] sm:$0xff] %vm463_vm1, %v434_v15  ;;  %469 = vst.msk [vmem:[#allocation2 + $0x51] sm:$0xff] %vm463_vm1, %v435_v16 }
  0x25   : > { %470 = vst.msk [vmem:[#allocation2 + $0x61] sm:$0xff] %vm463_vm1, %v436_v17  ;;  %471 = vst.msk [vmem:[#allocation2 + $0x69] sm:$0xff] %vm463_vm1, %v437_v18  ;;  %v460_v17 = vld [vmem:[%s6598_s6 + $0xf0] sm:$0xff]  ;;  %v461_v18 = vld [vmem:[%s6598_s6 + $0xf8] sm:$0xff] }
  0x26   : > { %472 = vst.msk [vmem:[#allocation2 + $0x79] sm:$0xff] %vm463_vm1, %v438_v19  ;;  %473 = vst.msk [vmem:[#allocation2 + $0x81] sm:$0xff] %vm463_vm1, %v439_v20 }
  0x27   : > { %474 = vst.msk [vmem:[#allocation2 + $0x91] sm:$0xff] %vm463_vm1, %v440_v21  ;;  %475 = vst.msk [vmem:[#allocation2 + $0x99] sm:$0xff] %vm463_vm1, %v441_v22 }
  0x28   : > { %476 = vst.msk [vmem:[#allocation2 + $0xa9] sm:$0xff] %vm463_vm1, %v442_v23  ;;  %477 = vst.msk [vmem:[#allocation2 + $0xb1] sm:$0xff] %vm463_vm1, %v443_v24 }
  0x29   : > { %478 = vst.msk [vmem:[#allocation2 + $0xc1] sm:$0xff] %vm463_vm1, %v444_v25  ;;  %479 = vst.msk [vmem:[#allocation2 + $0xc9] sm:$0xff] %vm463_vm1, %v445_v26  ;;  %v6659_v31 = vld [vmem:[#allocation2 + $0x19] sm:$0xff]  ;;  %v6663_v33 = vld [vmem:[#allocation2 + $0x21] sm:$0xff] }
  0x2a   : > { %480 = vst.msk [vmem:[#allocation2 + $0xd9] sm:$0xff] %vm463_vm1, %v446_v27  ;;  %v6661_v32 = vld [vmem:[#allocation2 + $0x18] sm:$0xff]  ;;  %481 = vst.msk [vmem:[#allocation2 + $0xe1] sm:$0xff] %vm463_vm1, %v447_v28  ;;  %5830 = vmatprep.mubr.msk.f32.mxu0 %vm463_vm1, %v6659_v31  ;;  %v6672_v34 = vld [vmem:[#allocation2 + $0x20] sm:$0xff] }
  0x2b   : > { %482 = vst.msk [vmem:[#allocation2 + $0xf1] sm:$0xff] %vm463_vm1, %v448_v29  ;;  %483 = vst.msk [vmem:[#allocation2 + $0xf9] sm:$0xff] %vm463_vm1, %v449_v30  ;;  %5880 = vmatprep.mubr.msk.f32.mxu1 %vm463_vm1, %v6661_v32  ;;  %v6674_v35 = vld [vmem:[#allocation2 + $0x31] sm:$0xff]  ;;  %5831 = vmatmul.mubr.msk.f32.gmra.mxu0 %vm463_vm1, %v6663_v33  ;;  %v6686_v37 = vld [vmem:[#allocation2 + $0x39] sm:$0xff] }
  0x2c   : > { %8531 = vst [vmem:[#allocation3_spill] sm:$0xff] %v6672_v34  ;;  %v6676_v36 = vld [vmem:[#allocation2 + $0x30] sm:$0xff]  ;;  %5881 = vmatmul.mubr.msk.f32.gmra.mxu1 %vm463_vm1, %v6672_v34  ;;  %5833 = vmatprep.mubr.msk.f32.mxu0 %vm463_vm1, %v6674_v35  ;;  %v6688_v38 = vld [vmem:[#allocation2 + $0x38] sm:$0xff]  ;;  %v6692_v40 = vld [vmem:[#allocation2 + $0x48] sm:$0xff] }
  0x2d   : > { %5883 = vmatprep.mubr.msk.f32.mxu1 %vm463_vm1, %v6676_v36  ;;  %8532 = vst [vmem:[#allocation4_spill] sm:$0xff] %v6688_v38  ;;  %v6690_v39 = vld [vmem:[#allocation2 + $0x49] sm:$0xff]  ;;  %v6702_v41 = vld [vmem:[#allocation2 + $0x51] sm:$0xff]  ;;  %v6706_v43 = vld [vmem:[#allocation2 + $0x61] sm:$0xff] }
  0x2e   : > { %v6704_v42 = vld [vmem:[#allocation2 + $0x50] sm:$0xff]  ;;  %v6708_v44 = vld [vmem:[#allocation2 + $0x60] sm:$0xff]  ;;  %v6720_v46 = vld [vmem:[#allocation2 + $0x68] sm:$0xff]  ;;  %484 = vst.msk [vmem:[#allocation2 + $0x109] sm:$0xff] %vm463_vm1, %v450_v51 }
  0x2f   : > { %5834 = vmatmul.mubr.msk.f32.gmra.mxu0 %vm463_vm1, %v6686_v37  ;;  %8533 = vst [vmem:[#allocation5_spill] sm:$0xff] %v6704_v42  ;;  %v6718_v45 = vld [vmem:[#allocation2 + $0x69] sm:$0xff]  ;;  %8534 = vst [vmem:[#allocation6_spill] sm:$0xff] %v6720_v46  ;;  %v6722_v47 = vld [vmem:[#allocation2 + $0x79] sm:$0xff] }
  0x30   : > { %5884 = vmatmul.mubr.msk.f32.gmra.mxu1 %vm463_vm1, %v6688_v38  ;;  %5836 = vmatprep.mubr.msk.f32.mxu0 %vm463_vm1, %v6690_v39  ;;  %v6724_v48 = vld [vmem:[#allocation2 + $0x78] sm:$0xff]  ;;  %v6726_v49 = vld [vmem:[#allocation2 + $0x81] sm:$0xff]  ;;  %485 = vst.msk [vmem:[#allocation2 + $0x111] sm:$0xff] %vm463_vm1, %v451_v52  ;;  %486 = vst.msk [vmem:[#allocation2 + $0x121] sm:$0xff] %vm463_vm1, %v452_v54 }
  0x31   : > { %5886 = vmatprep.mubr.msk.f32.mxu1 %vm463_vm1, %v6692_v40  ;;  %v6728_v50 = vld [vmem:[#allocation2 + $0x80] sm:$0xff]  ;;  %v6736_v53 = vld [vmem:[#allocation2 + $0x91] sm:$0xff]  ;;  %487 = vst.msk [vmem:[#allocation2 + $0x129] sm:$0xff] %vm463_vm1, %v453_v55  ;;  %488 = vst.msk [vmem:[#allocation2 + $0x139] sm:$0xff] %vm463_vm1, %v454_v56 }
  0x32   : > { %8535 = vst [vmem:[#allocation7_spill] sm:$0xff] %v6728_v50  ;;  %v6753_v60 = vld [vmem:[#allocation2 + $0x90] sm:$0xff]  ;;  %489 = vst.msk [vmem:[#allocation2 + $0x141] sm:$0xff] %vm463_vm1, %v455_v57  ;;  %v6770_v63 = vld [vmem:[#allocation2 + $0x99] sm:$0xff] }
  0x33   : > { %5837 = vmatmul.mubr.msk.f32.gmra.mxu0 %vm463_vm1, %v6702_v41  ;;  %490 = vst.msk [vmem:[#allocation2 + $0x151] sm:$0xff] %vm463_vm1, %v456_v58  ;;  %491 = vst.msk [vmem:[#allocation2 + $0x159] sm:$0xff] %vm463_vm1, %v457_v59  ;;  %v6772_v0 = vld [vmem:[#allocation2 + $0x98] sm:$0xff]  ;;  %v6774_v1 = vld [vmem:[#allocation2 + $0xa9] sm:$0xff] }
  0x34   : > { %5887 = vmatmul.mubr.msk.f32.gmra.mxu1 %vm463_vm1, %v6704_v42  ;;  %5839 = vmatprep.mubr.msk.f32.mxu0 %vm463_vm1, %v6706_v43  ;;  %492 = vst.msk [vmem:[#allocation2 + $0x169] sm:$0xff] %vm463_vm1, %v458_v61  ;;  %493 = vst.msk [vmem:[#allocation2 + $0x171] sm:$0xff] %vm463_vm1, %v459_v62  ;;  %v6776_v2 = vld [vmem:[#allocation2 + $0xa8] sm:$0xff]  ;;  %v6786_v3 = vld [vmem:[#allocation2 + $0xb1] sm:$0xff] }
  0x35   : > { %5889 = vmatprep.mubr.msk.f32.mxu1 %vm463_vm1, %v6708_v44  ;;  %8536 = vst [vmem:[#allocation8_spill] sm:$0xff] %v6772_v0  ;;  %v6788_v4 = vld [vmem:[#allocation2 + $0xb0] sm:$0xff]  ;;  %v6790_v5 = vld [vmem:[#allocation2 + $0xc1] sm:$0xff]  ;;  %v6806_v11 = vld [vmem:[#allocation2 + $0xd9] sm:$0xff] }
  0x36   : > { %8537 = vst [vmem:[#allocation9_spill] sm:$0xff] %v6788_v4  ;;  %v6792_v6 = vld [vmem:[#allocation2 + $0xc0] sm:$0xff]  ;;  %v6802_v7 = vld [vmem:[#allocation2 + $0xc9] sm:$0xff]  ;;  %v6808_v12 = vld [vmem:[#allocation2 + $0xd8] sm:$0xff] }
  0x37   : > { %5840 = vmatmul.mubr.msk.f32.gmra.mxu0 %vm463_vm1, %v6718_v45  ;;  %v6804_v10 = vld [vmem:[#allocation2 + $0xc8] sm:$0xff]  ;;  %v6820_v14 = vld [vmem:[#allocation2 + $0xe0] sm:$0xff]  ;;  %v6822_v15 = vld [vmem:[#allocation2 + $0xf1] sm:$0xff]  ;;  %494 = vst.msk [vmem:[#allocation2 + $0x181] sm:$0xff] %vm463_vm1, %v460_v17 }
  0x38   : > { %5890 = vmatmul.mubr.msk.f32.gmra.mxu1 %vm463_vm1, %v6720_v46  ;;  %5842 = vmatprep.mubr.msk.f32.mxu0 %vm463_vm1, %v6722_v47  ;;  %8538 = vst [vmem:[#allocation10_spill] sm:$0xff] %v6804_v10  ;;  %v6818_v13 = vld [vmem:[#allocation2 + $0xe1] sm:$0xff]  ;;  %8539 = vst [vmem:[#allocation11_spill] sm:$0xff] %v6820_v14  ;;  %v6824_v16 = vld [vmem:[#allocation2 + $0xf0] sm:$0xff] }
  0x39   : > { %5892 = vmatprep.mubr.msk.f32.mxu1 %vm463_vm1, %v6724_v48  ;;  %v6837_v19 = vld [vmem:[#allocation2 + $0xf9] sm:$0xff]  ;;  %495 = vst.msk [vmem:[#allocation2 + $0x189] sm:$0xff] %vm463_vm1, %v461_v18  ;;  %v6842_v21 = vld [vmem:[#allocation2 + $0x109] sm:$0xff]  ;;  %v6854_v23 = vld [vmem:[#allocation2 + $0x111] sm:$0xff] }
  0x3a   : > { %v6839_v20 = vld [vmem:[#allocation2 + $0xf8] sm:$0xff]  ;;  %v6844_v22 = vld [vmem:[#allocation2 + $0x108] sm:$0xff]  ;;  %v6856_v24 = vld [vmem:[#allocation2 + $0x110] sm:$0xff] }
  0x3b   : > { %5843 = vmatmul.mubr.msk.f32.gmra.mxu0 %vm463_vm1, %v6726_v49  ;;  %8540 = vst [vmem:[#allocation12_spill] sm:$0xff] %v6839_v20  ;;  %8541 = vst [vmem:[#allocation13_spill] sm:$0xff] %v6856_v24  ;;  %v6858_v25 = vld [vmem:[#allocation2 + $0x121] sm:$0xff]  ;;  %v6870_v27 = vld [vmem:[#allocation2 + $0x129] sm:$0xff] }
  0x3c   : > { %5893 = vmatmul.mubr.msk.f32.gmra.mxu1 %vm463_vm1, %v6728_v50  ;;  %5845 = vmatprep.mubr.msk.f32.mxu0 %vm463_vm1, %v6736_v53  ;;  %v6860_v26 = vld [vmem:[#allocation2 + $0x120] sm:$0xff]  ;;  %v6872_v28 = vld [vmem:[#allocation2 + $0x128] sm:$0xff]  ;;  %v6876_v30 = vld [vmem:[#allocation2 + $0x138] sm:$0xff] }
  0x3d   : > { %5895 = vmatprep.mubr.msk.f32.mxu1 %vm463_vm1, %v6753_v60  ;;  %8542 = vst [vmem:[#allocation14_spill] sm:$0xff] %v6872_v28  ;;  %v6874_v29 = vld [vmem:[#allocation2 + $0x139] sm:$0xff]  ;;  %v6886_v51 = vld [vmem:[#allocation2 + $0x141] sm:$0xff]  ;;  %v6890_v54 = vld [vmem:[#allocation2 + $0x151] sm:$0xff] }
  0x3e   : > { %v6888_v52 = vld [vmem:[#allocation2 + $0x140] sm:$0xff]  ;;  %v6892_v55 = vld [vmem:[#allocation2 + $0x150] sm:$0xff]  ;;  %v6904_v57 = vld [vmem:[#allocation2 + $0x158] sm:$0xff] }
  0x3f   : > { %5846 = vmatmul.mubr.msk.f32.gmra.mxu0 %vm463_vm1, %v6770_v63  ;;  %8543 = vst [vmem:[#allocation15_spill] sm:$0xff] %v6888_v52  ;;  %8544 = vst [vmem:[#allocation16_spill] sm:$0xff] %v6892_v55  ;;  %v6902_v56 = vld [vmem:[#allocation2 + $0x159] sm:$0xff]  ;;  %v6906_v58 = vld [vmem:[#allocation2 + $0x169] sm:$0xff] }
  0x40   : > { %5896 = vmatmul.mubr.msk.f32.gmra.mxu1 %vm463_vm1, %v6772_v0  ;;  %5848 = vmatprep.mubr.msk.f32.mxu0 %vm463_vm1, %v6774_v1  ;;  %8545 = vst [vmem:[#allocation17_spill] sm:$0xff] %v6904_v57  ;;  %8546 = vst [vmem:[#allocation18_spill] sm:$0xff] %v6906_v58  ;;  %v6908_v59 = vld [vmem:[#allocation2 + $0x168] sm:$0xff]  ;;  %v6918_v61 = vld [vmem:[#allocation2 + $0x171] sm:$0xff] }
  0x41   : > { %5898 = vmatprep.mubr.msk.f32.mxu1 %vm463_vm1, %v6776_v2  ;;  %8547 = vst [vmem:[#allocation19_spill] sm:$0xff] %v6908_v59  ;;  %8548 = vst [vmem:[#allocation20_spill] sm:$0xff] %v6918_v61  ;;  %v6920_v62 = vld [vmem:[#allocation2 + $0x170] sm:$0xff]  ;;  %v1242_v17 = vld [vmem:[#allocation2 + $0x2] sm:$0xff] }
  0x42   : > { %v1243_v18 = vld [vmem:[#allocation2 + $0xa] sm:$0xff] }
  0x43   : > { %5849 = vmatmul.mubr.msk.f32.gmra.mxu0 %vm463_vm1, %v6786_v3 }
  0x44   : > { %5899 = vmatmul.mubr.msk.f32.gmra.mxu1 %vm463_vm1, %v6788_v4  ;;  %5851 = vmatprep.mubr.msk.f32.mxu0 %vm463_vm1, %v6790_v5 }
  0x45   : > { %5901 = vmatprep.mubr.msk.f32.mxu1 %vm463_vm1, %v6792_v6 }
  0x47   : > { %5852 = vmatmul.mubr.msk.f32.gmra.mxu0 %vm463_vm1, %v6802_v7 }
  0x48   : > { %5902 = vmatmul.mubr.msk.f32.gmra.mxu1 %vm463_vm1, %v6804_v10  ;;  %5854 = vmatprep.mubr.msk.f32.mxu0 %vm463_vm1, %v6806_v11 }
  0x49   : > { %5904 = vmatprep.mubr.msk.f32.mxu1 %vm463_vm1, %v6808_v12 }
  0x4b   : > { %5855 = vmatmul.mubr.msk.f32.gmra.mxu0 %vm463_vm1, %v6818_v13 }
  0x4c   : > { %5905 = vmatmul.mubr.msk.f32.gmra.mxu1 %vm463_vm1, %v6820_v14  ;;  %5857 = vmatprep.mubr.msk.f32.mxu0 %vm463_vm1, %v6822_v15 }
  0x4d   : > { %5907 = vmatprep.mubr.msk.f32.mxu1 %vm463_vm1, %v6824_v16 }
  0x4f   : > { %5858 = vmatmul.mubr.msk.f32.gmra.mxu0 %vm463_vm1, %v6837_v19 }
  0x50   : > { %5908 = vmatmul.mubr.msk.f32.gmra.mxu1 %vm463_vm1, %v6839_v20  ;;  %5860 = vmatprep.mubr.msk.f32.mxu0 %vm463_vm1, %v6842_v21 }
  0x51   : > { %5910 = vmatprep.mubr.msk.f32.mxu1 %vm463_vm1, %v6844_v22 }
  0x53   : > { %5861 = vmatmul.mubr.msk.f32.gmra.mxu0 %vm463_vm1, %v6854_v23 }
  0x54   : > { %5911 = vmatmul.mubr.msk.f32.gmra.mxu1 %vm463_vm1, %v6856_v24  ;;  %5863 = vmatprep.mubr.msk.f32.mxu0 %vm463_vm1, %v6858_v25 }
  0x55   : > { %5913 = vmatprep.mubr.msk.f32.mxu1 %vm463_vm1, %v6860_v26 }
  0x57   : > { %5864 = vmatmul.mubr.msk.f32.gmra.mxu0 %vm463_vm1, %v6870_v27 }
  0x58   : > { %5914 = vmatmul.mubr.msk.f32.gmra.mxu1 %vm463_vm1, %v6872_v28  ;;  %5866 = vmatprep.mubr.msk.f32.mxu0 %vm463_vm1, %v6874_v29 }
  0x59   : > { %5916 = vmatprep.mubr.msk.f32.mxu1 %vm463_vm1, %v6876_v30 }
  0x5b   : > { %5867 = vmatmul.mubr.msk.f32.gmra.mxu0 %vm463_vm1, %v6886_v51 }
  0x5c   : > { %5917 = vmatmul.mubr.msk.f32.gmra.mxu1 %vm463_vm1, %v6888_v52  ;;  %5869 = vmatprep.mubr.msk.f32.mxu0 %vm463_vm1, %v6890_v54 }
  0x5d   : > { %5919 = vmatprep.mubr.msk.f32.mxu1 %vm463_vm1, %v6892_v55 }
  0x5f   : > { %5870 = vmatmul.mubr.msk.f32.gmra.mxu0 %vm463_vm1, %v6902_v56 }
  0x60   : > { %5920 = vmatmul.mubr.msk.f32.gmra.mxu1 %vm463_vm1, %v6904_v57  ;;  %5872 = vmatprep.mubr.msk.f32.mxu0 %vm463_vm1, %v6906_v58  ;;  %v6929_v58 = vld [vmem:[#allocation2 + $0x1a] sm:$0xff] }
  0x61   : > { %5922 = vmatprep.mubr.msk.f32.mxu1 %vm463_vm1, %v6908_v59 }
  0x63   : > { %5873 = vmatmul.mubr.msk.f32.gmra.mxu0 %vm463_vm1, %v6918_v61  ;;  %v6937_v61 = vld [vmem:[%s8475_s3 + $0x18] sm:$0xf] }
  0x64   : > { %5923 = vmatmul.mubr.msk.f32.gmra.mxu1 %vm463_vm1, %v6920_v62  ;;  %5927 = vmatprep.mubr.msk.f32.mxu0 %vm463_vm1, %v1242_v17  ;;  %v6942_v17 = vld [vmem:[%s8475_s3 + $0x14] sm:$0xf] }
  0x65   : > { %5977 = vmatprep.mubr.msk.f32.mxu1 %vm463_vm1, %v6661_v32 }
  0x67   : > { %5928 = vmatmul.mubr.msk.f32.vlgmr.msra.gmra.mxu0 %vm463_vm1, %v1243_v18  ;;  %v6948_v18 = vld [vmem:[#allocation2 + $0x22] sm:$0xff] }
  0x68   : > { %5978 = vmatmul.mubr.msk.f32.vlgmr.msra.gmra.mxu1 %vm463_vm1, %v6672_v34  ;;  %6026 = vmatpush3.msk.msra.mxu0 %vm689_vm0, %v6606_v8  ;;  %v6954_v34 = vld [vmem:[#allocation2 + $0x32] sm:$0xff]  ;;  %v6968_v8 = vld [vmem:[#allocation2 + $0x3a] sm:$0xff] }
  0x69   : > { %6076 = vmatpush3.msk.msra.mxu1 %vm689_vm0, %v6611_v9  ;;  %5930 = vmatprep.mubr.msk.f32.mxu0 %vm463_vm1, %v6929_v58  ;;  %8549 = vst [vmem:[#allocation21_spill] sm:$0xff] %v6954_v34  ;;  %v6970_v9 = vld [vmem:[#allocation2 + $0x4a] sm:$0xff] }
  0x6a   : > { %5980 = vmatprep.mubr.msk.f32.mxu1 %vm463_vm1, %v6676_v36  ;;  %6125 = vmatprep.subr.msk.mxu0 %vm689_vm0, %v6937_v61  ;;  %8550 = vst [vmem:[#allocation22_spill] sm:$0xff] %v6970_v9 }
  0x6b   : > { %6175 = vmatprep.subr.msk.mxu1 %vm689_vm0, %v6942_v17  ;;  %5931 = vmatmul.mubr.msk.f32.gmra.mxu0 %vm463_vm1, %v6948_v18 }
  0x6c   : > { %5981 = vmatmul.mubr.msk.f32.gmra.mxu1 %vm463_vm1, %v6688_v38  ;;  %5933 = vmatprep.mubr.msk.f32.mxu0 %vm463_vm1, %v6954_v34  ;;  %v6980_v38 = vld [vmem:[#allocation2 + $0x52] sm:$0xff]  ;;  %v6982_v34 = vld [vmem:[#allocation2 + $0x62] sm:$0xff] }
  0x6d   : > { %5983 = vmatprep.mubr.msk.f32.mxu1 %vm463_vm1, %v6692_v40  ;;  %8551 = vst [vmem:[#allocation23_spill] sm:$0xff] %v6982_v34 }
  0x6f   : > { %5934 = vmatmul.mubr.msk.f32.gmra.mxu0 %vm463_vm1, %v6968_v8 }
  0x70   : > { %5984 = vmatmul.mubr.msk.f32.gmra.mxu1 %vm463_vm1, %v6704_v42  ;;  %5936 = vmatprep.mubr.msk.f32.mxu0 %vm463_vm1, %v6970_v9  ;;  %v6992_v42 = vld [vmem:[#allocation2 + $0x6a] sm:$0xff]  ;;  %v6994_v9 = vld [vmem:[#allocation2 + $0x7a] sm:$0xff] }
  0x71   : > { %5986 = vmatprep.mubr.msk.f32.mxu1 %vm463_vm1, %v6708_v44  ;;  %8552 = vst [vmem:[#allocation24_spill] sm:$0xff] %v6994_v9 }
  0x73   : > { %5937 = vmatmul.mubr.msk.f32.gmra.mxu0 %vm463_vm1, %v6980_v38 }
  0x74   : > { %5987 = vmatmul.mubr.msk.f32.gmra.mxu1 %vm463_vm1, %v6720_v46  ;;  %5939 = vmatprep.mubr.msk.f32.mxu0 %vm463_vm1, %v6982_v34  ;;  %v7004_v46 = vld [vmem:[#allocation2 + $0x82] sm:$0xff]  ;;  %v7006_v34 = vld [vmem:[#allocation2 + $0x92] sm:$0xff] }
  0x75   : > { %5989 = vmatprep.mubr.msk.f32.mxu1 %vm463_vm1, %v6724_v48  ;;  %8553 = vst [vmem:[#allocation25_spill] sm:$0xff] %v7006_v34 }
  0x77   : > { %5940 = vmatmul.mubr.msk.f32.gmra.mxu0 %vm463_vm1, %v6992_v42 }
  0x78   : > { %5990 = vmatmul.mubr.msk.f32.gmra.mxu1 %vm463_vm1, %v6728_v50  ;;  %5942 = vmatprep.mubr.msk.f32.mxu0 %vm463_vm1, %v6994_v9  ;;  %v7016_v50 = vld [vmem:[#allocation2 + $0x9a] sm:$0xff]  ;;  %v7018_v9 = vld [vmem:[#allocation2 + $0xaa] sm:$0xff] }
  0x79   : > { %5992 = vmatprep.mubr.msk.f32.mxu1 %vm463_vm1, %v6753_v60  ;;  %8554 = vst [vmem:[#allocation26_spill] sm:$0xff] %v7018_v9 }
  0x7b   : > { %5943 = vmatmul.mubr.msk.f32.gmra.mxu0 %vm463_vm1, %v7004_v46 }
  0x7c   : > { %5993 = vmatmul.mubr.msk.f32.gmra.mxu1 %vm463_vm1, %v6772_v0  ;;  %5945 = vmatprep.mubr.msk.f32.mxu0 %vm463_vm1, %v7006_v34  ;;  %v7028_v0 = vld [vmem:[#allocation2 + $0xb2] sm:$0xff]  ;;  %v7030_v34 = vld [vmem:[#allocation2 + $0xc2] sm:$0xff] }
  0x7d   : > { %5995 = vmatprep.mubr.msk.f32.mxu1 %vm463_vm1, %v6776_v2  ;;  %8555 = vst [vmem:[#allocation27_spill] sm:$0xff] %v7030_v34 }
  0x7f   : > { %5946 = vmatmul.mubr.msk.f32.gmra.mxu0 %vm463_vm1, %v7016_v50 }
  0x80   : > { %5996 = vmatmul.mubr.msk.f32.gmra.mxu1 %vm463_vm1, %v6788_v4  ;;  %5948 = vmatprep.mubr.msk.f32.mxu0 %vm463_vm1, %v7018_v9  ;;  %v7040_v4 = vld [vmem:[#allocation2 + $0xca] sm:$0xff]  ;;  %v7042_v9 = vld [vmem:[#allocation2 + $0xda] sm:$0xff] }
  0x81   : > { %5998 = vmatprep.mubr.msk.f32.mxu1 %vm463_vm1, %v6792_v6  ;;  %8556 = vst [vmem:[#allocation28_spill] sm:$0xff] %v7042_v9 }
  0x83   : > { %5949 = vmatmul.mubr.msk.f32.gmra.mxu0 %vm463_vm1, %v7028_v0 }
  0x84   : > { %5999 = vmatmul.mubr.msk.f32.gmra.mxu1 %vm463_vm1, %v6804_v10  ;;  %5951 = vmatprep.mubr.msk.f32.mxu0 %vm463_vm1, %v7030_v34  ;;  %v7052_v10 = vld [vmem:[#allocation2 + $0xe2] sm:$0xff]  ;;  %v7054_v34 = vld [vmem:[#allocation2 + $0xf2] sm:$0xff] }
  0x85   : > { %6001 = vmatprep.mubr.msk.f32.mxu1 %vm463_vm1, %v6808_v12  ;;  %8557 = vst [vmem:[#allocation29_spill] sm:$0xff] %v7054_v34 }
  0x87   : > { %5952 = vmatmul.mubr.msk.f32.gmra.mxu0 %vm463_vm1, %v7040_v4 }
  0x88   : > { %6002 = vmatmul.mubr.msk.f32.gmra.mxu1 %vm463_vm1, %v6820_v14  ;;  %5954 = vmatprep.mubr.msk.f32.mxu0 %vm463_vm1, %v7042_v9  ;;  %v7064_v14 = vld [vmem:[#allocation2 + $0xfa] sm:$0xff]  ;;  %v7066_v9 = vld [vmem:[#allocation2 + $0x10a] sm:$0xff] }
  0x89   : > { %6004 = vmatprep.mubr.msk.f32.mxu1 %vm463_vm1, %v6824_v16  ;;  %8558 = vst [vmem:[#allocation30_spill] sm:$0xff] %v7066_v9 }
  0x8b   : > { %5955 = vmatmul.mubr.msk.f32.gmra.mxu0 %vm463_vm1, %v7052_v10 }
  0x8c   : > { %6005 = vmatmul.mubr.msk.f32.gmra.mxu1 %vm463_vm1, %v6839_v20  ;;  %5957 = vmatprep.mubr.msk.f32.mxu0 %vm463_vm1, %v7054_v34  ;;  %v7076_v20 = vld [vmem:[#allocation2 + $0x112] sm:$0xff]  ;;  %v7078_v34 = vld [vmem:[#allocation2 + $0x122] sm:$0xff] }
  0x8d   : > { %6007 = vmatprep.mubr.msk.f32.mxu1 %vm463_vm1, %v6844_v22  ;;  %8559 = vst [vmem:[#allocation31_spill] sm:$0xff] %v7078_v34 }
  0x8f   : > { %5958 = vmatmul.mubr.msk.f32.gmra.mxu0 %vm463_vm1, %v7064_v14 }
  0x90   : > { %6008 = vmatmul.mubr.msk.f32.gmra.mxu1 %vm463_vm1, %v6856_v24  ;;  %5960 = vmatprep.mubr.msk.f32.mxu0 %vm463_vm1, %v7066_v9  ;;  %v7088_v24 = vld [vmem:[#allocation2 + $0x12a] sm:$0xff]  ;;  %v7090_v9 = vld [vmem:[#allocation2 + $0x13a] sm:$0xff] }
  0x91   : > { %6010 = vmatprep.mubr.msk.f32.mxu1 %vm463_vm1, %v6860_v26  ;;  %8560 = vst [vmem:[#allocation32_spill] sm:$0xff] %v7090_v9 }
  0x93   : > { %5961 = vmatmul.mubr.msk.f32.gmra.mxu0 %vm463_vm1, %v7076_v20 }
  0x94   : > { %6011 = vmatmul.mubr.msk.f32.gmra.mxu1 %vm463_vm1, %v6872_v28  ;;  %5963 = vmatprep.mubr.msk.f32.mxu0 %vm463_vm1, %v7078_v34  ;;  %v7100_v28 = vld [vmem:[#allocation2 + $0x142] sm:$0xff]  ;;  %v7102_v34 = vld [vmem:[#allocation2 + $0x152] sm:$0xff] }
  0x95   : > { %6013 = vmatprep.mubr.msk.f32.mxu1 %vm463_vm1, %v6876_v30  ;;  %8561 = vst [vmem:[#allocation33_spill] sm:$0xff] %v7102_v34 }
  0x97   : > { %5964 = vmatmul.mubr.msk.f32.gmra.mxu0 %vm463_vm1, %v7088_v24 }
  0x98   : > { %6014 = vmatmul.mubr.msk.f32.gmra.mxu1 %vm463_vm1, %v6888_v52  ;;  %5966 = vmatprep.mubr.msk.f32.mxu0 %vm463_vm1, %v7090_v9  ;;  %v7112_v52 = vld [vmem:[#allocation2 + $0x15a] sm:$0xff]  ;;  %v7114_v9 = vld [vmem:[#allocation2 + $0x16a] sm:$0xff] }
  0x99   : > { %6016 = vmatprep.mubr.msk.f32.mxu1 %vm463_vm1, %v6892_v55  ;;  %8562 = vst [vmem:[#allocation34_spill] sm:$0xff] %v7114_v9  ;;  %v7116_v55 = vld [vmem:[#allocation2 + $0x180] sm:$0xff] }
  0x9a   : > { %8563 = vst [vmem:[#allocation35_spill] sm:$0xff] %v7116_v55 }
  0x9b   : > { %5967 = vmatmul.mubr.msk.f32.gmra.mxu0 %vm463_vm1, %v7100_v28 }
  0x9c   : > { %6017 = vmatmul.mubr.msk.f32.gmra.mxu1 %vm463_vm1, %v6904_v57  ;;  %5969 = vmatprep.mubr.msk.f32.mxu0 %vm463_vm1, %v7102_v34  ;;  %v7126_v57 = vld [vmem:[#allocation2 + $0x172] sm:$0xff] }
  0x9d   : > { %6019 = vmatprep.mubr.msk.f32.mxu1 %vm463_vm1, %v6908_v59  ;;  %8564 = vst [vmem:[#allocation36_spill] sm:$0xff] %v7126_v57  ;;  %v7128_v59 = vld [vmem:[#allocation2 + $0x188] sm:$0xff] }
  0x9e   : > { %8565 = vst [vmem:[#allocation37_spill] sm:$0xff] %v7128_v59 }
  0x9f   : > { %5970 = vmatmul.mubr.msk.f32.gmra.mxu0 %vm463_vm1, %v7112_v52 }
  0xa0   : > { %6020 = vmatmul.mubr.msk.f32.gmra.mxu1 %vm463_vm1, %v6920_v62  ;;  %5972 = vmatprep.mubr.msk.f32.mxu0 %vm463_vm1, %v7114_v9 }
  0xa1   : > { %6022 = vmatprep.mubr.msk.f32.mxu1 %vm463_vm1, %v7116_v55  ;;  %v7145_v55 = vld [vmem:[%s8475_s3 + $0x20] sm:$0xf] }
  0xa3   : > { %5973 = vmatmul.mubr.msk.f32.gmra.mxu0 %vm463_vm1, %v7126_v57 }
  0xa4   : > { %6023 = vmatmul.mubr.msk.f32.gmra.mxu1 %vm463_vm1, %v7128_v59  ;;  %6027 = vmatprep.mubr.msk.f32.mxu0 %vm463_vm1, %v6659_v31  ;;  %v7150_v59 = vld [vmem:[%s8475_s3 + $0x24] sm:$0xf] }
  0xa5   : > { %6077 = vmatprep.mubr.msk.f32.mxu1 %vm463_vm1, %v6659_v31  ;;  %v8566_v31 = vld [vmem:[#allocation18_spill] sm:$0xff] }
  0xa7   : > { %6028 = vmatmul.mubr.msk.f32.vlgmr.msra.gmra.mxu0 %vm463_vm1, %v6663_v33 }
  0xa8   : > { %6078 = vmatmul.mubr.msk.f32.vlgmr.msra.gmra.mxu1 %vm463_vm1, %v6663_v33  ;;  %6126 = vmatpush3.msk.msra.mxu0 %vm689_vm0, %v6937_v61  ;;  %v2054_v33 = vld [vmem:[#allocation2 + $0x181] sm:$0xff] }
  0xa9   : > { %6176 = vmatpush3.msk.msra.mxu1 %vm689_vm0, %v6942_v17  ;;  %6030 = vmatprep.mubr.msk.f32.mxu0 %vm463_vm1, %v6674_v35 }
  0xaa   : > { %6080 = vmatprep.mubr.msk.f32.mxu1 %vm463_vm1, %v6674_v35  ;;  %6225 = vmatprep.subr.msk.mxu0 %vm689_vm0, %v7145_v55  ;;  %v8567_v35 = vld [vmem:[#allocation20_spill] sm:$0xff] }
  0xab   : > { %6275 = vmatprep.subr.msk.mxu1 %vm689_vm0, %v7150_v59  ;;  %6031 = vmatmul.mubr.msk.f32.gmra.mxu0 %vm463_vm1, %v6686_v37 }
  0xac   : > { %6081 = vmatmul.mubr.msk.f32.gmra.mxu1 %vm463_vm1, %v6686_v37  ;;  %6033 = vmatprep.mubr.msk.f32.mxu0 %vm463_vm1, %v6690_v39  ;;  %v2055_v37 = vld [vmem:[#allocation2 + $0x189] sm:$0xff] }
  0xad   : > { %6083 = vmatprep.mubr.msk.f32.mxu1 %vm463_vm1, %v6690_v39 }
  0xaf   : > { %6034 = vmatmul.mubr.msk.f32.gmra.mxu0 %vm463_vm1, %v6702_v41 }
  0xb0   : > { %6084 = vmatmul.mubr.msk.f32.gmra.mxu1 %vm463_vm1, %v6702_v41  ;;  %6036 = vmatprep.mubr.msk.f32.mxu0 %vm463_vm1, %v6706_v43 }
  0xb1   : > { %6086 = vmatprep.mubr.msk.f32.mxu1 %vm463_vm1, %v6706_v43 }
  0xb3   : > { %6037 = vmatmul.mubr.msk.f32.gmra.mxu0 %vm463_vm1, %v6718_v45 }
  0xb4   : > { %6087 = vmatmul.mubr.msk.f32.gmra.mxu1 %vm463_vm1, %v6718_v45  ;;  %6039 = vmatprep.mubr.msk.f32.mxu0 %vm463_vm1, %v6722_v47 }
  0xb5   : > { %6089 = vmatprep.mubr.msk.f32.mxu1 %vm463_vm1, %v6722_v47 }
  0xb7   : > { %6040 = vmatmul.mubr.msk.f32.gmra.mxu0 %vm463_vm1, %v6726_v49 }
  0xb8   : > { %6090 = vmatmul.mubr.msk.f32.gmra.mxu1 %vm463_vm1, %v6726_v49  ;;  %6042 = vmatprep.mubr.msk.f32.mxu0 %vm463_vm1, %v6736_v53 }
  0xb9   : > { %6092 = vmatprep.mubr.msk.f32.mxu1 %vm463_vm1, %v6736_v53  ;;  %v8568_v53 = vld [vmem:[#allocation3_spill] sm:$0xff] }
  0xbb   : > { %6043 = vmatmul.mubr.msk.f32.gmra.mxu0 %vm463_vm1, %v6770_v63 }
  0xbc   : > { %6093 = vmatmul.mubr.msk.f32.gmra.mxu1 %vm463_vm1, %v6770_v63  ;;  %6045 = vmatprep.mubr.msk.f32.mxu0 %vm463_vm1, %v6774_v1  ;;  %v7291_v63 = vld [vmem:[%s8475_s3 + $0x28] sm:$0xf] }
  0xbd   : > { %6095 = vmatprep.mubr.msk.f32.mxu1 %vm463_vm1, %v6774_v1  ;;  %v8569_v1 = vld [vmem:[#allocation21_spill] sm:$0xff] }
  0xbf   : > { %6046 = vmatmul.mubr.msk.f32.gmra.mxu0 %vm463_vm1, %v6786_v3 }
  0xc0   : > { %6096 = vmatmul.mubr.msk.f32.gmra.mxu1 %vm463_vm1, %v6786_v3  ;;  %6048 = vmatprep.mubr.msk.f32.mxu0 %vm463_vm1, %v6790_v5 }
  0xc1   : > { %6098 = vmatprep.mubr.msk.f32.mxu1 %vm463_vm1, %v6790_v5 }
  0xc3   : > { %6049 = vmatmul.mubr.msk.f32.gmra.mxu0 %vm463_vm1, %v6802_v7 }
  0xc4   : > { %6099 = vmatmul.mubr.msk.f32.gmra.mxu1 %vm463_vm1, %v6802_v7  ;;  %6051 = vmatprep.mubr.msk.f32.mxu0 %vm463_vm1, %v6806_v11  ;;  %v8570_v7 = vld [vmem:[#allocation4_spill] sm:$0xff] }
  0xc5   : > { %6101 = vmatprep.mubr.msk.f32.mxu1 %vm463_vm1, %v6806_v11 }
  0xc7   : > { %6052 = vmatmul.mubr.msk.f32.gmra.mxu0 %vm463_vm1, %v6818_v13 }
  0xc8   : > { %6102 = vmatmul.mubr.msk.f32.gmra.mxu1 %vm463_vm1, %v6818_v13  ;;  %6054 = vmatprep.mubr.msk.f32.mxu0 %vm463_vm1, %v6822_v15 }
  0xc9   : > { %6104 = vmatprep.mubr.msk.f32.mxu1 %vm463_vm1, %v6822_v15 }
  0xcb   : > { %6055 = vmatmul.mubr.msk.f32.gmra.mxu0 %vm463_vm1, %v6837_v19 }
  0xcc   : > { %6105 = vmatmul.mubr.msk.f32.gmra.mxu1 %vm463_vm1, %v6837_v19  ;;  %6057 = vmatprep.mubr.msk.f32.mxu0 %vm463_vm1, %v6842_v21 }
  0xcd   : > { %6107 = vmatprep.mubr.msk.f32.mxu1 %vm463_vm1, %v6842_v21 }
  0xcf   : > { %6058 = vmatmul.mubr.msk.f32.gmra.mxu0 %vm463_vm1, %v6854_v23 }
  0xd0   : > { %6108 = vmatmul.mubr.msk.f32.gmra.mxu1 %vm463_vm1, %v6854_v23  ;;  %6060 = vmatprep.mubr.msk.f32.mxu0 %vm463_vm1, %v6858_v25 }
  0xd1   : > { %6110 = vmatprep.mubr.msk.f32.mxu1 %vm463_vm1, %v6858_v25  ;;  %v8572_v25 = vld [vmem:[#allocation5_spill] sm:$0xff] }
  0xd3   : > { %6061 = vmatmul.mubr.msk.f32.gmra.mxu0 %vm463_vm1, %v6870_v27 }
  0xd4   : > { %6111 = vmatmul.mubr.msk.f32.gmra.mxu1 %vm463_vm1, %v6870_v27  ;;  %6063 = vmatprep.mubr.msk.f32.mxu0 %vm463_vm1, %v6874_v29 }
  0xd5   : > { %6113 = vmatprep.mubr.msk.f32.mxu1 %vm463_vm1, %v6874_v29 }
  0xd7   : > { %6064 = vmatmul.mubr.msk.f32.gmra.mxu0 %vm463_vm1, %v6886_v51  ;;  %v5829_v39 = vpop.f32.mrf.mxu0 }
  0xd8   : > { %6114 = vmatmul.mubr.msk.f32.gmra.mxu1 %vm463_vm1, %v6886_v51  ;;  %6066 = vmatprep.mubr.msk.f32.mxu0 %vm463_vm1, %v6890_v54 }
  0xd9   : > { %6116 = vmatprep.mubr.msk.f32.mxu1 %vm463_vm1, %v6890_v54  ;;  %v5879_v41 = vpop.f32.mrf.mxu1  ;;  %v759_v45 = vpop.f32.mrf.mxu0 }
  0xda   : > { %v7280_v43 = vadd.f32 %v5879_v41, %v5829_v39  ;;  %v8576_v39 = vld [vmem:[#allocation7_spill] sm:$0xff] }
  0xdb   : > { %6067 = vmatmul.mubr.msk.f32.gmra.mxu0 %vm463_vm1, %v6902_v56  ;;  %v1083_v47 = vpop.f32.mrf.mxu1 }
  0xdc   : > { %6117 = vmatmul.mubr.msk.f32.gmra.mxu1 %vm463_vm1, %v6902_v56  ;;  %6069 = vmatprep.mubr.msk.f32.mxu0 %vm463_vm1, %v8566_v31  ;;  %v7282_v49 = vadd.f32 %v1083_v47, %v759_v45 }
  0xdd   : > { %6119 = vmatprep.mubr.msk.f32.mxu1 %vm463_vm1, %v8566_v31 }
  0xdf   : > { %6070 = vmatmul.mubr.msk.f32.gmra.mxu0 %vm463_vm1, %v8567_v35 }
  0xe0   : > { %6120 = vmatmul.mubr.msk.f32.gmra.mxu1 %vm463_vm1, %v8567_v35  ;;  %6072 = vmatprep.mubr.msk.f32.mxu0 %vm463_vm1, %v2054_v33 }
  0xe1   : > { %6122 = vmatprep.mubr.msk.f32.mxu1 %vm463_vm1, %v2054_v33 }
  0xe3   : > { %6073 = vmatmul.mubr.msk.f32.gmra.mxu0 %vm463_vm1, %v2055_v37 }
  0xe4   : > { %6123 = vmatmul.mubr.msk.f32.gmra.mxu1 %vm463_vm1, %v2055_v37  ;;  %6127 = vmatprep.mubr.msk.f32.mxu0 %vm463_vm1, %v6661_v32  ;;  %v7296_v32 = vld [vmem:[%s8475_s3 + $0x2c] sm:$0xf] }
  0xe5   : > { %6177 = vmatprep.mubr.msk.f32.mxu1 %vm463_vm1, %v6929_v58 }
  0xe7   : > { %6128 = vmatmul.mubr.msk.f32.vlgmr.msra.gmra.mxu0 %vm463_vm1, %v8568_v53 }
  0xe8   : > { %6178 = vmatmul.mubr.msk.f32.vlgmr.msra.gmra.mxu1 %vm463_vm1, %v6948_v18  ;;  %6226 = vmatpush3.msk.msra.mxu0 %vm689_vm0, %v7145_v55 }
  0xe9   : > { %6276 = vmatpush3.msk.msra.mxu1 %vm689_vm0, %v7150_v59  ;;  %6130 = vmatprep.mubr.msk.f32.mxu0 %vm463_vm1, %v6676_v36  ;;  %v8571_v36 = vld [vmem:[#allocation22_spill] sm:$0xff] }
  0xea   : > { %6180 = vmatprep.mubr.msk.f32.mxu1 %vm463_vm1, %v8569_v1  ;;  %6325 = vmatprep.subr.msk.mxu0 %vm689_vm0, %v7291_v63  ;;  %v8574_v59 = vld [vmem:[#allocation6_spill] sm:$0xff] }
  0xeb   : > { %6375 = vmatprep.subr.msk.mxu1 %vm689_vm0, %v7296_v32  ;;  %v5832_v3 = vpop.f32.mrf.mxu0  ;;  %6131 = vmatmul.mubr.msk.f32.gmra.mxu0 %vm463_vm1, %v8570_v7  ;;  %v8578_v7 = vld [vmem:[#allocation8_spill] sm:$0xff] }
  0xec   : > { %v5882_v5 = vpop.f32.mrf.mxu1  ;;  %6181 = vmatmul.mubr.msk.f32.gmra.mxu1 %vm463_vm1, %v6968_v8  ;;  %6133 = vmatprep.mubr.msk.f32.mxu0 %vm463_vm1, %v6692_v40  ;;  %v8573_v40 = vld [vmem:[#allocation23_spill] sm:$0xff] }
  0xed   : > { %v7314_v11 = vadd.f32 %v5882_v5, %v5832_v3  ;;  %6183 = vmatprep.mubr.msk.f32.mxu1 %vm463_vm1, %v8571_v36  ;;  %v769_v13 = vpop.f32.mrf.mxu0 }
  0xee   : > { %v1093_v15 = vpop.f32.mrf.mxu1 }
  0xef   : > { %v7320_v19 = vadd.f32 %v1093_v15, %v769_v13  ;;  %v5835_v21 = vpop.f32.mrf.mxu0  ;;  %6134 = vmatmul.mubr.msk.f32.gmra.mxu0 %vm463_vm1, %v8572_v25 }
  0xf0   : > { %v5885_v23 = vpop.f32.mrf.mxu1  ;;  %6184 = vmatmul.mubr.msk.f32.gmra.mxu1 %vm463_vm1, %v6980_v38  ;;  %6136 = vmatprep.mubr.msk.f32.mxu0 %vm463_vm1, %v6708_v44  ;;  %v8575_v44 = vld [vmem:[#allocation24_spill] sm:$0xff] }
  0xf1   : > { %v7326_v27 = vadd.f32 %v5885_v23, %v5835_v21  ;;  %6186 = vmatprep.mubr.msk.f32.mxu1 %vm463_vm1, %v8573_v40  ;;  %v779_v29 = vpop.f32.mrf.mxu0 }
  0xf2   : > { %v1103_v51 = vpop.f32.mrf.mxu1 }
  0xf3   : > { %v7332_v54 = vadd.f32 %v1103_v51, %v779_v29  ;;  %v5838_v55 = vpop.f32.mrf.mxu0  ;;  %6137 = vmatmul.mubr.msk.f32.gmra.mxu0 %vm463_vm1, %v8574_v59  ;;  %v8580_v51 = vld [vmem:[#allocation9_spill] sm:$0xff] }
  0xf4   : > { %v5888_v56 = vpop.f32.mrf.mxu1  ;;  %6187 = vmatmul.mubr.msk.f32.gmra.mxu1 %vm463_vm1, %v6992_v42  ;;  %6139 = vmatprep.mubr.msk.f32.mxu0 %vm463_vm1, %v6724_v48  ;;  %v8577_v48 = vld [vmem:[#allocation25_spill] sm:$0xff] }
  0xf5   : > { %v7338_v61 = vadd.f32 %v5888_v56, %v5838_v55  ;;  %6189 = vmatprep.mubr.msk.f32.mxu1 %vm463_vm1, %v8575_v44  ;;  %v789_v17 = vpop.f32.mrf.mxu0 }
  0xf6   : > { %v1113_v31 = vpop.f32.mrf.mxu1 }
  0xf7   : > { %v7344_v33 = vadd.f32 %v1113_v31, %v789_v17  ;;  %v5841_v35 = vpop.f32.mrf.mxu0  ;;  %6140 = vmatmul.mubr.msk.f32.gmra.mxu0 %vm463_vm1, %v8576_v39 }
  0xf8   : > { %v5891_v37 = vpop.f32.mrf.mxu1  ;;  %6190 = vmatmul.mubr.msk.f32.gmra.mxu1 %vm463_vm1, %v7004_v46  ;;  %6142 = vmatprep.mubr.msk.f32.mxu0 %vm463_vm1, %v6753_v60  ;;  %v8579_v60 = vld [vmem:[#allocation26_spill] sm:$0xff] }
  0xf9   : > { %v7350_v41 = vadd.f32 %v5891_v37, %v5841_v35  ;;  %6192 = vmatprep.mubr.msk.f32.mxu1 %vm463_vm1, %v8577_v48  ;;  %v799_v45 = vpop.f32.mrf.mxu0  ;;  %v8582_v37 = vld [vmem:[#allocation10_spill] sm:$0xff] }
  0xfa   : > { %v1123_v47 = vpop.f32.mrf.mxu1 }
  0xfb   : > { %v7356_v53 = vadd.f32 %v1123_v47, %v799_v45  ;;  %v5844_v3 = vpop.f32.mrf.mxu0  ;;  %6143 = vmatmul.mubr.msk.f32.gmra.mxu0 %vm463_vm1, %v8578_v7 }
  0xfc   : > { %v5894_v5 = vpop.f32.mrf.mxu1  ;;  %6193 = vmatmul.mubr.msk.f32.gmra.mxu1 %vm463_vm1, %v7016_v50  ;;  %6145 = vmatprep.mubr.msk.f32.mxu0 %vm463_vm1, %v6776_v2  ;;  %v8581_v2 = vld [vmem:[#allocation27_spill] sm:$0xff] }
  0xfd   : > { %v7362_v13 = vadd.f32 %v5894_v5, %v5844_v3  ;;  %6195 = vmatprep.mubr.msk.f32.mxu1 %vm463_vm1, %v8579_v60  ;;  %v809_v15 = vpop.f32.mrf.mxu0 }
  0xfe   : > { %v1133_v21 = vpop.f32.mrf.mxu1 }
  0xff   : > { %v7368_v23 = vadd.f32 %v1133_v21, %v809_v15  ;;  %v5847_v25 = vpop.f32.mrf.mxu0  ;;  %6146 = vmatmul.mubr.msk.f32.gmra.mxu0 %vm463_vm1, %v8580_v51  ;;  %v8584_v15 = vld [vmem:[#allocation11_spill] sm:$0xff] }
 0x100   : > { %v5897_v29 = vpop.f32.mrf.mxu1  ;;  %6196 = vmatmul.mubr.msk.f32.gmra.mxu1 %vm463_vm1, %v7028_v0  ;;  %6148 = vmatprep.mubr.msk.f32.mxu0 %vm463_vm1, %v6792_v6  ;;  %v8583_v6 = vld [vmem:[#allocation28_spill] sm:$0xff] }
 0x101   : > { %v7374_v55 = vadd.f32 %v5897_v29, %v5847_v25  ;;  %6198 = vmatprep.mubr.msk.f32.mxu1 %vm463_vm1, %v8581_v2  ;;  %v819_v56 = vpop.f32.mrf.mxu0 }
 0x102   : > { %v1143_v59 = vpop.f32.mrf.mxu1 }
 0x103   : > { %v7380_v17 = vadd.f32 %v1143_v59, %v819_v56  ;;  %v5850_v31 = vpop.f32.mrf.mxu0  ;;  %6149 = vmatmul.mubr.msk.f32.gmra.mxu0 %vm463_vm1, %v8582_v37 }
 0x104   : > { %v5900_v35 = vpop.f32.mrf.mxu1  ;;  %6199 = vmatmul.mubr.msk.f32.gmra.mxu1 %vm463_vm1, %v7040_v4  ;;  %6151 = vmatprep.mubr.msk.f32.mxu0 %vm463_vm1, %v6808_v12  ;;  %v8585_v12 = vld [vmem:[#allocation29_spill] sm:$0xff] }
 0x105   : > { %v7386_v39 = vadd.f32 %v5900_v35, %v5850_v31  ;;  %6201 = vmatprep.mubr.msk.f32.mxu1 %vm463_vm1, %v8583_v6  ;;  %v829_v45 = vpop.f32.mrf.mxu0  ;;  %v8586_v31 = vld [vmem:[#allocation12_spill] sm:$0xff] }
 0x106   : > { %v1153_v47 = vpop.f32.mrf.mxu1 }
 0x107   : > { %v7392_v3 = vadd.f32 %v1153_v47, %v829_v45  ;;  %v5853_v5 = vpop.f32.mrf.mxu0  ;;  %6152 = vmatmul.mubr.msk.f32.gmra.mxu0 %vm463_vm1, %v8584_v15  ;;  %v8588_v15 = vld [vmem:[#allocation13_spill] sm:$0xff] }
 0x108   : > { %v5903_v7 = vpop.f32.mrf.mxu1  ;;  %6202 = vmatmul.mubr.msk.f32.gmra.mxu1 %vm463_vm1, %v7052_v10  ;;  %6154 = vmatprep.mubr.msk.f32.mxu0 %vm463_vm1, %v6824_v16  ;;  %v8587_v16 = vld [vmem:[#allocation30_spill] sm:$0xff] }
 0x109   : > { %v7398_v21 = vadd.f32 %v5903_v7, %v5853_v5  ;;  %6204 = vmatprep.mubr.msk.f32.mxu1 %vm463_vm1, %v8585_v12  ;;  %v839_v25 = vpop.f32.mrf.mxu0 }
 0x10a   : > { %v1163_v29 = vpop.f32.mrf.mxu1 }
 0x10b   : > { %v7404_v51 = vadd.f32 %v1163_v29, %v839_v25  ;;  %v5856_v56 = vpop.f32.mrf.mxu0  ;;  %6155 = vmatmul.mubr.msk.f32.gmra.mxu0 %vm463_vm1, %v8586_v31 }
 0x10c   : > { %v5906_v59 = vpop.f32.mrf.mxu1  ;;  %6205 = vmatmul.mubr.msk.f32.gmra.mxu1 %vm463_vm1, %v7064_v14  ;;  %6157 = vmatprep.mubr.msk.f32.mxu0 %vm463_vm1, %v6844_v22  ;;  %v8589_v22 = vld [vmem:[#allocation31_spill] sm:$0xff] }
 0x10d   : > { %v7410_v35 = vadd.f32 %v5906_v59, %v5856_v56  ;;  %6207 = vmatprep.mubr.msk.f32.mxu1 %vm463_vm1, %v8587_v16  ;;  %v849_v37 = vpop.f32.mrf.mxu0 }
 0x10e   : > { %v1173_v45 = vpop.f32.mrf.mxu1 }
 0x10f   : > { %v7416_v47 = vadd.f32 %v1173_v45, %v849_v37  ;;  %v5859_v5 = vpop.f32.mrf.mxu0  ;;  %6158 = vmatmul.mubr.msk.f32.gmra.mxu0 %vm463_vm1, %v8588_v15  ;;  %v8591_v45 = vld [vmem:[#allocation14_spill] sm:$0xff] }
 0x110   : > { %v5909_v7 = vpop.f32.mrf.mxu1  ;;  %6208 = vmatmul.mubr.msk.f32.gmra.mxu1 %vm463_vm1, %v7076_v20  ;;  %6160 = vmatprep.mubr.msk.f32.mxu0 %vm463_vm1, %v6860_v26  ;;  %v8592_v26 = vld [vmem:[#allocation32_spill] sm:$0xff] }
 0x111   : > { %v7422_v25 = vadd.f32 %v5909_v7, %v5859_v5  ;;  %6210 = vmatprep.mubr.msk.f32.mxu1 %vm463_vm1, %v8589_v22  ;;  %v859_v29 = vpop.f32.mrf.mxu0  ;;  %v8594_v22 = vld [vmem:[#allocation15_spill] sm:$0xff] }
 0x112   : > { %v1183_v56 = vpop.f32.mrf.mxu1 }
 0x113   : > { %v7428_v59 = vadd.f32 %v1183_v56, %v859_v29  ;;  %v5862_v31 = vpop.f32.mrf.mxu0  ;;  %6161 = vmatmul.mubr.msk.f32.gmra.mxu0 %vm463_vm1, %v8591_v45 }
 0x114   : > { %v5912_v37 = vpop.f32.mrf.mxu1  ;;  %6211 = vmatmul.mubr.msk.f32.gmra.mxu1 %vm463_vm1, %v7088_v24  ;;  %6163 = vmatprep.mubr.msk.f32.mxu0 %vm463_vm1, %v6876_v30 }
 0x115   : > { %8590 = vst [vmem:[#allocation18_spill] sm:$0xff] %v7428_v59  ;;  %v7434_v5 = vadd.f32 %v5912_v37, %v5862_v31  ;;  %6213 = vmatprep.mubr.msk.f32.mxu1 %vm463_vm1, %v8592_v26  ;;  %v869_v7 = vpop.f32.mrf.mxu0  ;;  %v8595_v37 = vld [vmem:[#allocation16_spill] sm:$0xff]  ;;  %v8597_v26 = vld [vmem:[#allocation17_spill] sm:$0xff] }
 0x116   : > { %v1193_v15 = vpop.f32.mrf.mxu1 }
 0x117   : > { %v7440_v29 = vadd.f32 %v1193_v15, %v869_v7  ;;  %v5865_v56 = vpop.f32.mrf.mxu0  ;;  %6164 = vmatmul.mubr.msk.f32.gmra.mxu0 %vm463_vm1, %v8594_v22 }
 0x118   : > { %v5915_v59 = vpop.f32.mrf.mxu1  ;;  %6214 = vmatmul.mubr.msk.f32.gmra.mxu1 %vm463_vm1, %v7100_v28  ;;  %6166 = vmatprep.mubr.msk.f32.mxu0 %vm463_vm1, %v8595_v37 }
 0x119   : > { %8593 = vst [vmem:[#allocation20_spill] sm:$0xff] %v7440_v29  ;;  %v7446_v31 = vadd.f32 %v5915_v59, %v5865_v56  ;;  %6216 = vmatprep.mubr.msk.f32.mxu1 %vm463_vm1, %v7102_v34  ;;  %v879_v30 = vpop.f32.mrf.mxu0  ;;  %v8599_v59 = vld [vmem:[#allocation19_spill] sm:$0xff] }
 0x11a   : > { %v1203_v45 = vpop.f32.mrf.mxu1 }
 0x11b   : > { %v7452_v7 = vadd.f32 %v1203_v45, %v879_v30  ;;  %v5868_v15 = vpop.f32.mrf.mxu0  ;;  %6167 = vmatmul.mubr.msk.f32.gmra.mxu0 %vm463_vm1, %v8597_v26  ;;  %v7464_v30 = vld [vmem:[#allocation2 + $0x182] sm:$0xff] }
 0x11c   : > { %v5918_v29 = vpop.f32.mrf.mxu1  ;;  %6217 = vmatmul.mubr.msk.f32.gmra.mxu1 %vm463_vm1, %v7112_v52  ;;  %6169 = vmatprep.mubr.msk.f32.mxu0 %vm463_vm1, %v8599_v59  ;;  %8600 = vst [vmem:[#allocation4_spill] sm:$0xff] %v7464_v30 }
 0x11d   : > { %8596 = vst [vmem:[#allocation3_spill] sm:$0xff] %v7452_v7  ;;  %v7458_v22 = vadd.f32 %v5918_v29, %v5868_v15  ;;  %6219 = vmatprep.mubr.msk.f32.mxu1 %vm463_vm1, %v7114_v9  ;;  %v889_v56 = vpop.f32.mrf.mxu0  ;;  %v8603_v29 = vld [vmem:[#allocation35_spill] sm:$0xff] }
 0x11e   : > { %v1213_v37 = vpop.f32.mrf.mxu1  ;;  %v7478_v15 = vld [vmem:[#allocation2 + $0x18a] sm:$0xff] }
 0x11f   : > { %8598 = vst [vmem:[#allocation21_spill] sm:$0xff] %v7458_v22  ;;  %v7466_v45 = vadd.f32 %v1213_v37, %v889_v56  ;;  %v5871_v7 = vpop.f32.mrf.mxu0  ;;  %6170 = vmatmul.mubr.msk.f32.gmra.mxu0 %vm463_vm1, %v6920_v62  ;;  %v3525_v37 = vld [vmem:[#allocation2 + $0x30] sm:$0xff]  ;;  %v8605_v22 = vld [vmem:[#allocation37_spill] sm:$0xff] }
 0x120   : > { %v5921_v34 = vpop.f32.mrf.mxu1  ;;  %6220 = vmatmul.mubr.msk.f32.gmra.mxu1 %vm463_vm1, %v7126_v57  ;;  %6172 = vmatprep.mubr.msk.f32.mxu0 %vm463_vm1, %v8603_v29 }
 0x121   : > { %8601 = vst [vmem:[#allocation22_spill] sm:$0xff] %v7466_v45  ;;  %v7472_v26 = vadd.f32 %v5921_v34, %v5871_v7  ;;  %6222 = vmatprep.mubr.msk.f32.mxu1 %vm463_vm1, %v7464_v30  ;;  %v899_v59 = vpop.f32.mrf.mxu0  ;;  %v3526_v7 = vld [vmem:[#allocation2 + $0x38] sm:$0xff] }
 0x122   : > { %v1223_v56 = vpop.f32.mrf.mxu1 }
 0x123   : > { %8602 = vst [vmem:[#allocation5_spill] sm:$0xff] %v7472_v26  ;;  %v7480_v45 = vadd.f32 %v1223_v56, %v899_v59  ;;  %v5874_v9 = vpop.f32.mrf.mxu0  ;;  %6173 = vmatmul.mubr.msk.f32.gmra.mxu0 %vm463_vm1, %v8605_v22  ;;  %v3527_v56 = vld [vmem:[#allocation2 + $0x48] sm:$0xff] }
 0x124   : > { %v5924_v62 = vpop.f32.mrf.mxu1  ;;  %6223 = vmatmul.mubr.msk.f32.gmra.mxu1 %vm463_vm1, %v7478_v15  ;;  %6227 = vmatprep.mubr.msk.f32.mxu0 %vm463_vm1, %v6929_v58  ;;  %v3528_v58 = vld [vmem:[#allocation2 + $0x50] sm:$0xff] }
 0x125   : > { %8604 = vst [vmem:[#allocation23_spill] sm:$0xff] %v7480_v45  ;;  %v7486_v34 = vadd.f32 %v5924_v62, %v5874_v9  ;;  %6277 = vmatprep.mubr.msk.f32.mxu1 %vm463_vm1, %v3525_v37  ;;  %v909_v30 = vpop.f32.mrf.mxu0 }
 0x126   : > { %v1233_v26 = vpop.f32.mrf.mxu1 }
 0x127   : > { %v7491_v59 = vadd.f32 %v1233_v26, %v909_v30  ;;  %v5929_v45 = vpop.f32.mrf.mxu0  ;;  %6228 = vmatmul.mubr.msk.f32.vlgmr.msra.gmra.mxu0 %vm463_vm1, %v6948_v18  ;;  %v3529_v26 = vld [vmem:[#allocation2 + $0x60] sm:$0xff] }
 0x128   : > { %v5979_v57 = vpop.f32.mrf.mxu1  ;;  %6278 = vmatmul.mubr.msk.f32.vlgmr.msra.gmra.mxu1 %vm463_vm1, %v3526_v7  ;;  %v1601_v9 = vadd.f32 %v5929_v45, %v7280_v43  ;;  %6326 = vmatpush3.msk.msra.mxu0 %vm689_vm0, %v7291_v63 }
 0x129   : > { %6376 = vmatpush3.msk.msra.mxu1 %vm689_vm0, %v7296_v32  ;;  %v1441_v37 = vpop.f32.mrf.mxu0  ;;  %6230 = vmatprep.mubr.msk.f32.mxu0 %vm463_vm1, %v8569_v1 }
 0x12a   : > { %v1831_v30 = vpop.f32.mrf.mxu1  ;;  %6280 = vmatprep.mubr.msk.f32.mxu1 %vm463_vm1, %v3527_v56  ;;  %v7504_v18 = vadd.f32 %v5979_v57, %v1601_v9  ;;  %v1600_v62 = vadd.f32 %v1441_v37, %v7282_v49  ;;  %v3530_v57 = vld [vmem:[#allocation2 + $0x68] sm:$0xff]  ;;  %v3531_v49 = vld [vmem:[#allocation2 + $0x78] sm:$0xff] }
 0x12b   : > { %v5932_v43 = vpop.f32.mrf.mxu0  ;;  %6231 = vmatmul.mubr.msk.f32.gmra.mxu0 %vm463_vm1, %v6968_v8 }
 0x12c   : > { %v5982_v45 = vpop.f32.mrf.mxu1  ;;  %6281 = vmatmul.mubr.msk.f32.gmra.mxu1 %vm463_vm1, %v3528_v58  ;;  %v7510_v63 = vadd.f32 %v1831_v30, %v1600_v62  ;;  %v1603_v32 = vadd.f32 %v5932_v43, %v7314_v11  ;;  %6233 = vmatprep.mubr.msk.f32.mxu0 %vm463_vm1, %v8571_v36  ;;  %v3532_v58 = vld [vmem:[#allocation2 + $0x80] sm:$0xff] }
 0x12d   : > { %6283 = vmatprep.mubr.msk.f32.mxu1 %vm463_vm1, %v3529_v26  ;;  %v1451_v1 = vpop.f32.mrf.mxu0 }
 0x12e   : > { %v1841_v7 = vpop.f32.mrf.mxu1  ;;  %v7516_v56 = vadd.f32 %v5982_v45, %v1603_v32  ;;  %v1602_v9 = vadd.f32 %v1451_v1, %v7320_v19  ;;  %v3533_v19 = vld [vmem:[#allocation2 + $0x90] sm:$0xff]  ;;  %v3534_v32 = vld [vmem:[#allocation2 + $0x98] sm:$0xff] }
 0x12f   : > { %v5935_v8 = vpop.f32.mrf.mxu0  ;;  %6234 = vmatmul.mubr.msk.f32.gmra.mxu0 %vm463_vm1, %v6980_v38 }
 0x130   : > { %v5985_v37 = vpop.f32.mrf.mxu1  ;;  %6284 = vmatmul.mubr.msk.f32.gmra.mxu1 %vm463_vm1, %v3530_v57  ;;  %v7522_v11 = vadd.f32 %v1841_v7, %v1602_v9  ;;  %v1605_v36 = vadd.f32 %v5935_v8, %v7326_v27  ;;  %6236 = vmatprep.mubr.msk.f32.mxu0 %vm463_vm1, %v8573_v40  ;;  %v3536_v8 = vld [vmem:[#allocation2 + $0xb0] sm:$0xff] }
 0x131   : > { %6286 = vmatprep.mubr.msk.f32.mxu1 %vm463_vm1, %v3531_v49  ;;  %v1461_v30 = vpop.f32.mrf.mxu0 }
 0x132   : > { %v1851_v26 = vpop.f32.mrf.mxu1  ;;  %v7528_v62 = vadd.f32 %v5985_v37, %v1605_v36  ;;  %v1604_v43 = vadd.f32 %v1461_v30, %v7332_v54  ;;  %v3535_v54 = vld [vmem:[#allocation2 + $0xa8] sm:$0xff] }
 0x133   : > { %v5938_v38 = vpop.f32.mrf.mxu0  ;;  %6237 = vmatmul.mubr.msk.f32.gmra.mxu0 %vm463_vm1, %v6992_v42 }
 0x134   : > { %v5988_v45 = vpop.f32.mrf.mxu1  ;;  %6287 = vmatmul.mubr.msk.f32.gmra.mxu1 %vm463_vm1, %v3532_v58  ;;  %v7534_v27 = vadd.f32 %v1851_v26, %v1604_v43  ;;  %v1607_v40 = vadd.f32 %v5938_v38, %v7338_v61  ;;  %6239 = vmatprep.mubr.msk.f32.mxu0 %vm463_vm1, %v8575_v44 }
 0x135   : > { %6289 = vmatprep.mubr.msk.f32.mxu1 %vm463_vm1, %v3533_v19  ;;  %v1471_v57 = vpop.f32.mrf.mxu0  ;;  %v3538_v19 = vld [vmem:[#allocation2 + $0xc8] sm:$0xff] }
 0x136   : > { %v1861_v1 = vpop.f32.mrf.mxu1  ;;  %v7540_v7 = vadd.f32 %v5988_v45, %v1607_v40  ;;  %v1606_v49 = vadd.f32 %v1471_v57, %v7344_v33  ;;  %v3537_v33 = vld [vmem:[#allocation2 + $0xc0] sm:$0xff] }
 0x137   : > { %v5941_v42 = vpop.f32.mrf.mxu0  ;;  %6240 = vmatmul.mubr.msk.f32.gmra.mxu0 %vm463_vm1, %v7004_v46  ;;  %v3540_v57 = vld [vmem:[#allocation2 + $0xe0] sm:$0xff] }
 0x138   : > { %v5991_v9 = vpop.f32.mrf.mxu1  ;;  %6290 = vmatmul.mubr.msk.f32.gmra.mxu1 %vm463_vm1, %v3534_v32  ;;  %v7546_v61 = vadd.f32 %v1861_v1, %v1606_v49  ;;  %v1609_v44 = vadd.f32 %v5941_v42, %v7350_v41  ;;  %6242 = vmatprep.mubr.msk.f32.mxu0 %vm463_vm1, %v8577_v48 }
 0x139   : > { %6292 = vmatprep.mubr.msk.f32.mxu1 %vm463_vm1, %v3535_v54  ;;  %v1481_v37 = vpop.f32.mrf.mxu0 }
 0x13a   : > { %v1871_v36 = vpop.f32.mrf.mxu1  ;;  %v7552_v58 = vadd.f32 %v5991_v9, %v1609_v44  ;;  %v1608_v30 = vadd.f32 %v1481_v37, %v7356_v53  ;;  %v3539_v53 = vld [vmem:[#allocation2 + $0xd8] sm:$0xff] }
 0x13b   : > { %v5944_v46 = vpop.f32.mrf.mxu0  ;;  %6243 = vmatmul.mubr.msk.f32.gmra.mxu0 %vm463_vm1, %v7016_v50  ;;  %v3542_v44 = vld [vmem:[#allocation2 + $0xf8] sm:$0xff] }
 0x13c   : > { %v5994_v26 = vpop.f32.mrf.mxu1  ;;  %6293 = vmatmul.mubr.msk.f32.gmra.mxu1 %vm463_vm1, %v3536_v8  ;;  %v7558_v41 = vadd.f32 %v1871_v36, %v1608_v30  ;;  %v1611_v48 = vadd.f32 %v5944_v46, %v7362_v13  ;;  %6245 = vmatprep.mubr.msk.f32.mxu0 %vm463_vm1, %v8579_v60  ;;  %v3544_v46 = vld [vmem:[#allocation2 + $0x110] sm:$0xff] }
 0x13d   : > { %6295 = vmatprep.mubr.msk.f32.mxu1 %vm463_vm1, %v3537_v33  ;;  %v1491_v43 = vpop.f32.mrf.mxu0 }
 0x13e   : > { %v1881_v38 = vpop.f32.mrf.mxu1  ;;  %v7564_v45 = vadd.f32 %v5994_v26, %v1611_v48  ;;  %v1610_v40 = vadd.f32 %v1491_v43, %v7368_v23  ;;  %v3541_v23 = vld [vmem:[#allocation2 + $0xf0] sm:$0xff] }
 0x13f   : > { %v5947_v50 = vpop.f32.mrf.mxu0  ;;  %6246 = vmatmul.mubr.msk.f32.gmra.mxu0 %vm463_vm1, %v7028_v0 }
 0x140   : > { %v5997_v32 = vpop.f32.mrf.mxu1  ;;  %6296 = vmatmul.mubr.msk.f32.gmra.mxu1 %vm463_vm1, %v3538_v19  ;;  %v7570_v13 = vadd.f32 %v1881_v38, %v1610_v40  ;;  %v1613_v60 = vadd.f32 %v5947_v50, %v7374_v55  ;;  %6248 = vmatprep.mubr.msk.f32.mxu0 %vm463_vm1, %v8581_v2 }
 0x141   : > { %6298 = vmatprep.mubr.msk.f32.mxu1 %vm463_vm1, %v3539_v53  ;;  %v1501_v1 = vpop.f32.mrf.mxu0  ;;  %v3546_v53 = vld [vmem:[#allocation2 + $0x128] sm:$0xff] }
 0x142   : > { %v1891_v54 = vpop.f32.mrf.mxu1  ;;  %v7576_v49 = vadd.f32 %v5997_v32, %v1613_v60  ;;  %v1612_v42 = vadd.f32 %v1501_v1, %v7380_v17  ;;  %v3543_v17 = vld [vmem:[#allocation2 + $0x108] sm:$0xff]  ;;  %v8609_v1 = vld [vmem:[#allocation31_spill] sm:$0xff] }
 0x143   : > { %v5950_v0 = vpop.f32.mrf.mxu0  ;;  %6249 = vmatmul.mubr.msk.f32.gmra.mxu0 %vm463_vm1, %v7040_v4 }
 0x144   : > { %v6000_v9 = vpop.f32.mrf.mxu1  ;;  %6299 = vmatmul.mubr.msk.f32.gmra.mxu1 %vm463_vm1, %v3540_v57  ;;  %v7582_v55 = vadd.f32 %v1891_v54, %v1612_v42  ;;  %v1615_v2 = vadd.f32 %v5950_v0, %v7386_v39  ;;  %6251 = vmatprep.mubr.msk.f32.mxu0 %vm463_vm1, %v8583_v6  ;;  %v3548_v54 = vld [vmem:[#allocation2 + $0x140] sm:$0xff] }
 0x145   : > { %6301 = vmatprep.mubr.msk.f32.mxu1 %vm463_vm1, %v3541_v23  ;;  %v1511_v8 = vpop.f32.mrf.mxu0 }
 0x146   : > { %v1901_v37 = vpop.f32.mrf.mxu1  ;;  %v7588_v36 = vadd.f32 %v6000_v9, %v1615_v2  ;;  %v1614_v33 = vadd.f32 %v1511_v8, %v7392_v3  ;;  %v3545_v3 = vld [vmem:[#allocation2 + $0x120] sm:$0xff]  ;;  %v8611_v9 = vld [vmem:[#allocation18_spill] sm:$0xff] }
 0x147   : > { %v5953_v4 = vpop.f32.mrf.mxu0  ;;  %6252 = vmatmul.mubr.msk.f32.gmra.mxu0 %vm463_vm1, %v7052_v10 }
 0x148   : > { %v6003_v30 = vpop.f32.mrf.mxu1  ;;  %6302 = vmatmul.mubr.msk.f32.gmra.mxu1 %vm463_vm1, %v3542_v44  ;;  %v7594_v39 = vadd.f32 %v1901_v37, %v1614_v33  ;;  %v1617_v6 = vadd.f32 %v5953_v4, %v7398_v21  ;;  %6254 = vmatprep.mubr.msk.f32.mxu0 %vm463_vm1, %v8585_v12  ;;  %v8613_v37 = vld [vmem:[#allocation32_spill] sm:$0xff] }
 0x149   : > { %6304 = vmatprep.mubr.msk.f32.mxu1 %vm463_vm1, %v3543_v17  ;;  %v1521_v26 = vpop.f32.mrf.mxu0  ;;  %v3550_v17 = vld [vmem:[#allocation2 + $0x158] sm:$0xff] }
 0x14a   : > { %v1911_v48 = vpop.f32.mrf.mxu1  ;;  %v7600_v19 = vadd.f32 %v6003_v30, %v1617_v6  ;;  %v1616_v43 = vadd.f32 %v1521_v26, %v7404_v51  ;;  %v3547_v51 = vld [vmem:[#allocation2 + $0x138] sm:$0xff]  ;;  %v3551_v30 = vld [vmem:[#allocation2 + $0x168] sm:$0xff] }
 0x14b   : > { %v5956_v10 = vpop.f32.mrf.mxu0  ;;  %6255 = vmatmul.mubr.msk.f32.gmra.mxu0 %vm463_vm1, %v7064_v14 }
 0x14c   : > { %v6006_v38 = vpop.f32.mrf.mxu1  ;;  %6305 = vmatmul.mubr.msk.f32.gmra.mxu1 %vm463_vm1, %v3544_v46  ;;  %v7606_v21 = vadd.f32 %v1911_v48, %v1616_v43  ;;  %v1619_v12 = vadd.f32 %v5956_v10, %v7410_v35  ;;  %6257 = vmatprep.mubr.msk.f32.mxu0 %vm463_vm1, %v8587_v16  ;;  %v8615_v46 = vld [vmem:[#allocation20_spill] sm:$0xff]  ;;  %v8617_v43 = vld [vmem:[#allocation33_spill] sm:$0xff]  ;;  %v3552_v10 = vld [vmem:[#allocation2 + $0x170] sm:$0xff] }
 0x14d   : > { %6307 = vmatprep.mubr.msk.f32.mxu1 %vm463_vm1, %v3545_v3  ;;  %v1531_v40 = vpop.f32.mrf.mxu0 }
 0x14e   : > { %8606 = vst [vmem:[#allocation6_spill] sm:$0xff] %v7606_v21  ;;  %v1921_v50 = vpop.f32.mrf.mxu1  ;;  %v7612_v32 = vadd.f32 %v6006_v38, %v1619_v12  ;;  %v1618_v60 = vadd.f32 %v1531_v40, %v7416_v47  ;;  %v3549_v47 = vld [vmem:[#allocation2 + $0x150] sm:$0xff] }
 0x14f   : > { %v5959_v14 = vpop.f32.mrf.mxu0  ;;  %6258 = vmatmul.mubr.msk.f32.gmra.mxu0 %vm463_vm1, %v7076_v20  ;;  %v8619_v40 = vld [vmem:[#allocation3_spill] sm:$0xff] }
 0x150   : > { %8607 = vst [vmem:[#allocation24_spill] sm:$0xff] %v7612_v32  ;;  %v6009_v57 = vpop.f32.mrf.mxu1  ;;  %6308 = vmatmul.mubr.msk.f32.gmra.mxu1 %vm463_vm1, %v3546_v53  ;;  %v7618_v35 = vadd.f32 %v1921_v50, %v1618_v60  ;;  %v1621_v16 = vadd.f32 %v5959_v14, %v7422_v25  ;;  %6260 = vmatprep.mubr.msk.f32.mxu0 %vm463_vm1, %v8609_v1  ;;  %v8621_v60 = vld [vmem:[#allocation21_spill] sm:$0xff] }
 0x151   : > { %6310 = vmatprep.mubr.msk.f32.mxu1 %vm463_vm1, %v3547_v51  ;;  %v1541_v23 = vpop.f32.mrf.mxu0  ;;  %v4325_v32 = vld [vmem:[#allocation2 + $0x122] sm:$0xff] }
 0x152   : > { %8608 = vst [vmem:[#allocation7_spill] sm:$0xff] %v7618_v35  ;;  %v1931_v42 = vpop.f32.mrf.mxu1  ;;  %v7624_v0 = vadd.f32 %v6009_v57, %v1621_v16  ;;  %v1620_v2 = vadd.f32 %v1541_v23, %v8611_v9  ;;  %v8622_v57 = vld [vmem:[#allocation34_spill] sm:$0xff] }
 0x153   : > { %v5962_v20 = vpop.f32.mrf.mxu0  ;;  %6261 = vmatmul.mubr.msk.f32.gmra.mxu0 %vm463_vm1, %v7088_v24  ;;  %v3935_v35 = vld [vmem:[#allocation2 + $0x121] sm:$0xff] }
 0x154   : > { %8610 = vst [vmem:[#allocation25_spill] sm:$0xff] %v7624_v0  ;;  %v6012_v44 = vpop.f32.mrf.mxu1  ;;  %6311 = vmatmul.mubr.msk.f32.gmra.mxu1 %vm463_vm1, %v3548_v54  ;;  %v7630_v25 = vadd.f32 %v1931_v42, %v1620_v2  ;;  %v1623_v8 = vadd.f32 %v5962_v20, %v7434_v5  ;;  %6263 = vmatprep.mubr.msk.f32.mxu0 %vm463_vm1, %v8613_v37  ;;  %v3555_v54 = vld [vmem:[#allocation2 + $0x198] sm:$0xff]  ;;  %v8624_v42 = vld [vmem:[#allocation22_spill] sm:$0xff]  ;;  %v3556_v37 = vld [vmem:[#allocation2 + $0x1a0] sm:$0xff] }
 0x155   : > { %6313 = vmatprep.mubr.msk.f32.mxu1 %vm463_vm1, %v3549_v47  ;;  %v1551_v33 = vpop.f32.mrf.mxu0  ;;  %v8625_v2 = vld [vmem:[#allocation36_spill] sm:$0xff] }
 0x156   : > { %8612 = vst [vmem:[#allocation8_spill] sm:$0xff] %v7630_v25  ;;  %v1941_v4 = vpop.f32.mrf.mxu1  ;;  %v7636_v6 = vadd.f32 %v6012_v44, %v1623_v8  ;;  %v1622_v26 = vadd.f32 %v1551_v33, %v8615_v46  ;;  %v8627_v44 = vld [vmem:[#allocation5_spill] sm:$0xff] }
 0x157   : > { %v5965_v24 = vpop.f32.mrf.mxu0  ;;  %6264 = vmatmul.mubr.msk.f32.gmra.mxu0 %vm463_vm1, %v7100_v28 }
 0x158   : > { %8614 = vst [vmem:[#allocation26_spill] sm:$0xff] %v7636_v6  ;;  %v6015_v48 = vpop.f32.mrf.mxu1  ;;  %6314 = vmatmul.mubr.msk.f32.gmra.mxu1 %vm463_vm1, %v3550_v17  ;;  %v7642_v5 = vadd.f32 %v1941_v4, %v1622_v26  ;;  %v1625_v3 = vadd.f32 %v5965_v24, %v7446_v31  ;;  %6266 = vmatprep.mubr.msk.f32.mxu0 %vm463_vm1, %v8617_v43  ;;  %v3915_v4 = vld [vmem:[#allocation2 + $0x31] sm:$0xff] }
 0x159   : > { %6316 = vmatprep.mubr.msk.f32.mxu1 %vm463_vm1, %v3551_v30  ;;  %v1561_v38 = vpop.f32.mrf.mxu0  ;;  %v4305_v30 = vld [vmem:[#allocation2 + $0x32] sm:$0xff]  ;;  %v4323_v6 = vld [vmem:[#allocation2 + $0x10a] sm:$0xff] }
 0x15a   : > { %8616 = vst [vmem:[#allocation9_spill] sm:$0xff] %v7642_v5  ;;  %v1951_v12 = vpop.f32.mrf.mxu1  ;;  %v7648_v53 = vadd.f32 %v6015_v48, %v1625_v3  ;;  %v1624_v50 = vadd.f32 %v1561_v38, %v8619_v40  ;;  %v8630_v26 = vld [vmem:[#allocation23_spill] sm:$0xff]  ;;  %v4306_v38 = vld [vmem:[#allocation2 + $0x3a] sm:$0xff] }
 0x15b   : > { %v5968_v51 = vpop.f32.mrf.mxu0  ;;  %6267 = vmatmul.mubr.msk.f32.gmra.mxu0 %vm463_vm1, %v7112_v52  ;;  %v3933_v5 = vld [vmem:[#allocation2 + $0x109] sm:$0xff] }
 0x15c   : > { %8618 = vst [vmem:[#allocation27_spill] sm:$0xff] %v7648_v53  ;;  %v6018_v28 = vpop.f32.mrf.mxu1  ;;  %6317 = vmatmul.mubr.msk.f32.gmra.mxu1 %vm463_vm1, %v3552_v10  ;;  %v7654_v31 = vadd.f32 %v1951_v12, %v1624_v50  ;;  %v1627_v14 = vadd.f32 %v5968_v51, %v8621_v60  ;;  %6269 = vmatprep.mubr.msk.f32.mxu0 %vm463_vm1, %v8622_v57  ;;  %v3916_v10 = vld [vmem:[#allocation2 + $0x39] sm:$0xff]  ;;  %v3917_v50 = vld [vmem:[#allocation2 + $0x49] sm:$0xff] }
 0x15d   : > { %6319 = vmatprep.mubr.msk.f32.mxu1 %vm463_vm1, %v8603_v29  ;;  %v1571_v16 = vpop.f32.mrf.mxu0  ;;  %v8628_v29 = vld [vmem:[#allocation4_spill] sm:$0xff]  ;;  %v4307_v51 = vld [vmem:[#allocation2 + $0x4a] sm:$0xff] }
 0x15e   : > { %8620 = vst [vmem:[#allocation10_spill] sm:$0xff] %v7654_v31  ;;  %v1961_v1 = vpop.f32.mrf.mxu1  ;;  %v7661_v23 = vadd.f32 %v6018_v28, %v1627_v14  ;;  %v1626_v47 = vadd.f32 %v1571_v16, %v8624_v42  ;;  %v3918_v16 = vld [vmem:[#allocation2 + $0x51] sm:$0xff] }
 0x15f   : > { %v5971_v52 = vpop.f32.mrf.mxu0  ;;  %6270 = vmatmul.mubr.msk.f32.gmra.mxu0 %vm463_vm1, %v8625_v2  ;;  %v3920_v2 = vld [vmem:[#allocation2 + $0x69] sm:$0xff] }
 0x160   : > { %8623 = vst [vmem:[#allocation28_spill] sm:$0xff] %v7661_v23  ;;  %v6021_v9 = vpop.f32.mrf.mxu1  ;;  %6320 = vmatmul.mubr.msk.f32.gmra.mxu1 %vm463_vm1, %v8605_v22  ;;  %v7668_v20 = vadd.f32 %v1961_v1, %v1626_v47  ;;  %v1629_v8 = vadd.f32 %v5971_v52, %v8627_v44  ;;  %6272 = vmatprep.mubr.msk.f32.mxu0 %vm463_vm1, %v8628_v29  ;;  %v4308_v1 = vld [vmem:[#allocation2 + $0x52] sm:$0xff]  ;;  %v4309_v47 = vld [vmem:[#allocation2 + $0x62] sm:$0xff]  ;;  %v4310_v44 = vld [vmem:[#allocation2 + $0x6a] sm:$0xff] }
 0x161   : > { %6322 = vmatprep.mubr.msk.f32.mxu1 %vm463_vm1, %v3555_v54  ;;  %v1581_v17 = vpop.f32.mrf.mxu0  ;;  %v4321_v23 = vld [vmem:[#allocation2 + $0xf2] sm:$0xff] }
 0x162   : > { %8626 = vst [vmem:[#allocation11_spill] sm:$0xff] %v7668_v20  ;;  %v1971_v33 = vpop.f32.mrf.mxu1  ;;  %v7674_v46 = vadd.f32 %v6021_v9, %v1629_v8  ;;  %v1628_v24 = vadd.f32 %v1581_v17, %v8630_v26  ;;  %v3921_v17 = vld [vmem:[#allocation2 + $0x79] sm:$0xff]  ;;  %v3922_v26 = vld [vmem:[#allocation2 + $0x81] sm:$0xff]  ;;  %v3931_v20 = vld [vmem:[#allocation2 + $0xf1] sm:$0xff] }
 0x163   : > { %v5974_v48 = vpop.f32.mrf.mxu0  ;;  %6273 = vmatmul.mubr.msk.f32.gmra.mxu0 %vm463_vm1, %v7478_v15 }
 0x164   : > { %8629 = vst [vmem:[#allocation29_spill] sm:$0xff] %v7674_v46  ;;  %v6024_v22 = vpop.f32.mrf.mxu1  ;;  %6323 = vmatmul.mubr.msk.f32.gmra.mxu1 %vm463_vm1, %v3556_v37  ;;  %v7680_v3 = vadd.f32 %v1971_v33, %v1628_v24  ;;  %v1631_v43 = vadd.f32 %v5974_v48, %v7486_v34  ;;  %6327 = vmatprep.mubr.msk.f32.mxu0 %vm463_vm1, %v3915_v4  ;;  %v4311_v33 = vld [vmem:[#allocation2 + $0x7a] sm:$0xff]  ;;  %v4312_v24 = vld [vmem:[#allocation2 + $0x82] sm:$0xff] }
 0x165   : > { %6377 = vmatprep.mubr.msk.f32.mxu1 %vm463_vm1, %v4305_v30  ;;  %v1591_v12 = vpop.f32.mrf.mxu0 }
 0x166   : > { %8631 = vst [vmem:[#allocation12_spill] sm:$0xff] %v7680_v3  ;;  %v1981_v40 = vpop.f32.mrf.mxu1  ;;  %v7685_v28 = vadd.f32 %v6024_v22, %v1631_v43  ;;  %v1630_v60 = vadd.f32 %v1591_v12, %v7491_v59  ;;  %v3919_v59 = vld [vmem:[#allocation2 + $0x61] sm:$0xff]  ;;  %v3923_v43 = vld [vmem:[#allocation2 + $0x91] sm:$0xff] }
 0x167   : > { %v7688_v14 = vpop.f32.mrf.mxu0  ;;  %6328 = vmatmul.mubr.msk.f32.vlgmr.msra.gmra.mxu0 %vm463_vm1, %v3916_v10  ;;  %v4313_v10 = vld [vmem:[#allocation2 + $0x92] sm:$0xff] }
 0x168   : > { %8632 = vst [vmem:[#allocation30_spill] sm:$0xff] %v7685_v28  ;;  %v7690_v57 = vpop.f32.mrf.mxu1  ;;  %6378 = vmatmul.mubr.msk.f32.vlgmr.msra.gmra.mxu1 %vm463_vm1, %v4306_v38  ;;  %v7694_v34 = vadd.f32 %v1981_v40, %v1630_v60  ;;  %6330 = vmatprep.mubr.msk.f32.mxu0 %vm463_vm1, %v3917_v50  ;;  %v3924_v40 = vld [vmem:[#allocation2 + $0x99] sm:$0xff] }
 0x169   : > { %6380 = vmatprep.mubr.msk.f32.mxu1 %vm463_vm1, %v4307_v51  ;;  %v7698_v54 = vpop.f32.mrf.mxu0  ;;  %v4314_v50 = vld [vmem:[#allocation2 + $0x9a] sm:$0xff] }
 0x16a   : > { %8633 = vst [vmem:[#allocation13_spill] sm:$0xff] %v7694_v34  ;;  %v7700_v42 = vpop.f32.mrf.mxu1  ;;  %v3929_v34 = vld [vmem:[#allocation2 + $0xd9] sm:$0xff] }
 0x16b   : > { %v7702_v52 = vpop.f32.mrf.mxu0  ;;  %6331 = vmatmul.mubr.msk.f32.gmra.mxu0 %vm463_vm1, %v3918_v16  ;;  %v3925_v16 = vld [vmem:[#allocation2 + $0xa9] sm:$0xff]  ;;  %v4319_v28 = vld [vmem:[#allocation2 + $0xda] sm:$0xff] }
 0x16c   : > { %v7704_v9 = vpop.f32.mrf.mxu1  ;;  %6381 = vmatmul.mubr.msk.f32.gmra.mxu1 %vm463_vm1, %v4308_v1  ;;  %6333 = vmatprep.mubr.msk.f32.mxu0 %vm463_vm1, %v3919_v59  ;;  %v4315_v1 = vld [vmem:[#allocation2 + $0xaa] sm:$0xff] }
 0x16d   : > { %6383 = vmatprep.mubr.msk.f32.mxu1 %vm463_vm1, %v4309_v47  ;;  %v7710_v8 = vpop.f32.mrf.mxu0 }
 0x16e   : > { %v7712_v37 = vpop.f32.mrf.mxu1 }
 0x16f   : > { %v7714_v4 = vpop.f32.mrf.mxu0  ;;  %6334 = vmatmul.mubr.msk.f32.gmra.mxu0 %vm463_vm1, %v3920_v2  ;;  %v3926_v2 = vld [vmem:[#allocation2 + $0xb1] sm:$0xff] }
 0x170   : > { %v7716_v30 = vpop.f32.mrf.mxu1  ;;  %6384 = vmatmul.mubr.msk.f32.gmra.mxu1 %vm463_vm1, %v4310_v44  ;;  %6336 = vmatprep.mubr.msk.f32.mxu0 %vm463_vm1, %v3921_v17  ;;  %v4316_v44 = vld [vmem:[#allocation2 + $0xb2] sm:$0xff] }
 0x171   : > { %6386 = vmatprep.mubr.msk.f32.mxu1 %vm463_vm1, %v4311_v33  ;;  %v7722_v48 = vpop.f32.mrf.mxu0 }
 0x172   : > { %v7724_v22 = vpop.f32.mrf.mxu1 }
 0x173   : > { %v7726_v38 = vpop.f32.mrf.mxu0  ;;  %6337 = vmatmul.mubr.msk.f32.gmra.mxu0 %vm463_vm1, %v3922_v26  ;;  %v3927_v26 = vld [vmem:[#allocation2 + $0xc1] sm:$0xff] }
 0x174   : > { %v7728_v12 = vpop.f32.mrf.mxu1  ;;  %6387 = vmatmul.mubr.msk.f32.gmra.mxu1 %vm463_vm1, %v4312_v24  ;;  %6339 = vmatprep.mubr.msk.f32.mxu0 %vm463_vm1, %v3923_v43  ;;  %v4317_v24 = vld [vmem:[#allocation2 + $0xc2] sm:$0xff] }
 0x175   : > { %6389 = vmatprep.mubr.msk.f32.mxu1 %vm463_vm1, %v4313_v10  ;;  %v7734_v51 = vpop.f32.mrf.mxu0 }
 0x176   : > { %v7736_v60 = vpop.f32.mrf.mxu1 }
 0x177   : > { %v7738_v59 = vpop.f32.mrf.mxu0  ;;  %6340 = vmatmul.mubr.msk.f32.gmra.mxu0 %vm463_vm1, %v3924_v40  ;;  %v3928_v40 = vld [vmem:[#allocation2 + $0xc9] sm:$0xff] }
 0x178   : > { %v7740_v47 = vpop.f32.mrf.mxu1  ;;  %6390 = vmatmul.mubr.msk.f32.gmra.mxu1 %vm463_vm1, %v4314_v50  ;;  %6342 = vmatprep.mubr.msk.f32.mxu0 %vm463_vm1, %v3925_v16  ;;  %v4318_v50 = vld [vmem:[#allocation2 + $0xca] sm:$0xff] }
 0x179   : > { %6392 = vmatprep.mubr.msk.f32.mxu1 %vm463_vm1, %v4315_v1  ;;  %v7746_v17 = vpop.f32.mrf.mxu0 }
 0x17a   : > { %v7748_v33 = vpop.f32.mrf.mxu1 }
 0x17b   : > { %v7750_v43 = vpop.f32.mrf.mxu0  ;;  %6343 = vmatmul.mubr.msk.f32.gmra.mxu0 %vm463_vm1, %v3926_v2  ;;  %v3930_v2 = vld [vmem:[#allocation2 + $0xe1] sm:$0xff] }
 0x17c   : > { %v7752_v10 = vpop.f32.mrf.mxu1  ;;  %6393 = vmatmul.mubr.msk.f32.gmra.mxu1 %vm463_vm1, %v4316_v44  ;;  %6345 = vmatprep.mubr.msk.f32.mxu0 %vm463_vm1, %v3927_v26  ;;  %v4320_v44 = vld [vmem:[#allocation2 + $0xe2] sm:$0xff] }
 0x17d   : > { %6395 = vmatprep.mubr.msk.f32.mxu1 %vm463_vm1, %v4317_v24  ;;  %v7758_v16 = vpop.f32.mrf.mxu0 }
 0x17e   : > { %v7760_v1 = vpop.f32.mrf.mxu1 }
 0x17f   : > { %v7762_v3 = vpop.f32.mrf.mxu0  ;;  %6346 = vmatmul.mubr.msk.f32.gmra.mxu0 %vm463_vm1, %v3928_v40 }
 0x180   : > { %v7764_v46 = vpop.f32.mrf.mxu1  ;;  %6396 = vmatmul.mubr.msk.f32.gmra.mxu1 %vm463_vm1, %v4318_v50  ;;  %6348 = vmatprep.mubr.msk.f32.mxu0 %vm463_vm1, %v3929_v34  ;;  %v4322_v34 = vld [vmem:[#allocation2 + $0xfa] sm:$0xff] }
 0x181   : > { %6398 = vmatprep.mubr.msk.f32.mxu1 %vm463_vm1, %v4319_v28  ;;  %v7770_v26 = vpop.f32.mrf.mxu0  ;;  %v3932_v28 = vld [vmem:[#allocation2 + $0xf9] sm:$0xff] }
 0x182   : > { %v7772_v24 = vpop.f32.mrf.mxu1 }
 0x183   : > { %v7774_v31 = vpop.f32.mrf.mxu0  ;;  %6349 = vmatmul.mubr.msk.f32.gmra.mxu0 %vm463_vm1, %v3930_v2 }
 0x184   : > { %v7776_v53 = vpop.f32.mrf.mxu1  ;;  %6399 = vmatmul.mubr.msk.f32.gmra.mxu1 %vm463_vm1, %v4320_v44  ;;  %6351 = vmatprep.mubr.msk.f32.mxu0 %vm463_vm1, %v3931_v20  ;;  %v4324_v20 = vld [vmem:[#allocation2 + $0x112] sm:$0xff] }
 0x185   : > { %6401 = vmatprep.mubr.msk.f32.mxu1 %vm463_vm1, %v4321_v23  ;;  %v7782_v40 = vpop.f32.mrf.mxu0  ;;  %v3934_v23 = vld [vmem:[#allocation2 + $0x111] sm:$0xff] }
 0x186   : > { %v7784_v50 = vpop.f32.mrf.mxu1 }
 0x187   : > { %8634 = vst [vmem:[#allocation14_spill] sm:$0xff] %v7784_v50  ;;  %v7786_v25 = vpop.f32.mrf.mxu0  ;;  %6352 = vmatmul.mubr.msk.f32.gmra.mxu0 %vm463_vm1, %v3932_v28 }
 0x188   : > { %v7788_v0 = vpop.f32.mrf.mxu1  ;;  %6402 = vmatmul.mubr.msk.f32.gmra.mxu1 %vm463_vm1, %v4322_v34  ;;  %6354 = vmatprep.mubr.msk.f32.mxu0 %vm463_vm1, %v3933_v5  ;;  %v4326_v5 = vld [vmem:[#allocation2 + $0x12a] sm:$0xff] }
 0x189   : > { %8635 = vst [vmem:[#allocation15_spill] sm:$0xff] %v7788_v0  ;;  %6404 = vmatprep.mubr.msk.f32.mxu1 %vm463_vm1, %v4323_v6  ;;  %v7794_v2 = vpop.f32.mrf.mxu0  ;;  %v3936_v6 = vld [vmem:[#allocation2 + $0x129] sm:$0xff]  ;;  %v4327_v0 = vld [vmem:[#allocation2 + $0x13a] sm:$0xff] }
 0x18a   : > { %8636 = vst [vmem:[#allocation16_spill] sm:$0xff] %v7794_v2  ;;  %v7796_v44 = vpop.f32.mrf.mxu1 }
 0x18b   : > { %8637 = vst [vmem:[#allocation17_spill] sm:$0xff] %v7796_v44  ;;  %v7798_v21 = vpop.f32.mrf.mxu0  ;;  %6355 = vmatmul.mubr.msk.f32.gmra.mxu0 %vm463_vm1, %v3934_v23  ;;  %v3937_v44 = vld [vmem:[#allocation2 + $0x139] sm:$0xff] }
 0x18c   : > { %8638 = vst [vmem:[#allocation19_spill] sm:$0xff] %v7798_v21  ;;  %v7800_v50 = vpop.f32.mrf.mxu1  ;;  %6405 = vmatmul.mubr.msk.f32.gmra.mxu1 %vm463_vm1, %v4324_v20  ;;  %6357 = vmatprep.mubr.msk.f32.mxu0 %vm463_vm1, %v3935_v35  ;;  %v4328_v35 = vld [vmem:[#allocation2 + $0x142] sm:$0xff] }
 0x18d   : > { %8639 = vst [vmem:[#allocation35_spill] sm:$0xff] %v7800_v50  ;;  %6407 = vmatprep.mubr.msk.f32.mxu1 %vm463_vm1, %v4325_v32  ;;  %v7806_v28 = vpop.f32.mrf.mxu0  ;;  %v3938_v32 = vld [vmem:[#allocation2 + $0x141] sm:$0xff]  ;;  %v4329_v50 = vld [vmem:[#allocation2 + $0x152] sm:$0xff] }
 0x18e   : > { %8640 = vst [vmem:[#allocation37_spill] sm:$0xff] %v7806_v28  ;;  %v7808_v34 = vpop.f32.mrf.mxu1 }
 0x18f   : > { %8641 = vst [vmem:[#allocation31_spill] sm:$0xff] %v7808_v34  ;;  %v7810_v2 = vpop.f32.mrf.mxu0  ;;  %6358 = vmatmul.mubr.msk.f32.gmra.mxu0 %vm463_vm1, %v3936_v6  ;;  %v3939_v34 = vld [vmem:[#allocation2 + $0x151] sm:$0xff] }
 0x190   : > { %8642 = vst [vmem:[#allocation18_spill] sm:$0xff] %v7810_v2  ;;  %v7812_v21 = vpop.f32.mrf.mxu1  ;;  %6408 = vmatmul.mubr.msk.f32.gmra.mxu1 %vm463_vm1, %v4326_v5  ;;  %6360 = vmatprep.mubr.msk.f32.mxu0 %vm463_vm1, %v3937_v44  ;;  %v4330_v44 = vld [vmem:[#allocation2 + $0x15a] sm:$0xff] }
 0x191   : > { %8643 = vst [vmem:[#allocation32_spill] sm:$0xff] %v7812_v21  ;;  %6410 = vmatprep.mubr.msk.f32.mxu1 %vm463_vm1, %v4327_v0  ;;  %v7818_v23 = vpop.f32.mrf.mxu0  ;;  %v3940_v0 = vld [vmem:[#allocation2 + $0x159] sm:$0xff]  ;;  %v4331_v21 = vld [vmem:[#allocation2 + $0x16a] sm:$0xff] }
 0x192   : > { %8644 = vst [vmem:[#allocation20_spill] sm:$0xff] %v7818_v23  ;;  %v7820_v20 = vpop.f32.mrf.mxu1 }
 0x193   : > { %8645 = vst [vmem:[#allocation33_spill] sm:$0xff] %v7820_v20  ;;  %v7822_v28 = vpop.f32.mrf.mxu0  ;;  %6361 = vmatmul.mubr.msk.f32.gmra.mxu0 %vm463_vm1, %v3938_v32  ;;  %v3941_v20 = vld [vmem:[#allocation2 + $0x169] sm:$0xff] }
 0x194   : > { %8646 = vst [vmem:[#allocation3_spill] sm:$0xff] %v7822_v28  ;;  %v7824_v2 = vpop.f32.mrf.mxu1  ;;  %6411 = vmatmul.mubr.msk.f32.gmra.mxu1 %vm463_vm1, %v4328_v35  ;;  %6363 = vmatprep.mubr.msk.f32.mxu0 %vm463_vm1, %v3939_v34  ;;  %v4332_v34 = vld [vmem:[#allocation2 + $0x172] sm:$0xff] }
 0x195   : > { %8647 = vst [vmem:[#allocation21_spill] sm:$0xff] %v7824_v2  ;;  %6413 = vmatprep.mubr.msk.f32.mxu1 %vm463_vm1, %v4329_v50  ;;  %v7830_v6 = vpop.f32.mrf.mxu0  ;;  %v3942_v50 = vld [vmem:[#allocation2 + $0x171] sm:$0xff] }
 0x196   : > { %v7832_v5 = vpop.f32.mrf.mxu1 }
 0x197   : > { %8648 = vst [vmem:[#allocation34_spill] sm:$0xff] %v7832_v5  ;;  %v7834_v23 = vpop.f32.mrf.mxu0  ;;  %6364 = vmatmul.mubr.msk.f32.gmra.mxu0 %vm463_vm1, %v3940_v0  ;;  %v3943_v5 = vld [vmem:[#allocation2 + $0x181] sm:$0xff] }
 0x198   : > { %8649 = vst [vmem:[#allocation22_spill] sm:$0xff] %v7834_v23  ;;  %v7836_v28 = vpop.f32.mrf.mxu1  ;;  %6414 = vmatmul.mubr.msk.f32.gmra.mxu1 %vm463_vm1, %v4330_v44  ;;  %6366 = vmatprep.mubr.msk.f32.mxu0 %vm463_vm1, %v3941_v20  ;;  %v3945_v44 = vld [vmem:[#allocation2 + $0x199] sm:$0xff] }
 0x199   : > { %8650 = vst [vmem:[#allocation36_spill] sm:$0xff] %v7836_v28  ;;  %6416 = vmatprep.mubr.msk.f32.mxu1 %vm463_vm1, %v4331_v21  ;;  %v7842_v32 = vpop.f32.mrf.mxu0  ;;  %v3944_v21 = vld [vmem:[#allocation2 + $0x189] sm:$0xff] }
 0x19a   : > { %v7844_v35 = vpop.f32.mrf.mxu1 }
 0x19b   : > { %8651 = vst [vmem:[#allocation5_spill] sm:$0xff] %v7844_v35  ;;  %v7846_v2 = vpop.f32.mrf.mxu0  ;;  %6367 = vmatmul.mubr.msk.f32.gmra.mxu0 %vm463_vm1, %v3942_v50  ;;  %v4335_v35 = vld [vmem:[#allocation2 + $0x19a] sm:$0xff] }
 0x19c   : > { %v7848_v23 = vpop.f32.mrf.mxu1  ;;  %6417 = vmatmul.mubr.msk.f32.gmra.mxu1 %vm463_vm1, %v4332_v34  ;;  %6369 = vmatprep.mubr.msk.f32.mxu0 %vm463_vm1, %v3943_v5  ;;  %v4336_v5 = vld [vmem:[#allocation2 + $0x1a2] sm:$0xff] }
 0x19d   : > { %8652 = vst [vmem:[#allocation4_spill] sm:$0xff] %v7848_v23  ;;  %6419 = vmatprep.mubr.msk.f32.mxu1 %vm463_vm1, %v8628_v29  ;;  %v7855_v20 = vpop.f32.mrf.mxu0  ;;  %v3946_v29 = vld [vmem:[#allocation2 + $0x1a1] sm:$0xff] }
 0x19e   : > { %v7857_v0 = vpop.f32.mrf.mxu1 }
 0x19f   : > { %8653 = vst [vmem:[#allocation23_spill] sm:$0xff] %v7857_v0  ;;  %v7859_v28 = vpop.f32.mrf.mxu0  ;;  %6370 = vmatmul.mubr.msk.f32.gmra.mxu0 %vm463_vm1, %v3944_v21 }
 0x1a0   : > { %8654 = vst [vmem:[#allocation38_spill] sm:$0xff] %v7859_v28  ;;  %v7861_v23 = vpop.f32.mrf.mxu1  ;;  %6420 = vmatmul.mubr.msk.f32.gmra.mxu1 %vm463_vm1, %v7478_v15  ;;  %6372 = vmatprep.mubr.msk.f32.mxu0 %vm463_vm1, %v3945_v44 }
 0x1a1   : > { %6422 = vmatprep.mubr.msk.f32.mxu1 %vm463_vm1, %v4335_v35  ;;  %v7868_v50 = vpop.f32.mrf.mxu0  ;;  %v2383_v35 = vadd.f32 %v7688_v14, %v7504_v18 }
 0x1a2   : > { %v7870_v34 = vpop.f32.mrf.mxu1 }
 0x1a3   : > { %8655 = vst [vmem:[#allocation39_spill] sm:$0xff] %v7870_v34  ;;  %v7872_v0 = vpop.f32.mrf.mxu0  ;;  %6373 = vmatmul.mubr.msk.f32.gmra.mxu0 %vm463_vm1, %v3946_v29  ;;  %v7888_v34 = vld [vmem:[%s8476_s4] ss:$0 sm:$0xff]  ;;  %v2382_v29 = vadd.f32 %v7698_v54, %v7510_v63 }
 0x1a4   : > { %8656 = vst [vmem:[#allocation40_spill] sm:$0xff] %v7872_v0  ;;  %v7874_v28 = vpop.f32.mrf.mxu1  ;;  %6423 = vmatmul.mubr.msk.f32.gmra.mxu1 %vm463_vm1, %v4336_v5 }
 0x1a5   : > { %8657 = vst [vmem:[#allocation41_spill] sm:$0xff] %v7874_v28  ;;  %v7878_v21 = vpop.f32.mrf.mxu0 }
 0x1a6   : > { %8658 = vst [vmem:[#allocation42_spill] sm:$0xff] %v7878_v21  ;;  %v7880_v15 = vpop.f32.mrf.mxu1 }
 0x1a7   : > { %8659 = vst [vmem:[#allocation43_spill] sm:$0xff] %v7880_v15  ;;  %v6129_v44 = vpop.f32.mrf.mxu0  ;;  %v2385_v15 = vadd.f32 %v7702_v52, %v7516_v56 }
 0x1a8   : > { %v6179_v0 = vpop.f32.mrf.mxu1  ;;  %v7893_v5 = vadd.f32 %v6129_v44, %v7690_v57 }
 0x1a9   : > { %v3231_v28 = vadd.f32 %v6179_v0, %v2383_v35  ;;  %v2713_v18 = vpop.f32.mrf.mxu0  ;;  %v2384_v35 = vadd.f32 %v7710_v8, %v7522_v11 }
 0x1aa   : > { %8660 = vst [vmem:[#allocation44_spill] sm:$0xff] %v7893_v5  ;;  %v3071_v14 = vpop.f32.mrf.mxu1  ;;  %v7904_v63 = vadd.f32 %v2713_v18, %v7700_v42  ;;  %v2387_v42 = vadd.f32 %v7714_v4, %v7528_v62 }
 0x1ab   : > { %v4702_v21 = vadd.f32 %v7888_v34, %v3231_v28  ;;  %v3230_v57 = vadd.f32 %v3071_v14, %v2382_v29  ;;  %v6132_v54 = vpop.f32.mrf.mxu0 }
 0x1ac   : > { %v6182_v0 = vpop.f32.mrf.mxu1  ;;  %v7912_v5 = vadd.f32 %v6132_v54, %v7704_v9  ;;  %v2386_v9 = vadd.f32 %v7722_v48, %v7534_v27 }
 0x1ad   : > { %4735 = vst.msk [vmem:[%s7898_s18 + $0x8] sm:$0xff] %vm4733_vm3, %v4702_v21  ;;  %v4701_v44 = vadd.f32 %v7888_v34, %v3230_v57  ;;  %v3233_v56 = vadd.f32 %v6182_v0, %v2385_v15  ;;  %v2723_v52 = vpop.f32.mrf.mxu0 }
 0x1ae   : > { %v3081_v28 = vpop.f32.mrf.mxu1  ;;  %v7920_v11 = vadd.f32 %v2723_v52, %v7712_v37  ;;  %v2389_v37 = vadd.f32 %v7726_v38, %v7540_v7 }
 0x1af   : > { %4734 = vst.msk [vmem:[%s7898_s18] sm:$0xff] %vm4733_vm3, %v4701_v44  ;;  %v4704_v29 = vadd.f32 %v7888_v34, %v3233_v56  ;;  %v3232_v8 = vadd.f32 %v3081_v28, %v2384_v35  ;;  %v6135_v21 = vpop.f32.mrf.mxu0 }
 0x1b0   : > { %v6185_v18 = vpop.f32.mrf.mxu1  ;;  %v7928_v62 = vadd.f32 %v6135_v21, %v7716_v30  ;;  %v2388_v30 = vadd.f32 %v7734_v51, %v7546_v61 }
 0x1b1   : > { %4737 = vst.msk [vmem:[%s7898_s18 + $0x28] sm:$0xff] %vm4733_vm3, %v4704_v29  ;;  %v4703_v15 = vadd.f32 %v7888_v34, %v3232_v8  ;;  %v3235_v4 = vadd.f32 %v6185_v18, %v2387_v42  ;;  %v2733_v14 = vpop.f32.mrf.mxu0 }
 0x1b2   : > { %v3091_v57 = vpop.f32.mrf.mxu1  ;;  %v7936_v27 = vadd.f32 %v2733_v14, %v7724_v22  ;;  %v2391_v22 = vadd.f32 %v7738_v59, %v7552_v58 }
 0x1b3   : > { %4736 = vst.msk [vmem:[%s7898_s18 + $0x20] sm:$0xff] %vm4733_vm3, %v4703_v15  ;;  %v4706_v54 = vadd.f32 %v7888_v34, %v3235_v4  ;;  %v3234_v48 = vadd.f32 %v3091_v57, %v2386_v9  ;;  %v6138_v0 = vpop.f32.mrf.mxu0 }
 0x1b4   : > { %v6188_v35 = vpop.f32.mrf.mxu1  ;;  %v7944_v7 = vadd.f32 %v6138_v0, %v7728_v12  ;;  %v2390_v12 = vadd.f32 %v7746_v17, %v7558_v41 }
 0x1b5   : > { %4739 = vst.msk [vmem:[%s7898_s18 + $0x48] sm:$0xff] %vm4733_vm3, %v4706_v54  ;;  %v4705_v44 = vadd.f32 %v7888_v34, %v3234_v48  ;;  %v3237_v38 = vadd.f32 %v6188_v35, %v2389_v37  ;;  %v2743_v56 = vpop.f32.mrf.mxu0 }
 0x1b6   : > { %v3101_v52 = vpop.f32.mrf.mxu1  ;;  %v7952_v61 = vadd.f32 %v2743_v56, %v7736_v60  ;;  %v2393_v60 = vadd.f32 %v7750_v43, %v7564_v45 }
 0x1b7   : > { %4738 = vst.msk [vmem:[%s7898_s18 + $0x40] sm:$0xff] %vm4733_vm3, %v4705_v44  ;;  %v4708_v28 = vadd.f32 %v7888_v34, %v3237_v38  ;;  %v3236_v51 = vadd.f32 %v3101_v52, %v2388_v30  ;;  %v6141_v42 = vpop.f32.mrf.mxu0 }
 0x1b8   : > { %v6191_v29 = vpop.f32.mrf.mxu1  ;;  %v7960_v58 = vadd.f32 %v6141_v42, %v7740_v47  ;;  %v2392_v47 = vadd.f32 %v7758_v16, %v7570_v13 }
 0x1b9   : > { %4741 = vst.msk [vmem:[%s7898_s18 + $0x68] sm:$0xff] %vm4733_vm3, %v4708_v28  ;;  %v4707_v8 = vadd.f32 %v7888_v34, %v3236_v51  ;;  %v3239_v59 = vadd.f32 %v6191_v29, %v2391_v22  ;;  %v2753_v21 = vpop.f32.mrf.mxu0  ;;  %v8661_v29 = vld [vmem:[#allocation14_spill] sm:$0xff] }
 0x1ba   : > { %v3111_v18 = vpop.f32.mrf.mxu1  ;;  %v7968_v41 = vadd.f32 %v2753_v21, %v7748_v33  ;;  %v2395_v33 = vadd.f32 %v7762_v3, %v7576_v49 }
 0x1bb   : > { %4740 = vst.msk [vmem:[%s7898_s18 + $0x60] sm:$0xff] %vm4733_vm3, %v4707_v8  ;;  %v4710_v9 = vadd.f32 %v7888_v34, %v3239_v59  ;;  %v3238_v17 = vadd.f32 %v3111_v18, %v2390_v12  ;;  %v6144_v15 = vpop.f32.mrf.mxu0  ;;  %v8662_v59 = vld [vmem:[#allocation6_spill] sm:$0xff] }
 0x1bc   : > { %v6194_v4 = vpop.f32.mrf.mxu1  ;;  %v7976_v45 = vadd.f32 %v6144_v15, %v7752_v10  ;;  %v2394_v10 = vadd.f32 %v7770_v26, %v7582_v55  ;;  %v8665_v15 = vld [vmem:[#allocation24_spill] sm:$0xff] }
 0x1bd   : > { %4743 = vst.msk [vmem:[%s7898_s18 + $0x88] sm:$0xff] %vm4733_vm3, %v4710_v9  ;;  %v4709_v14 = vadd.f32 %v7888_v34, %v3238_v17  ;;  %v3241_v43 = vadd.f32 %v6194_v4, %v2393_v60  ;;  %v2763_v57 = vpop.f32.mrf.mxu0  ;;  %v8664_v60 = vld [vmem:[#allocation15_spill] sm:$0xff] }
 0x1be   : > { %v3121_v37 = vpop.f32.mrf.mxu1  ;;  %v7984_v13 = vadd.f32 %v2763_v57, %v7760_v1  ;;  %v2397_v1 = vadd.f32 %v7774_v31, %v7588_v36  ;;  %v8666_v4 = vld [vmem:[#allocation19_spill] sm:$0xff] }
 0x1bf   : > { %4742 = vst.msk [vmem:[%s7898_s18 + $0x80] sm:$0xff] %vm4733_vm3, %v4709_v14  ;;  %v4712_v54 = vadd.f32 %v7888_v34, %v3241_v43  ;;  %v3240_v16 = vadd.f32 %v3121_v37, %v2392_v47  ;;  %v6147_v48 = vpop.f32.mrf.mxu0  ;;  %v2401_v47 = vadd.f32 %v8666_v4, %v8665_v15  ;;  %v8667_v43 = vld [vmem:[#allocation17_spill] sm:$0xff] }
 0x1c0   : > { %v6197_v0 = vpop.f32.mrf.mxu1  ;;  %v7992_v49 = vadd.f32 %v6147_v48, %v7764_v46  ;;  %v2396_v46 = vadd.f32 %v7782_v40, %v7594_v39  ;;  %v8669_v48 = vld [vmem:[#allocation37_spill] sm:$0xff] }
 0x1c1   : > { %4745 = vst.msk [vmem:[%s7898_s18 + $0xa8] sm:$0xff] %vm4733_vm3, %v4712_v54  ;;  %v4711_v35 = vadd.f32 %v7888_v34, %v3240_v16  ;;  %v3243_v3 = vadd.f32 %v6197_v0, %v2395_v33  ;;  %v2773_v30 = vpop.f32.mrf.mxu0  ;;  %v8668_v16 = vld [vmem:[#allocation7_spill] sm:$0xff] }
 0x1c2   : > { %v3131_v44 = vpop.f32.mrf.mxu1  ;;  %v8000_v55 = vadd.f32 %v2773_v30, %v7772_v24  ;;  %v2399_v24 = vadd.f32 %v7786_v25, %v7600_v19  ;;  %v2400_v0 = vadd.f32 %v8669_v48, %v8668_v16 }
 0x1c3   : > { %4744 = vst.msk [vmem:[%s7898_s18 + $0xa0] sm:$0xff] %vm4733_vm3, %v4711_v35  ;;  %v4714_v38 = vadd.f32 %v7888_v34, %v3243_v3  ;;  %v3242_v26 = vadd.f32 %v3131_v44, %v2394_v10  ;;  %v6150_v56 = vpop.f32.mrf.mxu0  ;;  %v8670_v35 = vld [vmem:[#allocation35_spill] sm:$0xff] }
 0x1c4   : > { %v6200_v52 = vpop.f32.mrf.mxu1  ;;  %v8008_v36 = vadd.f32 %v6150_v56, %v7776_v53  ;;  %v8663_v53 = vld [vmem:[#allocation16_spill] sm:$0xff] }
 0x1c5   : > { %4747 = vst.msk [vmem:[%s7898_s18 + $0xc8] sm:$0xff] %vm4733_vm3, %v4714_v38  ;;  %v4713_v22 = vadd.f32 %v7888_v34, %v3242_v26  ;;  %v3245_v31 = vadd.f32 %v6200_v52, %v2397_v1  ;;  %v2783_v28 = vpop.f32.mrf.mxu0  ;;  %v2398_v21 = vadd.f32 %v8663_v53, %v8662_v59  ;;  %v8672_v38 = vld [vmem:[#allocation25_spill] sm:$0xff]  ;;  %v8673_v26 = vld [vmem:[#allocation18_spill] sm:$0xff] }
 0x1c6   : > { %v3141_v51 = vpop.f32.mrf.mxu1  ;;  %v8016_v39 = vadd.f32 %v2783_v28, %v8661_v29  ;;  %v2403_v56 = vadd.f32 %v8673_v26, %v8672_v38  ;;  %v8689_v38 = vld [vmem:[#allocation34_spill] sm:$0xff] }
 0x1c7   : > { %4746 = vst.msk [vmem:[%s7898_s18 + $0xc0] sm:$0xff] %vm4733_vm3, %v4713_v22  ;;  %v4716_v42 = vadd.f32 %v7888_v34, %v3245_v31  ;;  %v3244_v40 = vadd.f32 %v3141_v51, %v2396_v46  ;;  %v6153_v12 = vpop.f32.mrf.mxu0  ;;  %v8674_v46 = vld [vmem:[#allocation31_spill] sm:$0xff] }
 0x1c8   : > { %v6203_v8 = vpop.f32.mrf.mxu1  ;;  %v8024_v19 = vadd.f32 %v6153_v12, %v8664_v60  ;;  %v8678_v12 = vld [vmem:[#allocation32_spill] sm:$0xff]  ;;  %v8681_v60 = vld [vmem:[#allocation3_spill] sm:$0xff] }
 0x1c9   : > { %4749 = vst.msk [vmem:[%s7898_s18 + $0xe8] sm:$0xff] %vm4733_vm3, %v4716_v42  ;;  %v4715_v18 = vadd.f32 %v7888_v34, %v3244_v40  ;;  %v3247_v25 = vadd.f32 %v6203_v8, %v2399_v24  ;;  %v2793_v9 = vpop.f32.mrf.mxu0  ;;  %v8676_v24 = vld [vmem:[#allocation8_spill] sm:$0xff] }
 0x1ca   : > { %v3151_v17 = vpop.f32.mrf.mxu1  ;;  %v8032_v57 = vadd.f32 %v2793_v9, %v8667_v43  ;;  %v8677_v42 = vld [vmem:[#allocation20_spill] sm:$0xff]  ;;  %v8684_v43 = vld [vmem:[#allocation9_spill] sm:$0xff] }
 0x1cb   : > { %4748 = vst.msk [vmem:[%s7898_s18 + $0xe0] sm:$0xff] %vm4733_vm3, %v4715_v18  ;;  %v4718_v14 = vadd.f32 %v7888_v34, %v3247_v25  ;;  %v3246_v37 = vadd.f32 %v3151_v17, %v2398_v21  ;;  %v6156_v33 = vpop.f32.mrf.mxu0  ;;  %v2402_v29 = vadd.f32 %v8677_v42, %v8676_v24  ;;  %v8680_v18 = vld [vmem:[#allocation26_spill] sm:$0xff]  ;;  %v8682_v17 = vld [vmem:[#allocation33_spill] sm:$0xff] }
 0x1cc   : > { %v6206_v54 = vpop.f32.mrf.mxu1  ;;  %v8040_v3 = vadd.f32 %v6156_v33, %v8670_v35  ;;  %v2405_v25 = vadd.f32 %v8681_v60, %v8680_v18  ;;  %v8687_v35 = vld [vmem:[#allocation27_spill] sm:$0xff] }
 0x1cd   : > { %4751 = vst.msk [vmem:[%s7898_s18 + $0x108] sm:$0xff] %vm4733_vm3, %v4718_v14  ;;  %v4717_v10 = vadd.f32 %v7888_v34, %v3246_v37  ;;  %v3249_v30 = vadd.f32 %v6206_v54, %v2401_v47  ;;  %v2803_v44 = vpop.f32.mrf.mxu0  ;;  %v2404_v37 = vadd.f32 %v7830_v6, %v8684_v43  ;;  %v8685_v54 = vld [vmem:[#allocation21_spill] sm:$0xff] }
 0x1ce   : > { %8671 = vst [vmem:[#allocation14_spill] sm:$0xff] %v8040_v3  ;;  %v3161_v1 = vpop.f32.mrf.mxu1  ;;  %v8048_v22 = vadd.f32 %v2803_v44, %v8674_v46  ;;  %v8691_v46 = vld [vmem:[#allocation10_spill] sm:$0xff] }
 0x1cf   : > { %4750 = vst.msk [vmem:[%s7898_s18 + $0x100] sm:$0xff] %vm4733_vm3, %v4717_v10  ;;  %v4720_v52 = vadd.f32 %v7888_v34, %v3249_v30  ;;  %v3248_v31 = vadd.f32 %v3161_v1, %v2400_v0  ;;  %v6159_v28 = vpop.f32.mrf.mxu0  ;;  %v8688_v30 = vld [vmem:[#allocation22_spill] sm:$0xff] }
 0x1d0   : > { %8675 = vst [vmem:[#allocation6_spill] sm:$0xff] %v8048_v22  ;;  %v6209_v51 = vpop.f32.mrf.mxu1  ;;  %v8056_v8 = vadd.f32 %v6159_v28, %v8678_v12  ;;  %v2407_v44 = vadd.f32 %v8688_v30, %v8687_v35  ;;  %v8694_v12 = vld [vmem:[#allocation28_spill] sm:$0xff] }
 0x1d1   : > { %4753 = vst.msk [vmem:[%s7898_s18 + $0x128] sm:$0xff] %vm4733_vm3, %v4720_v52  ;;  %v4719_v40 = vadd.f32 %v7888_v34, %v3248_v31  ;;  %v3251_v59 = vadd.f32 %v6209_v51, %v2403_v56  ;;  %v2813_v53 = vpop.f32.mrf.mxu0  ;;  %v2406_v31 = vadd.f32 %v7842_v32, %v8691_v46  ;;  %v8692_v51 = vld [vmem:[#allocation36_spill] sm:$0xff] }
 0x1d2   : > { %8679 = vst [vmem:[#allocation16_spill] sm:$0xff] %v8056_v8  ;;  %v3171_v21 = vpop.f32.mrf.mxu1  ;;  %v8064_v15 = vadd.f32 %v2813_v53, %v8682_v17 }
 0x1d3   : > { %4752 = vst.msk [vmem:[%s7898_s18 + $0x120] sm:$0xff] %vm4733_vm3, %v4719_v40  ;;  %v4722_v9 = vadd.f32 %v7888_v34, %v3251_v59  ;;  %v3250_v4 = vadd.f32 %v3171_v21, %v2402_v29  ;;  %v6162_v47 = vpop.f32.mrf.mxu0  ;;  %v2409_v59 = vadd.f32 %v7846_v2, %v8694_v12  ;;  %v8695_v21 = vld [vmem:[#allocation5_spill] sm:$0xff] }
 0x1d4   : > { %8683 = vst [vmem:[#allocation15_spill] sm:$0xff] %v8064_v15  ;;  %v6212_v14 = vpop.f32.mrf.mxu1  ;;  %v8072_v16 = vadd.f32 %v6162_v47, %v8685_v54  ;;  %v8698_v47 = vld [vmem:[#allocation4_spill] sm:$0xff]  ;;  %v8701_v54 = vld [vmem:[#allocation38_spill] sm:$0xff] }
 0x1d5   : > { %4755 = vst.msk [vmem:[%s7898_s18 + $0x148] sm:$0xff] %vm4733_vm3, %v4722_v9  ;;  %v4721_v33 = vadd.f32 %v7888_v34, %v3250_v4  ;;  %v3253_v48 = vadd.f32 %v6212_v14, %v2405_v25  ;;  %v2823_v0 = vpop.f32.mrf.mxu0  ;;  %v8697_v9 = vld [vmem:[#allocation11_spill] sm:$0xff] }
 0x1d6   : > { %8686 = vst [vmem:[#allocation24_spill] sm:$0xff] %v8072_v16  ;;  %v3181_v10 = vpop.f32.mrf.mxu1  ;;  %v8080_v6 = vadd.f32 %v2823_v0, %v8689_v38  ;;  %v2408_v17 = vadd.f32 %v7855_v20, %v8697_v9 }
 0x1d7   : > { %4754 = vst.msk [vmem:[%s7898_s18 + $0x140] sm:$0xff] %vm4733_vm3, %v4721_v33  ;;  %v4724_v1 = vadd.f32 %v7888_v34, %v3253_v48  ;;  %v3252_v26 = vadd.f32 %v3181_v10, %v2404_v37  ;;  %v6165_v56 = vpop.f32.mrf.mxu0  ;;  %v8700_v33 = vld [vmem:[#allocation29_spill] sm:$0xff]  ;;  %v8702_v10 = vld [vmem:[#allocation23_spill] sm:$0xff] }
 0x1d8   : > { %8690 = vst [vmem:[#allocation19_spill] sm:$0xff] %v8080_v6  ;;  %v6215_v52 = vpop.f32.mrf.mxu1  ;;  %v8088_v24 = vadd.f32 %v6165_v56, %v8692_v51  ;;  %v2411_v48 = vadd.f32 %v8701_v54, %v8700_v33  ;;  %v8707_v51 = vld [vmem:[#allocation40_spill] sm:$0xff] }
 0x1d9   : > { %4757 = vst.msk [vmem:[%s7898_s18 + $0x168] sm:$0xff] %vm4733_vm3, %v4724_v1  ;;  %v4723_v28 = vadd.f32 %v7888_v34, %v3252_v26  ;;  %v3255_v42 = vadd.f32 %v6215_v52, %v2407_v44  ;;  %v2833_v29 = vpop.f32.mrf.mxu0  ;;  %v8704_v1 = vld [vmem:[#allocation12_spill] sm:$0xff] }
 0x1da   : > { %8693 = vst [vmem:[#allocation17_spill] sm:$0xff] %v8088_v24  ;;  %v3191_v40 = vpop.f32.mrf.mxu1  ;;  %v8096_v32 = vadd.f32 %v2833_v29, %v8695_v21  ;;  %v2410_v38 = vadd.f32 %v7868_v50, %v8704_v1  ;;  %v8711_v21 = vld [vmem:[#allocation42_spill] sm:$0xff] }
 0x1db   : > { %4756 = vst.msk [vmem:[%s7898_s18 + $0x160] sm:$0xff] %vm4733_vm3, %v4723_v28  ;;  %v4726_v53 = vadd.f32 %v7888_v34, %v3255_v42  ;;  %v3254_v18 = vadd.f32 %v3191_v40, %v2406_v31  ;;  %v6168_v60 = vpop.f32.mrf.mxu0  ;;  %v8706_v28 = vld [vmem:[#allocation30_spill] sm:$0xff]  ;;  %v8708_v40 = vld [vmem:[#allocation39_spill] sm:$0xff] }
 0x1dc   : > { %8696 = vst [vmem:[#allocation7_spill] sm:$0xff] %v8096_v32  ;;  %v6218_v25 = vpop.f32.mrf.mxu1  ;;  %v8104_v2 = vadd.f32 %v6168_v60, %v8698_v47  ;;  %v2413_v42 = vadd.f32 %v8707_v51, %v8706_v28 }
 0x1dd   : > { %4759 = vst.msk [vmem:[%s7898_s18 + $0x188] sm:$0xff] %vm4733_vm3, %v4726_v53  ;;  %v4725_v4 = vadd.f32 %v7888_v34, %v3254_v18  ;;  %v3257_v14 = vadd.f32 %v6218_v25, %v2409_v59  ;;  %v2843_v43 = vpop.f32.mrf.mxu0  ;;  %v8712_v25 = vld [vmem:[#allocation41_spill] sm:$0xff] }
 0x1de   : > { %8699 = vst [vmem:[#allocation37_spill] sm:$0xff] %v8104_v2  ;;  %v3201_v37 = vpop.f32.mrf.mxu1  ;;  %v8112_v20 = vadd.f32 %v2843_v43, %v8702_v10  ;;  %v8714_v43 = vld [vmem:[#allocation43_spill] sm:$0xff] }
 0x1df   : > { %4758 = vst.msk [vmem:[%s7898_s18 + $0x180] sm:$0xff] %vm4733_vm3, %v4725_v4  ;;  %v4728_v0 = vadd.f32 %v7888_v34, %v3257_v14  ;;  %v3256_v35 = vadd.f32 %v3201_v37, %v2408_v17  ;;  %v6171_v30 = vpop.f32.mrf.mxu0 }
 0x1e0   : > { %8703 = vst [vmem:[#allocation35_spill] sm:$0xff] %v8112_v20  ;;  %v6221_v44 = vpop.f32.mrf.mxu1  ;;  %v8120_v56 = vadd.f32 %v6171_v30, %v7861_v23  ;;  %v8710_v23 = vld [vmem:[#allocation13_spill] sm:$0xff] }
 0x1e1   : > { %4761 = vst.msk [vmem:[%s7898_s18 + $0x1a8] sm:$0xff] %vm4733_vm3, %v4728_v0  ;;  %v4727_v26 = vadd.f32 %v7888_v34, %v3256_v35  ;;  %v3259_v52 = vadd.f32 %v6221_v44, %v2411_v48  ;;  %v2853_v46 = vpop.f32.mrf.mxu0  ;;  %v2412_v18 = vadd.f32 %v8711_v21, %v8710_v23 }
 0x1e2   : > { %8705 = vst [vmem:[#allocation25_spill] sm:$0xff] %v8120_v56  ;;  %v3211_v31 = vpop.f32.mrf.mxu1  ;;  %v8128_v50 = vadd.f32 %v2853_v46, %v8708_v40 }
 0x1e3   : > { %4760 = vst.msk [vmem:[%s7898_s18 + $0x1a0] sm:$0xff] %vm4733_vm3, %v4727_v26  ;;  %v4730_v29 = vadd.f32 %v7888_v34, %v3259_v52  ;;  %v3258_v12 = vadd.f32 %v3211_v31, %v2410_v38  ;;  %v6174_v59 = vpop.f32.mrf.mxu0 }
 0x1e4   : > { %8709 = vst [vmem:[#allocation18_spill] sm:$0xff] %v8128_v50  ;;  %v6224_v53 = vpop.f32.mrf.mxu1  ;;  %v8136_v9 = vadd.f32 %v6174_v59, %v8712_v25 }
 0x1e5   : > { %4763 = vst.msk [vmem:[%s7898_s18 + $0x1c8] sm:$0xff] %vm4733_vm3, %v4730_v29  ;;  %v4729_v60 = vadd.f32 %v7888_v34, %v3258_v12  ;;  %v3261_v17 = vadd.f32 %v6224_v53, %v2413_v42  ;;  %v2863_v4 = vpop.f32.mrf.mxu0 }
 0x1e6   : > { %8713 = vst [vmem:[#allocation31_spill] sm:$0xff] %v8136_v9  ;;  %v3221_v47 = vpop.f32.mrf.mxu1  ;;  %v8142_v37 = vadd.f32 %v2863_v4, %v8714_v43 }
 0x1e7   : > { %4762 = vst.msk [vmem:[%s7898_s18 + $0x1c0] sm:$0xff] %vm4733_vm3, %v4729_v60  ;;  %v4732_v14 = vadd.f32 %v7888_v34, %v3261_v17  ;;  %v3260_v33 = vadd.f32 %v3221_v47, %v2412_v18  ;;  %v8144_v54 = vpop.f32.mrf.mxu0 }
 0x1e8   : > { %8715 = vst [vmem:[#allocation8_spill] sm:$0xff] %v8142_v37  ;;  %v8146_v48 = vpop.f32.mrf.mxu1 }
 0x1e9   : > { %4765 = vst.msk [vmem:[%s7898_s18 + $0x1e8] sm:$0xff] %vm4733_vm3, %v4732_v14  ;;  %v4731_v0 = vadd.f32 %v7888_v34, %v3260_v33  ;;  %v3333_v10 = vpop.f32.mrf.mxu0 }
 0x1ea   : > { %v8151_v35 = vpop.f32.mrf.mxu1 }
 0x1eb   : > { %4764 = vst.msk [vmem:[%s7898_s18 + $0x1e0] sm:$0xff] %vm4733_vm3, %v4731_v0  ;;  %v8155_v30 = vpop.f32.mrf.mxu0 }
 0x1ec   : > { %v8157_v44 = vpop.f32.mrf.mxu1 }
 0x1ed   : > { %v8159_v1 = vpop.f32.mrf.mxu0 }
 0x1ee   : > { %v8161_v38 = vpop.f32.mrf.mxu1 }
 0x1ef   : > { %v8163_v26 = vpop.f32.mrf.mxu0 }
 0x1f0   : > { %v8165_v52 = vpop.f32.mrf.mxu1 }
 0x1f1   : > { %v8167_v46 = vpop.f32.mrf.mxu0 }
 0x1f2   : > { %v8169_v31 = vpop.f32.mrf.mxu1 }
 0x1f3   : > { %v8171_v28 = vpop.f32.mrf.mxu0 }
 0x1f4   : > { %v8173_v51 = vpop.f32.mrf.mxu1 }
 0x1f5   : > { %v8175_v42 = vpop.f32.mrf.mxu0 }
 0x1f6   : > { %v8177_v29 = vpop.f32.mrf.mxu1 }
 0x1f7   : > { %v8179_v40 = vpop.f32.mrf.mxu0 }
 0x1f8   : > { %v8181_v12 = vpop.f32.mrf.mxu1 }
 0x1f9   : > { %v8183_v59 = vpop.f32.mrf.mxu0 }
 0x1fa   : > { %v8185_v53 = vpop.f32.mrf.mxu1 }
 0x1fb   : > { %v8187_v23 = vpop.f32.mrf.mxu0 }
 0x1fc   : > { %v8189_v21 = vpop.f32.mrf.mxu1 }
 0x1fd   : > { %v8191_v18 = vpop.f32.mrf.mxu0 }
 0x1fe   : > { %v8193_v60 = vpop.f32.mrf.mxu1 }
 0x1ff   : > { %v8195_v25 = vpop.f32.mrf.mxu0 }
 0x200   : > { %v8197_v17 = vpop.f32.mrf.mxu1 }
 0x201   : > { %v8199_v4 = vpop.f32.mrf.mxu0 }
 0x202   : > { %v8201_v47 = vpop.f32.mrf.mxu1 }
 0x203   : > { %v8203_v14 = vpop.f32.mrf.mxu0 }
 0x204   : > { %v8205_v43 = vpop.f32.mrf.mxu1 }
 0x205   : > { %v8207_v33 = vpop.f32.mrf.mxu0 }
 0x206   : > { %v8209_v0 = vpop.f32.mrf.mxu1 }
 0x207   : > { %v8211_v37 = vpop.f32.mrf.mxu0 }
 0x208   : > { %v8213_v9 = vpop.f32.mrf.mxu1 }
 0x209   : > { %8716 = vst [vmem:[#allocation20_spill] sm:$0xff] %v8213_v9  ;;  %v8215_v50 = vpop.f32.mrf.mxu0 }
 0x20a   : > { %v8217_v56 = vpop.f32.mrf.mxu1 }
 0x20b   : > { %8717 = vst [vmem:[#allocation32_spill] sm:$0xff] %v8217_v56  ;;  %v8219_v20 = vpop.f32.mrf.mxu0 }
 0x20c   : > { %8718 = vst [vmem:[#allocation26_spill] sm:$0xff] %v8219_v20  ;;  %v8221_v2 = vpop.f32.mrf.mxu1 }
 0x20d   : > { %8719 = vst [vmem:[#allocation3_spill] sm:$0xff] %v8221_v2  ;;  %v8223_v32 = vpop.f32.mrf.mxu0 }
 0x20e   : > { %8720 = vst [vmem:[#allocation33_spill] sm:$0xff] %v8223_v32  ;;  %v8225_v24 = vpop.f32.mrf.mxu1 }
 0x20f   : > { %8721 = vst [vmem:[#allocation9_spill] sm:$0xff] %v8225_v24  ;;  %v8227_v6 = vpop.f32.mrf.mxu0 }
 0x210   : > { %8722 = vst [vmem:[#allocation21_spill] sm:$0xff] %v8227_v6  ;;  %v8229_v16 = vpop.f32.mrf.mxu1 }
 0x211   : > { %8723 = vst [vmem:[#allocation27_spill] sm:$0xff] %v8229_v16  ;;  %v8231_v15 = vpop.f32.mrf.mxu0 }
 0x212   : > { %8724 = vst [vmem:[#allocation22_spill] sm:$0xff] %v8231_v15  ;;  %v8233_v8 = vpop.f32.mrf.mxu1 }
 0x213   : > { %8725 = vst [vmem:[#allocation34_spill] sm:$0xff] %v8233_v8  ;;  %v8235_v22 = vpop.f32.mrf.mxu0 }
 0x214   : > { %8726 = vst [vmem:[#allocation10_spill] sm:$0xff] %v8235_v22  ;;  %v8237_v3 = vpop.f32.mrf.mxu1 }
 0x215   : > { %8727 = vst [vmem:[#allocation36_spill] sm:$0xff] %v8237_v3  ;;  %v8239_v56 = vpop.f32.mrf.mxu0 }
 0x216   : > { %8728 = vst [vmem:[#allocation28_spill] sm:$0xff] %v8239_v56  ;;  %v8241_v20 = vpop.f32.mrf.mxu1 }
 0x217   : > { %8729 = vst [vmem:[#allocation5_spill] sm:$0xff] %v8241_v20  ;;  %v8243_v2 = vpop.f32.mrf.mxu0 }
 0x218   : > { %8730 = vst [vmem:[#allocation11_spill] sm:$0xff] %v8243_v2  ;;  %v8245_v32 = vpop.f32.mrf.mxu1 }
 0x219   : > { %8731 = vst [vmem:[#allocation4_spill] sm:$0xff] %v8245_v32  ;;  %v8247_v24 = vpop.f32.mrf.mxu0  ;;  %v8742_v32 = vld [vmem:[#allocation44_spill] sm:$0xff] }
 0x21a   : > { %8732 = vst [vmem:[#allocation29_spill] sm:$0xff] %v8247_v24  ;;  %v8249_v6 = vpop.f32.mrf.mxu1  ;;  %v3493_v24 = vadd.f32 %v8144_v54, %v8742_v32  ;;  %v3494_v32 = vadd.f32 %v8159_v1, %v7920_v11 }
 0x21b   : > { %8733 = vst [vmem:[#allocation38_spill] sm:$0xff] %v8249_v6  ;;  %v8251_v16 = vpop.f32.mrf.mxu0 }
 0x21c   : > { %8734 = vst [vmem:[#allocation23_spill] sm:$0xff] %v8251_v16  ;;  %v8253_v15 = vpop.f32.mrf.mxu1 }
 0x21d   : > { %8735 = vst [vmem:[#allocation12_spill] sm:$0xff] %v8253_v15  ;;  %v8255_v8 = vpop.f32.mrf.mxu0  ;;  %v3492_v15 = vadd.f32 %v3333_v10, %v7904_v63  ;;  %v3497_v63 = vadd.f32 %v8163_v26, %v7928_v62 }
 0x21e   : > { %8736 = vst [vmem:[#allocation30_spill] sm:$0xff] %v8255_v8  ;;  %v8257_v22 = vpop.f32.mrf.mxu1 }
 0x21f   : > { %8737 = vst [vmem:[#allocation40_spill] sm:$0xff] %v8257_v22  ;;  %v8259_v3 = vpop.f32.mrf.mxu0  ;;  %v3883_v9 = vadd.f32 %v8151_v35, %v3492_v15  ;;  %v3885_v15 = vadd.f32 %v8161_v38, %v3494_v32  ;;  %v3888_v62 = vadd.f32 %v8165_v52, %v3497_v63 }
 0x220   : > { %8738 = vst [vmem:[#allocation39_spill] sm:$0xff] %v8259_v3  ;;  %v8261_v56 = vpop.f32.mrf.mxu1  ;;  %v3884_v3 = vadd.f32 %v8146_v48, %v3493_v24 }
 0x221   : > { %8739 = vst [vmem:[#allocation13_spill] sm:$0xff] %v8261_v56  ;;  %v8263_v20 = vpop.f32.mrf.mxu0  ;;  %v3495_v56 = vadd.f32 %v8155_v30, %v7912_v5  ;;  %v3496_v5 = vadd.f32 %v8167_v46, %v7936_v27  ;;  %v3501_v46 = vadd.f32 %v8179_v40, %v7960_v58 }
 0x222   : > { %8740 = vst [vmem:[#allocation42_spill] sm:$0xff] %v8263_v20  ;;  %v8265_v2 = vpop.f32.mrf.mxu1 }
 0x223   : > { %8741 = vst [vmem:[#allocation41_spill] sm:$0xff] %v8265_v2  ;;  %v8269_v6 = vpop.f32.mrf.mxu0 }
 0x224   : > { %v8271_v16 = vpop.f32.mrf.mxu1 }
 0x225   : > { %8743 = vst [vmem:[#allocation43_spill] sm:$0xff] %v8271_v16  ;;  %v8274_v8 = vpop.f32.mrf.mxu0 }
 0x226   : > { %8744 = vst [vmem:[#allocation44_spill] sm:$0xff] %v8274_v8  ;;  %v8276_v22 = vpop.f32.mrf.mxu1 }
 0x227   : > { %8745 = vst [vmem:[#allocation45_spill] sm:$0xff] %v8276_v22  ;;  %v6329_v20 = vpop.f32.mrf.mxu0  ;;  %v3886_v22 = vadd.f32 %v8157_v44, %v3495_v56  ;;  %v3887_v44 = vadd.f32 %v8169_v31, %v3496_v5 }
 0x228   : > { %v6379_v2 = vpop.f32.mrf.mxu1  ;;  %v4274_v54 = vadd.f32 %v6329_v20, %v3884_v3 }
 0x229   : > { %v4114_v10 = vpop.f32.mrf.mxu0 }
 0x22a   : > { %v4504_v16 = vpop.f32.mrf.mxu1  ;;  %v4664_v24 = vadd.f32 %v6379_v2, %v4274_v54  ;;  %v4273_v48 = vadd.f32 %v4114_v10, %v3883_v9  ;;  %v3499_v2 = vadd.f32 %v8171_v28, %v7944_v7  ;;  %v3500_v54 = vadd.f32 %v8183_v59, %v7968_v41 }
 0x22b   : > { %v6332_v30 = vpop.f32.mrf.mxu0 }
 0x22c   : > { %v6382_v8 = vpop.f32.mrf.mxu1  ;;  %v4767_v11 = vadd.f32 %v7888_v34, %v4664_v24  ;;  %v4663_v3 = vadd.f32 %v4504_v16, %v4273_v48  ;;  %v4276_v20 = vadd.f32 %v6332_v30, %v3886_v22  ;;  %v3498_v22 = vadd.f32 %v8175_v42, %v7952_v61 }
 0x22d   : > { %v4124_v35 = vpop.f32.mrf.mxu0  ;;  %v3890_v32 = vadd.f32 %v8173_v51, %v3499_v2  ;;  %v3892_v48 = vadd.f32 %v8181_v12, %v3501_v46 }
 0x22e   : > { %v4514_v1 = vpop.f32.mrf.mxu1  ;;  %5391 = vst.msk [vmem:[%s7898_s18 + $0x18] sm:$0xff] %vm4733_vm3, %v4767_v11  ;;  %v4766_v27 = vadd.f32 %v7888_v34, %v4663_v3  ;;  %v4666_v56 = vadd.f32 %v6382_v8, %v4276_v20  ;;  %v4275_v9 = vadd.f32 %v4124_v35, %v3885_v15  ;;  %v3889_v24 = vadd.f32 %v8177_v29, %v3498_v22 }
 0x22f   : > { %v6335_v38 = vpop.f32.mrf.mxu0  ;;  %v3503_v15 = vadd.f32 %v8187_v23, %v7976_v45  ;;  %v3891_v11 = vadd.f32 %v8185_v53, %v3500_v54  ;;  %v3505_v35 = vadd.f32 %v8195_v25, %v7992_v49  ;;  %v3508_v54 = vadd.f32 %v8215_v50, %v8032_v57 }
 0x230   : > { %v6385_v26 = vpop.f32.mrf.mxu1  ;;  %5390 = vst.msk [vmem:[%s7898_s18 + $0x10] sm:$0xff] %vm4733_vm3, %v4766_v27  ;;  %v4769_v16 = vadd.f32 %v7888_v34, %v4666_v56  ;;  %v4665_v7 = vadd.f32 %v4514_v1, %v4275_v9  ;;  %v4278_v52 = vadd.f32 %v6335_v38, %v3888_v62  ;;  %v3502_v62 = vadd.f32 %v8191_v18, %v7984_v13 }
 0x231   : > { %v4134_v28 = vpop.f32.mrf.mxu0  ;;  %v3894_v27 = vadd.f32 %v8189_v21, %v3503_v15  ;;  %v3504_v56 = vadd.f32 %v8199_v4, %v8000_v55 }
 0x232   : > { %v4524_v8 = vpop.f32.mrf.mxu1  ;;  %5393 = vst.msk [vmem:[%s7898_s18 + $0x38] sm:$0xff] %vm4733_vm3, %v4769_v16  ;;  %v4768_v31 = vadd.f32 %v7888_v34, %v4665_v7  ;;  %v4668_v61 = vadd.f32 %v6385_v26, %v4278_v52  ;;  %v4277_v42 = vadd.f32 %v4134_v28, %v3887_v44  ;;  %v3893_v38 = vadd.f32 %v8193_v60, %v3502_v62 }
 0x233   : > { %v6338_v63 = vpop.f32.mrf.mxu0  ;;  %v3896_v26 = vadd.f32 %v8197_v17, %v3505_v35  ;;  %v3507_v7 = vadd.f32 %v8203_v14, %v8008_v36  ;;  %v3895_v52 = vadd.f32 %v8201_v47, %v3504_v56  ;;  %v8752_v35 = vld [vmem:[#allocation16_spill] sm:$0xff] }
 0x234   : > { %v6388_v10 = vpop.f32.mrf.mxu1  ;;  %5392 = vst.msk [vmem:[%s7898_s18 + $0x30] sm:$0xff] %vm4733_vm3, %v4768_v31  ;;  %v4771_v58 = vadd.f32 %v7888_v34, %v4668_v61  ;;  %v4667_v51 = vadd.f32 %v4524_v8, %v4277_v42  ;;  %v4280_v40 = vadd.f32 %v6338_v63, %v3890_v32  ;;  %v3506_v8 = vadd.f32 %v8207_v33, %v8016_v39 }
 0x235   : > { %v4144_v5 = vpop.f32.mrf.mxu0  ;;  %v3509_v32 = vadd.f32 %v8211_v37, %v8024_v19  ;;  %v3898_v42 = vadd.f32 %v8205_v43, %v3507_v7 }
 0x236   : > { %v4534_v30 = vpop.f32.mrf.mxu1  ;;  %5395 = vst.msk [vmem:[%s7898_s18 + $0x58] sm:$0xff] %vm4733_vm3, %v4771_v58  ;;  %v4770_v41 = vadd.f32 %v7888_v34, %v4667_v51  ;;  %v4670_v29 = vadd.f32 %v6388_v10, %v4280_v40  ;;  %v4279_v59 = vadd.f32 %v4144_v5, %v3889_v24  ;;  %v3897_v24 = vadd.f32 %v8209_v0, %v3506_v8  ;;  %v8746_v58 = vld [vmem:[#allocation20_spill] sm:$0xff]  ;;  %v8747_v5 = vld [vmem:[#allocation14_spill] sm:$0xff] }
 0x237   : > { %v6341_v3 = vpop.f32.mrf.mxu0  ;;  %v3900_v51 = vadd.f32 %v8746_v58, %v3509_v32  ;;  %v8759_v8 = vld [vmem:[#allocation24_spill] sm:$0xff] }
 0x238   : > { %v6391_v20 = vpop.f32.mrf.mxu1  ;;  %5394 = vst.msk [vmem:[%s7898_s18 + $0x50] sm:$0xff] %vm4733_vm3, %v4770_v41  ;;  %v4773_v12 = vadd.f32 %v7888_v34, %v4670_v29  ;;  %v4669_v45 = vadd.f32 %v4534_v30, %v4279_v59  ;;  %v4282_v23 = vadd.f32 %v6341_v3, %v3892_v48  ;;  %v8748_v30 = vld [vmem:[#allocation26_spill] sm:$0xff]  ;;  %v8749_v41 = vld [vmem:[#allocation32_spill] sm:$0xff] }
 0x239   : > { %v4154_v1 = vpop.f32.mrf.mxu0  ;;  %v3511_v15 = vadd.f32 %v8748_v30, %v8747_v5  ;;  %v3899_v29 = vadd.f32 %v8749_v41, %v3508_v54  ;;  %v8750_v3 = vld [vmem:[#allocation6_spill] sm:$0xff]  ;;  %v8763_v54 = vld [vmem:[#allocation28_spill] sm:$0xff] }
 0x23a   : > { %v4544_v2 = vpop.f32.mrf.mxu1  ;;  %5397 = vst.msk [vmem:[%s7898_s18 + $0x78] sm:$0xff] %vm4733_vm3, %v4773_v12  ;;  %v4772_v53 = vadd.f32 %v7888_v34, %v4669_v45  ;;  %v4672_v13 = vadd.f32 %v6391_v20, %v4282_v23  ;;  %v4281_v18 = vadd.f32 %v4154_v1, %v3891_v11  ;;  %v8751_v20 = vld [vmem:[#allocation33_spill] sm:$0xff] }
 0x23b   : > { %v6344_v9 = vpop.f32.mrf.mxu0  ;;  %v3510_v62 = vadd.f32 %v8751_v20, %v8750_v3  ;;  %v8753_v1 = vld [vmem:[#allocation21_spill] sm:$0xff] }
 0x23c   : > { %v6394_v44 = vpop.f32.mrf.mxu1  ;;  %5396 = vst.msk [vmem:[%s7898_s18 + $0x70] sm:$0xff] %vm4733_vm3, %v4772_v53  ;;  %v4775_v49 = vadd.f32 %v7888_v34, %v4672_v13  ;;  %v4671_v21 = vadd.f32 %v4544_v2, %v4281_v18  ;;  %v4284_v25 = vadd.f32 %v6344_v9, %v3894_v27  ;;  %v3513_v2 = vadd.f32 %v8753_v1, %v8752_v35  ;;  %v8754_v13 = vld [vmem:[#allocation3_spill] sm:$0xff] }
 0x23d   : > { %v4164_v22 = vpop.f32.mrf.mxu0  ;;  %v3902_v18 = vadd.f32 %v8754_v13, %v3511_v15 }
 0x23e   : > { %v4554_v16 = vpop.f32.mrf.mxu1  ;;  %5399 = vst.msk [vmem:[%s7898_s18 + $0x98] sm:$0xff] %vm4733_vm3, %v4775_v49  ;;  %v4774_v55 = vadd.f32 %v7888_v34, %v4671_v21  ;;  %v4674_v60 = vadd.f32 %v6394_v44, %v4284_v25  ;;  %v4283_v4 = vadd.f32 %v4164_v22, %v3893_v38  ;;  %v8755_v38 = vld [vmem:[#allocation15_spill] sm:$0xff]  ;;  %v8756_v49 = vld [vmem:[#allocation22_spill] sm:$0xff]  ;;  %v8757_v22 = vld [vmem:[#allocation9_spill] sm:$0xff] }
 0x23f   : > { %v6347_v46 = vpop.f32.mrf.mxu0  ;;  %v3512_v21 = vadd.f32 %v8756_v49, %v8755_v38 }
 0x240   : > { %v6397_v28 = vpop.f32.mrf.mxu1  ;;  %5398 = vst.msk [vmem:[%s7898_s18 + $0x90] sm:$0xff] %vm4733_vm3, %v4774_v55  ;;  %v4777_v17 = vadd.f32 %v7888_v34, %v4674_v60  ;;  %v4673_v36 = vadd.f32 %v4554_v16, %v4283_v4  ;;  %v4286_v14 = vadd.f32 %v6347_v46, %v3896_v26  ;;  %v3901_v16 = vadd.f32 %v8757_v22, %v3510_v62  ;;  %v8758_v4 = vld [vmem:[#allocation27_spill] sm:$0xff] }
 0x241   : > { %v4174_v31 = vpop.f32.mrf.mxu0 }
 0x242   : > { %v4564_v61 = vpop.f32.mrf.mxu1  ;;  %5401 = vst.msk [vmem:[%s7898_s18 + $0xb8] sm:$0xff] %vm4733_vm3, %v4777_v17  ;;  %v4776_v47 = vadd.f32 %v7888_v34, %v4673_v36  ;;  %v4676_v39 = vadd.f32 %v6397_v28, %v4286_v14  ;;  %v4285_v33 = vadd.f32 %v4174_v31, %v3895_v52  ;;  %v3904_v52 = vadd.f32 %v8758_v4, %v3513_v2  ;;  %v8760_v17 = vld [vmem:[#allocation10_spill] sm:$0xff]  ;;  %v8771_v2 = vld [vmem:[#allocation37_spill] sm:$0xff] }
 0x243   : > { %v6350_v63 = vpop.f32.mrf.mxu0  ;;  %v3515_v36 = vadd.f32 %v8760_v17, %v8759_v8 }
 0x244   : > { %v6400_v10 = vpop.f32.mrf.mxu1  ;;  %5400 = vst.msk [vmem:[%s7898_s18 + $0xb0] sm:$0xff] %vm4733_vm3, %v4776_v47  ;;  %v4779_v19 = vadd.f32 %v7888_v34, %v4676_v39  ;;  %v4675_v37 = vadd.f32 %v4564_v61, %v4285_v33  ;;  %v4288_v43 = vadd.f32 %v6350_v63, %v3898_v42  ;;  %v8761_v61 = vld [vmem:[#allocation34_spill] sm:$0xff]  ;;  %v8762_v33 = vld [vmem:[#allocation19_spill] sm:$0xff] }
 0x245   : > { %v4184_v40 = vpop.f32.mrf.mxu0  ;;  %v3903_v42 = vadd.f32 %v8761_v61, %v3512_v21  ;;  %v3514_v63 = vadd.f32 %v8763_v54, %v8762_v33  ;;  %v8774_v21 = vld [vmem:[#allocation35_spill] sm:$0xff] }
 0x246   : > { %v4574_v48 = vpop.f32.mrf.mxu1  ;;  %5403 = vst.msk [vmem:[%s7898_s18 + $0xd8] sm:$0xff] %vm4733_vm3, %v4779_v19  ;;  %v4778_v57 = vadd.f32 %v7888_v34, %v4675_v37  ;;  %v4678_v50 = vadd.f32 %v6400_v10, %v4288_v43  ;;  %v4287_v0 = vadd.f32 %v4184_v40, %v3897_v24  ;;  %v8764_v37 = vld [vmem:[#allocation17_spill] sm:$0xff]  ;;  %v8765_v43 = vld [vmem:[#allocation11_spill] sm:$0xff] }
 0x247   : > { %v6353_v59 = vpop.f32.mrf.mxu0  ;;  %v3517_v58 = vadd.f32 %v8765_v43, %v8764_v37 }
 0x248   : > { %v6403_v11 = vpop.f32.mrf.mxu1  ;;  %5402 = vst.msk [vmem:[%s7898_s18 + $0xd0] sm:$0xff] %vm4733_vm3, %v4778_v57  ;;  %v4781_v12 = vadd.f32 %v7888_v34, %v4678_v50  ;;  %v4677_v45 = vadd.f32 %v4574_v48, %v4287_v0  ;;  %v4290_v23 = vadd.f32 %v6353_v59, %v3900_v51  ;;  %v8766_v48 = vld [vmem:[#allocation36_spill] sm:$0xff]  ;;  %v8767_v50 = vld [vmem:[#allocation7_spill] sm:$0xff]  ;;  %v8768_v0 = vld [vmem:[#allocation29_spill] sm:$0xff] }
 0x249   : > { %v4194_v27 = vpop.f32.mrf.mxu0  ;;  %v3906_v5 = vadd.f32 %v8766_v48, %v3515_v36  ;;  %v3516_v41 = vadd.f32 %v8768_v0, %v8767_v50  ;;  %v8785_v0 = vld [vmem:[#allocation8_spill] sm:$0xff] }
 0x24a   : > { %v4584_v53 = vpop.f32.mrf.mxu1  ;;  %5405 = vst.msk [vmem:[%s7898_s18 + $0xf8] sm:$0xff] %vm4733_vm3, %v4781_v12  ;;  %v4780_v56 = vadd.f32 %v7888_v34, %v4677_v45  ;;  %v4680_v9 = vadd.f32 %v6403_v11, %v4290_v23  ;;  %v4289_v44 = vadd.f32 %v4194_v27, %v3899_v29  ;;  %v8769_v11 = vld [vmem:[#allocation5_spill] sm:$0xff]  ;;  %v8770_v45 = vld [vmem:[#allocation4_spill] sm:$0xff]  ;;  %v8772_v27 = vld [vmem:[#allocation23_spill] sm:$0xff] }
 0x24b   : > { %v6356_v25 = vpop.f32.mrf.mxu0  ;;  %v3905_v3 = vadd.f32 %v8769_v11, %v3514_v63  ;;  %v3908_v23 = vadd.f32 %v8770_v45, %v3517_v58  ;;  %v8783_v58 = vld [vmem:[#allocation31_spill] sm:$0xff] }
 0x24c   : > { %v6406_v26 = vpop.f32.mrf.mxu1  ;;  %5404 = vst.msk [vmem:[%s7898_s18 + $0xf0] sm:$0xff] %vm4733_vm3, %v4780_v56  ;;  %v4783_v7 = vadd.f32 %v7888_v34, %v4680_v9  ;;  %v4679_v55 = vadd.f32 %v4584_v53, %v4289_v44  ;;  %v4292_v60 = vadd.f32 %v6356_v25, %v3902_v18  ;;  %v3519_v53 = vadd.f32 %v8772_v27, %v8771_v2  ;;  %v8773_v9 = vld [vmem:[#allocation38_spill] sm:$0xff]  ;;  %v8788_v27 = vld [vmem:[#allocation45_spill] sm:$0xff] }
 0x24d   : > { %v4204_v46 = vpop.f32.mrf.mxu0  ;;  %v3907_v44 = vadd.f32 %v8773_v9, %v3516_v41  ;;  %v8775_v25 = vld [vmem:[#allocation30_spill] sm:$0xff]  ;;  %v8786_v41 = vld [vmem:[#allocation44_spill] sm:$0xff] }
 0x24e   : > { %v4594_v28 = vpop.f32.mrf.mxu1  ;;  %5407 = vst.msk [vmem:[%s7898_s18 + $0x118] sm:$0xff] %vm4733_vm3, %v4783_v7  ;;  %v4782_v14 = vadd.f32 %v7888_v34, %v4679_v55  ;;  %v4682_v32 = vadd.f32 %v6406_v26, %v4292_v60  ;;  %v4291_v31 = vadd.f32 %v4204_v46, %v3901_v16  ;;  %v3518_v26 = vadd.f32 %v8775_v25, %v8774_v21  ;;  %v8776_v55 = vld [vmem:[#allocation25_spill] sm:$0xff]  ;;  %v8777_v60 = vld [vmem:[#allocation39_spill] sm:$0xff] }
 0x24f   : > { %v6359_v47 = vpop.f32.mrf.mxu0  ;;  %v3521_v4 = vadd.f32 %v8777_v60, %v8776_v55 }
 0x250   : > { %v6409_v39 = vpop.f32.mrf.mxu1  ;;  %5406 = vst.msk [vmem:[%s7898_s18 + $0x110] sm:$0xff] %vm4733_vm3, %v4782_v14  ;;  %v4785_v10 = vadd.f32 %v7888_v34, %v4682_v32  ;;  %v4681_v24 = vadd.f32 %v4594_v28, %v4291_v31  ;;  %v4294_v19 = vadd.f32 %v6359_v47, %v3904_v52  ;;  %v8778_v28 = vld [vmem:[#allocation12_spill] sm:$0xff]  ;;  %v8779_v32 = vld [vmem:[#allocation18_spill] sm:$0xff] }
 0x251   : > { %v4214_v51 = vpop.f32.mrf.mxu0  ;;  %v3910_v8 = vadd.f32 %v8778_v28, %v3519_v53  ;;  %v8780_v31 = vld [vmem:[#allocation42_spill] sm:$0xff] }
 0x252   : > { %v4604_v40 = vpop.f32.mrf.mxu1  ;;  %5409 = vst.msk [vmem:[%s7898_s18 + $0x138] sm:$0xff] %vm4733_vm3, %v4785_v10  ;;  %v4784_v30 = vadd.f32 %v7888_v34, %v4681_v24  ;;  %v4684_v15 = vadd.f32 %v6409_v39, %v4294_v19  ;;  %v4293_v57 = vadd.f32 %v4214_v51, %v3903_v42  ;;  %v3520_v61 = vadd.f32 %v8780_v31, %v8779_v32  ;;  %v8781_v39 = vld [vmem:[#allocation40_spill] sm:$0xff]  ;;  %v8782_v24 = vld [vmem:[#allocation13_spill] sm:$0xff] }
 0x253   : > { %v6362_v29 = vpop.f32.mrf.mxu0  ;;  %v3909_v33 = vadd.f32 %v8781_v39, %v3518_v26  ;;  %v3912_v19 = vadd.f32 %v8782_v24, %v3521_v4  ;;  %v3523_v51 = vadd.f32 %v8269_v6, %v8783_v58  ;;  %v6450_v6 = vld [vmem:[%s8476_s4] ss:$0 sm:$0xff] }
 0x254   : > { %v6412_v59 = vpop.f32.mrf.mxu1  ;;  %5408 = vst.msk [vmem:[%s7898_s18 + $0x130] sm:$0xff] %vm4733_vm3, %v4784_v30  ;;  %v4787_v20 = vadd.f32 %v7888_v34, %v4684_v15  ;;  %v4683_v62 = vadd.f32 %v4604_v40, %v4293_v57  ;;  %v4296_v12 = vadd.f32 %v6362_v29, %v3906_v5  ;;  %v8784_v30 = vld [vmem:[#allocation41_spill] sm:$0xff]  ;;  %v3522_v29 = vadd.f32 %v8786_v41, %v8785_v0 }
 0x255   : > { %v4224_v35 = vpop.f32.mrf.mxu0  ;;  %v3911_v15 = vadd.f32 %v8784_v30, %v3520_v61 }
 0x256   : > { %v4614_v1 = vpop.f32.mrf.mxu1  ;;  %5411 = vst.msk [vmem:[%s7898_s18 + $0x158] sm:$0xff] %vm4733_vm3, %v4787_v20  ;;  %v4786_v13 = vadd.f32 %v7888_v34, %v4683_v62  ;;  %v4686_v18 = vadd.f32 %v6412_v59, %v4296_v12  ;;  %v4295_v56 = vadd.f32 %v4224_v35, %v3905_v3  ;;  %v8787_v62 = vld [vmem:[#allocation43_spill] sm:$0xff]  ;;  %v3913_v53 = vadd.f32 %v8788_v27, %v3522_v29 }
 0x257   : > { %v6365_v38 = vpop.f32.mrf.mxu0  ;;  %v3914_v12 = vadd.f32 %v8787_v62, %v3523_v51 }
 0x258   : > { %v6415_v49 = vpop.f32.mrf.mxu1  ;;  %5410 = vst.msk [vmem:[%s7898_s18 + $0x150] sm:$0xff] %vm4733_vm3, %v4786_v13  ;;  %v4789_v22 = vadd.f32 %v7888_v34, %v4686_v18  ;;  %v4685_v16 = vadd.f32 %v4614_v1, %v4295_v56  ;;  %v4298_v7 = vadd.f32 %v6365_v38, %v3908_v23 }
 0x259   : > { %v4234_v52 = vpop.f32.mrf.mxu0 }
 0x25a   : > { %v4624_v46 = vpop.f32.mrf.mxu1  ;;  %5413 = vst.msk [vmem:[%s7898_s18 + $0x178] sm:$0xff] %vm4733_vm3, %v4789_v22  ;;  %v4788_v17 = vadd.f32 %v7888_v34, %v4685_v16  ;;  %v4688_v36 = vadd.f32 %v6415_v49, %v4298_v7  ;;  %v4297_v14 = vadd.f32 %v4234_v52, %v3907_v44 }
 0x25b   : > { %v6368_v42 = vpop.f32.mrf.mxu0 }
 0x25c   : > { %v6418_v47 = vpop.f32.mrf.mxu1  ;;  %5412 = vst.msk [vmem:[%s7898_s18 + $0x170] sm:$0xff] %vm4733_vm3, %v4788_v17  ;;  %v4791_v54 = vadd.f32 %v7888_v34, %v4688_v36  ;;  %v4687_v63 = vadd.f32 %v4624_v46, %v4297_v14  ;;  %v4300_v10 = vadd.f32 %v6368_v42, %v3910_v8 }
 0x25d   : > { %v4244_v37 = vpop.f32.mrf.mxu0 }
 0x25e   : > { %v4634_v43 = vpop.f32.mrf.mxu1  ;;  %5415 = vst.msk [vmem:[%s7898_s18 + $0x198] sm:$0xff] %vm4733_vm3, %v4791_v54  ;;  %v4790_v40 = vadd.f32 %v7888_v34, %v4687_v63  ;;  %v4690_v48 = vadd.f32 %v6418_v47, %v4300_v10  ;;  %v4299_v5 = vadd.f32 %v4244_v37, %v3909_v33 }
 0x25f   : > { %v6371_v57 = vpop.f32.mrf.mxu0 }
 0x260   : > { %v6421_v50 = vpop.f32.mrf.mxu1  ;;  %5414 = vst.msk [vmem:[%s7898_s18 + $0x190] sm:$0xff] %vm4733_vm3, %v4790_v40  ;;  %v4793_v59 = vadd.f32 %v6450_v6, %v4690_v48  ;;  %v4689_v11 = vadd.f32 %v4634_v43, %v4299_v5  ;;  %v4302_v3 = vadd.f32 %v6371_v57, %v3912_v19 }
 0x261   : > { %v4254_v34 = vpop.f32.mrf.mxu0 }
 0x262   : > { %v4644_v20 = vpop.f32.mrf.mxu1  ;;  %5417 = vst.msk [vmem:[%s7898_s18 + $0x1b8] sm:$0xff] %vm4733_vm3, %v4793_v59  ;;  %v4792_v45 = vadd.f32 %v6450_v6, %v4689_v11  ;;  %v4692_v23 = vadd.f32 %v6421_v50, %v4302_v3  ;;  %v4301_v35 = vadd.f32 %v4254_v34, %v3911_v15 }
 0x263   : > { %v6374_v1 = vpop.f32.mrf.mxu0 }
 0x264   : > { %v6424_v2 = vpop.f32.mrf.mxu1  ;;  %5416 = vst.msk [vmem:[%s7898_s18 + $0x1b0] sm:$0xff] %vm4733_vm3, %v4792_v45  ;;  %v4795_v13 = vadd.f32 %v6450_v6, %v4692_v23  ;;  %v4691_v18 = vadd.f32 %v4644_v20, %v4301_v35  ;;  %v4304_v56 = vadd.f32 %v6374_v1, %v3914_v12 }
 0x265   : > { %v4264_v9 = vpop.f32.mrf.mxu0 }
 0x266   : > { %5419 = vst.msk [vmem:[%s7898_s18 + $0x1d8] sm:$0xff] %vm4733_vm3, %v4795_v13  ;;  %v4794_v44 = vadd.f32 %v6450_v6, %v4691_v18  ;;  %v4694_v38 = vadd.f32 %v6424_v2, %v4304_v56  ;;  %v4303_v49 = vadd.f32 %v4264_v9, %v3913_v53  ;;  %v4654_v21 = vpop.f32.mrf.mxu1 }
 0x268   : > { %5418 = vst.msk [vmem:[%s7898_s18 + $0x1d0] sm:$0xff] %vm4733_vm3, %v4794_v44  ;;  %v4797_v25 = vadd.f32 %v6450_v6, %v4694_v38  ;;  %v4693_v26 = vadd.f32 %v4654_v21, %v4303_v49 }
 0x26a   : > { %5421 = vst.msk [vmem:[%s7898_s18 + $0x1f8] sm:$0xff] %vm4733_vm3, %v4797_v25  ;;  %v4796_v22 = vadd.f32 %v6450_v6, %v4693_v26 }
 0x26c   : > { %5420 = vst.msk [vmem:[%s7898_s18 + $0x1f0] sm:$0xff] %vm4733_vm3, %v4796_v22 }
 0x26d PF: > { %s15_s20 = sadd.s32 1, %s6473_s20   ;;  %s8789_s18 = smov %s6469_s19 }
 0x26e   : > { %p12_p5 = scmp.ge.s32.totalorder %s15_s20, 4   ;;  %s8790_s19 = smov %s8792_s1 }
 0x270   :  { %14 = sbr.rel (!%p12_p5) target bundleno = 2 (0x2), region = 108 }

</bundles_post_ra>
